<compile_context>
chip_gen: v7x
topology: tpu7x:2x2x1
jax: 0.10.0
libtpu: 0.0.40
codegen_flags: <defaults>
</compile_context>

<pallas_src>
import functools
import jax
import jax.numpy as jnp
from jax.experimental import pallas as pl
from jax.experimental.pallas import tpu as pltpu


def _round_up(x, m):
    return ((x + m - 1) // m) * m


def _ln(x, g, b, eps):
    mu = jnp.mean(x, axis=-1, keepdims=True)
    xc = x - mu
    var = jnp.mean(xc * xc, axis=-1, keepdims=True)
    return xc * jax.lax.rsqrt(var + eps) * g + b


# ----------------------------------------------------------------------------
# ONE fused kernel: embed -> L transformer layers -> LN(CLS) -> Linear -> BN1d
# ----------------------------------------------------------------------------
def _encoder_vit_kernel(
        patches_ref, patch_w_ref, tok_ref, mask_ref,
        ln1_g_ref, ln1_b_ref, wqkv_ref, bqkv_ref, wo_ref, bo_ref,
        ln2_g_ref, ln2_b_ref, w1_ref, b1_ref, w2_ref, b2_ref,
        fln_g_ref, fln_b_ref, ew_ref, eb_ref, bn_g_ref, bn_b_ref,
        o_ref, *, batch, s_pad, heads, layers, ln_eps, bn_eps):
    d = patch_w_ref.shape[1]
    dh = d // heads
    scale = dh ** -0.5
    rows = batch * s_pad

    # ---- patch-embed matmul + (CLS + pos + conv-bias) static tokens ----------
    # Zero LHS rows at the CLS/padding slots are intentional (keeps one matmul).
    x = (jnp.dot(patches_ref[...], patch_w_ref[...],
                 preferred_element_type=jnp.float32) + tok_ref[...])     # (rows, D)

    mask = mask_ref[...]                      # (S_pad, S_pad): 0 real / -1e30 pad keys

    # ---- transformer layers (static unrolled loop over L) --------------------
    for l in range(layers):
        # attention block (pre-LN)
        hs = _ln(x, ln1_g_ref[l], ln1_b_ref[l], ln_eps)
        qkv = (jnp.dot(hs, wqkv_ref[l], preferred_element_type=jnp.float32)
               + bqkv_ref[l])                                            # (rows, 3D)
        qkv = qkv.reshape(batch, s_pad, 3 * d)

        ctx_heads = []
        for h in range(heads):
            c0 = h * dh
            q = qkv[:, :, c0:c0 + dh]                                    # (B, S, Dh)
            k = qkv[:, :, d + c0:d + c0 + dh]
            v = qkv[:, :, 2 * d + c0:2 * d + c0 + dh]
            s = (jnp.einsum('bqd,bkd->bqk', q, k,
                            preferred_element_type=jnp.float32) * scale
                 + mask[None, :, :])                                     # (B, S, S)
            m = jnp.max(s, axis=-1, keepdims=True)
            p = jnp.exp(s - m)
            p = p * pl.reciprocal(jnp.sum(p, axis=-1, keepdims=True), approx=True)
            ctx_heads.append(jnp.einsum('bqk,bkd->bqd', p, v,
                                        preferred_element_type=jnp.float32))
        # lane-axis concat -> one full-width output-projection matmul
        ctx = jnp.concatenate(ctx_heads, axis=-1).reshape(rows, d)       # (rows, D)
        x = x + jnp.dot(ctx, wo_ref[l], preferred_element_type=jnp.float32) + bo_ref[l]

        # MLP block (pre-LN)
        hs2 = _ln(x, ln2_g_ref[l], ln2_b_ref[l], ln_eps)
        h1 = jnp.dot(hs2, w1_ref[l], preferred_element_type=jnp.float32) + b1_ref[l]
        # TODO(synk): HF ViT uses exact (erf) GELU; tanh approximation used here for
        # Mosaic-safe lowering (small systematic numerical drift vs. the reference).
        h1 = jax.nn.gelu(h1, approximate=True)
        x = x + jnp.dot(h1, w2_ref[l], preferred_element_type=jnp.float32) + b2_ref[l]

    # ---- final LN (CLS rows only) + embed Linear + BatchNorm1d ---------------
    cls = x.reshape(batch, s_pad, d)[:, 0, :]                            # (B, D)
    hcls = _ln(cls, fln_g_ref[...], fln_b_ref[...], ln_eps)
    feat = jnp.dot(hcls, ew_ref[...], preferred_element_type=jnp.float32) + eb_ref[...]
    # BatchNorm1d, training-mode batch statistics with biased variance (PyTorch fwd).
    # TODO(synk): eval-mode running-stat normalization not modeled.
    mu = jnp.mean(feat, axis=0, keepdims=True)
    var = jnp.mean((feat - mu) * (feat - mu), axis=0, keepdims=True)
    out = (feat - mu) * jax.lax.rsqrt(var + bn_eps) * bn_g_ref[...] + bn_b_ref[...]
    o_ref[...] = out.astype(o_ref.dtype)                                 # (B, E_pad)


# ----------------------------------------------------------------------------
# Glue (layout plumbing in plain JAX)
# ----------------------------------------------------------------------------
def patchify(images, patch):
    """NCHW -> (B, num_patches, C*patch*patch), matching Conv2d(stride=kernel)."""
    b, c, h, w = images.shape
    nh, nw = h // patch, w // patch
    x = images.reshape(b, c, nh, patch, nw, patch)
    x = x.transpose(0, 2, 4, 1, 3, 5)                 # (B, nh, nw, C, p, p)
    return x.reshape(b, nh * nw, c * patch * patch)


def encoder_vit_forward(images, fp, cfg):
    """Equivalent of EncoderViT.forward: ViT -> CLS -> Linear -> BatchNorm1d."""
    b = images.shape[0]
    patches = patchify(images, cfg["patch"])          # (B, N, C*p*p)
    n = patches.shape[1]
    s_real = n + 1
    s_pad = _round_up(s_real, 8)
    # Zero rows at the CLS slot and padding slots so one patch-embed matmul covers
    # every token row; CLS / pos / conv-bias terms live in fp["static_tokens"].
    patches_padded = jnp.pad(patches, ((0, 0), (1, s_pad - s_real), (0, 0)))
    patches_padded = patches_padded.reshape(b * s_pad, -1)

    e_pad = fp["embed_w"].shape[1]
    out_pad = pl.pallas_call(
        functools.partial(_encoder_vit_kernel, batch=b, s_pad=s_pad,
                          heads=cfg["heads"], layers=cfg["layers"],
                          ln_eps=cfg["ln_eps"], bn_eps=cfg["bn_eps"]),
        out_shape=jax.ShapeDtypeStruct((b, e_pad), jnp.float32),
        compiler_params=pltpu.CompilerParams(vmem_limit_bytes=32 * 1024 * 1024),
    )(patches_padded, fp["patch_w"], fp["static_tokens"], fp["mask"],
      fp["ln1_g"], fp["ln1_b"], fp["wqkv"], fp["bqkv"], fp["wo"], fp["bo"],
      fp["ln2_g"], fp["ln2_b"], fp["w1"], fp["b1"], fp["w2"], fp["b2"],
      fp["ln_g"], fp["ln_b"], fp["embed_w"], fp["embed_b"],
      fp["bn_g"], fp["bn_b"])
    return out_pad[:, :cfg["embed_size"]]


def prepare_params(params, cfg, batch):
    """Fuse / stack / pad PyTorch-style parameters once, outside the forward pass."""
    d = cfg["hidden"]
    e = cfg["embed_size"]
    e_pad = _round_up(e, 128)
    s_real = (cfg["image"] // cfg["patch"]) ** 2 + 1
    s_pad = _round_up(s_real, 8)

    # Static additive tokens (cls+pos0 / patch_bias+pos_i / 0), pre-tiled to B*S_pad.
    pos = params["pos"][0]                                       # (S_real, D)
    cls_row = params["cls"].reshape(1, d) + pos[0:1]
    patch_rows = pos[1:] + params["patch_b"].reshape(1, d)
    pad_rows = jnp.zeros((s_pad - s_real, d), jnp.float32)
    static_tokens = jnp.concatenate([cls_row, patch_rows, pad_rows], axis=0)
    static_tokens = jnp.tile(static_tokens, (batch, 1))          # (B*S_pad, D)

    # Precomputed key-padding mask (columns >= s_real get -1e30).
    key_id = jax.lax.broadcasted_iota(jnp.int32, (s_pad, s_pad), 1)
    mask = jnp.where(key_id < s_real, 0.0, -1e30).astype(jnp.float32)

    layers = params["layers"]

    def stk(name, shape):
        return jnp.stack([lp[name].reshape(shape) for lp in layers], axis=0)

    fp = {
        "patch_w": params["patch_w"],
        "static_tokens": static_tokens,
        "mask": mask,
        # per-layer weights stacked along a leading L axis
        "ln1_g": stk("ln1_g", (1, d)), "ln1_b": stk("ln1_b", (1, d)),
        "wqkv": jnp.stack([jnp.concatenate([lp["wq"], lp["wk"], lp["wv"]], axis=1)
                           for lp in layers], axis=0),
        "bqkv": jnp.stack([jnp.concatenate([lp["bq"], lp["bk"], lp["bv"]]).reshape(1, 3 * d)
                           for lp in layers], axis=0),
        "wo": stk("wo", (d, d)), "bo": stk("bo", (1, d)),
        "ln2_g": stk("ln2_g", (1, d)), "ln2_b": stk("ln2_b", (1, d)),
        "w1": stk("w1", (d, cfg["mlp"])), "b1": stk("b1", (1, cfg["mlp"])),
        "w2": stk("w2", (cfg["mlp"], d)), "b2": stk("b2", (1, d)),
        # head params, padded to 128 lanes for a lane-dense output store
        "ln_g": params["ln_g"].reshape(1, d), "ln_b": params["ln_b"].reshape(1, d),
        "embed_w": jnp.zeros((d, e_pad), jnp.float32).at[:, :e].set(params["embed_w"]),
        "embed_b": jnp.zeros((1, e_pad), jnp.float32).at[:, :e].set(
            params["embed_b"].reshape(1, e)),
        "bn_g": jnp.ones((1, e_pad), jnp.float32).at[:, :e].set(
            params["bn_g"].reshape(1, e)),
        "bn_b": jnp.zeros((1, e_pad), jnp.float32).at[:, :e].set(
            params["bn_b"].reshape(1, e)),
    }
    return fp


# ----------------------------------------------------------------------------
# Deterministic parameter initialization (shapes implied by the module)
# ----------------------------------------------------------------------------
def init_params(key, cfg):
    d, mlp, layers, e = cfg["hidden"], cfg["mlp"], cfg["layers"], cfg["embed_size"]
    p, c = cfg["patch"], cfg["channels"]
    num_patches = (cfg["image"] // p) ** 2
    keys = iter(jax.random.split(key, 8 + layers * 12))

    def w(shape, scale=0.02):
        return scale * jax.random.normal(next(keys), shape, jnp.float32)

    params = {
        "patch_w": w((c * p * p, d)),
        "patch_b": w((d,)),
        "cls": w((1, 1, d)),
        "pos": w((1, num_patches + 1, d)),
        "ln_g": jnp.ones((d,), jnp.float32),
        "ln_b": jnp.zeros((d,), jnp.float32),
        "embed_w": w((d, e)),
        "embed_b": w((e,)),
        "bn_g": jnp.ones((e,), jnp.float32),
        "bn_b": jnp.zeros((e,), jnp.float32),
        "layers": [],
    }
    for _ in range(layers):
        params["layers"].append({
            "ln1_g": jnp.ones((d,), jnp.float32), "ln1_b": jnp.zeros((d,), jnp.float32),
            "wq": w((d, d)), "bq": w((d,)),
            "wk": w((d, d)), "bk": w((d,)),
            "wv": w((d, d)), "bv": w((d,)),
            "wo": w((d, d)), "bo": w((d,)),
            "ln2_g": jnp.ones((d,), jnp.float32), "ln2_b": jnp.zeros((d,), jnp.float32),
            "w1": w((d, mlp)), "b1": w((mlp,)),
            "w2": w((mlp, d)), "b2": w((d,)),
        })
    return params


if __name__ == "__main__":
    cfg = {
        "image": 32,
        "patch": 16,
        "channels": 3,
        "hidden": 128,     # scaled down from ViT-base's 768
        "heads": 4,
        "mlp": 512,
        "layers": 2,
        "embed_size": 32,
        "ln_eps": 1e-12,   # HF ViT layer_norm_eps
        "bn_eps": 1e-5,    # torch.nn.BatchNorm1d default
    }
    images = jax.random.normal(jax.random.PRNGKey(0), (2, 3, 32, 32), jnp.float32)
    params = init_params(jax.random.PRNGKey(1), cfg)
    fused_params = prepare_params(params, cfg, batch=2)   # one-time fusion / stacking

    fwd = jax.jit(functools.partial(encoder_vit_forward, cfg=cfg))
    out = fwd(images, fused_params)
    out = jax.block_until_ready(out)
    assert out.shape == (2, cfg["embed_size"]), out.shape
    assert bool(jnp.all(jnp.isfinite(out)))
    print("KERNEL_OK")
</pallas_src>

<mosaic_0001>
module attributes {stable_mosaic.version = 11 : i64} {
  func.func @_encoder_vit_kernel(%arg0: memref<16x768xf32, #tpu.memory_space<vmem>>, %arg1: memref<768x128xf32, #tpu.memory_space<vmem>>, %arg2: memref<16x128xf32, #tpu.memory_space<vmem>>, %arg3: memref<8x8xf32, #tpu.memory_space<vmem>>, %arg4: memref<2x1x128xf32, #tpu.memory_space<vmem>>, %arg5: memref<2x1x128xf32, #tpu.memory_space<vmem>>, %arg6: memref<2x128x384xf32, #tpu.memory_space<vmem>>, %arg7: memref<2x1x384xf32, #tpu.memory_space<vmem>>, %arg8: memref<2x128x128xf32, #tpu.memory_space<vmem>>, %arg9: memref<2x1x128xf32, #tpu.memory_space<vmem>>, %arg10: memref<2x1x128xf32, #tpu.memory_space<vmem>>, %arg11: memref<2x1x128xf32, #tpu.memory_space<vmem>>, %arg12: memref<2x128x512xf32, #tpu.memory_space<vmem>>, %arg13: memref<2x1x512xf32, #tpu.memory_space<vmem>>, %arg14: memref<2x512x128xf32, #tpu.memory_space<vmem>>, %arg15: memref<2x1x128xf32, #tpu.memory_space<vmem>>, %arg16: memref<1x128xf32, #tpu.memory_space<vmem>>, %arg17: memref<1x128xf32, #tpu.memory_space<vmem>>, %arg18: memref<128x128xf32, #tpu.memory_space<vmem>>, %arg19: memref<1x128xf32, #tpu.memory_space<vmem>>, %arg20: memref<1x128xf32, #tpu.memory_space<vmem>>, %arg21: memref<1x128xf32, #tpu.memory_space<vmem>>, %arg22: memref<2x128xf32, #tpu.memory_space<vmem>>) attributes {dimension_semantics = [], scalar_prefetch = 0 : i64, scratch_operands = 0 : i64, tpu.core_type = #tpu.core_type<tc>} {
    %c0 = arith.constant 0 : index
    %c0_0 = arith.constant 0 : index
    %0 = vector.load %arg0[%c0, %c0_0] : memref<16x768xf32, #tpu.memory_space<vmem>>, vector<16x768xf32>
    %c0_1 = arith.constant 0 : index
    %c0_2 = arith.constant 0 : index
    %1 = vector.load %arg1[%c0_1, %c0_2] : memref<768x128xf32, #tpu.memory_space<vmem>>, vector<768x128xf32>
    %cst = arith.constant dense<0.000000e+00> : vector<16x128xf32>
    %2 = tpu.matmul %0, %1, %cst {dimension_numbers = #tpu.dot_dimension_numbers<[1], [0], [0], [1], [0, 0, 1, 1], [], []>} : vector<16x768xf32>, vector<768x128xf32>, vector<16x128xf32> -> vector<16x128xf32>
    %c0_3 = arith.constant 0 : index
    %c0_4 = arith.constant 0 : index
    %3 = vector.load %arg2[%c0_3, %c0_4] : memref<16x128xf32, #tpu.memory_space<vmem>>, vector<16x128xf32>
    %4 = arith.addf %2, %3 : vector<16x128xf32>
    %c0_5 = arith.constant 0 : index
    %c0_6 = arith.constant 0 : index
    %5 = vector.load %arg3[%c0_5, %c0_6] : memref<8x8xf32, #tpu.memory_space<vmem>>, vector<8x8xf32>
    %c0_7 = arith.constant 0 : index
    %c0_8 = arith.constant 0 : index
    %c0_9 = arith.constant 0 : index
    %6 = vector.load %arg4[%c0_7, %c0_8, %c0_9] : memref<2x1x128xf32, #tpu.memory_space<vmem>>, vector<1x1x128xf32>
    %7 = vector.shape_cast %6 : vector<1x1x128xf32> to vector<1x128xf32>
    %c0_10 = arith.constant 0 : index
    %c0_11 = arith.constant 0 : index
    %c0_12 = arith.constant 0 : index
    %8 = vector.load %arg5[%c0_10, %c0_11, %c0_12] : memref<2x1x128xf32, #tpu.memory_space<vmem>>, vector<1x1x128xf32>
    %9 = vector.shape_cast %8 : vector<1x1x128xf32> to vector<1x128xf32>
    %cst_13 = arith.constant dense<0.000000e+00> : vector<16xf32>
    %10 = vector.multi_reduction <add>, %4, %cst_13 [1] : vector<16x128xf32> to vector<16xf32>
    %11 = vector.shape_cast %10 : vector<16xf32> to vector<16x1xf32>
    %cst_14 = arith.constant 1.280000e+02 : f32
    %12 = vector.broadcast %cst_14 : f32 to vector<16x1xf32>
    %13 = arith.divf %11, %12 : vector<16x1xf32>
    %14 = vector.broadcast %13 : vector<16x1xf32> to vector<16x128xf32>
    %15 = arith.subf %4, %14 : vector<16x128xf32>
    %16 = arith.mulf %15, %15 : vector<16x128xf32>
    %cst_15 = arith.constant dense<0.000000e+00> : vector<16xf32>
    %17 = vector.multi_reduction <add>, %16, %cst_15 [1] : vector<16x128xf32> to vector<16xf32>
    %18 = vector.shape_cast %17 : vector<16xf32> to vector<16x1xf32>
    %cst_16 = arith.constant 1.280000e+02 : f32
    %19 = vector.broadcast %cst_16 : f32 to vector<16x1xf32>
    %20 = arith.divf %18, %19 : vector<16x1xf32>
    %cst_17 = arith.constant 9.99999996E-13 : f32
    %21 = vector.broadcast %cst_17 : f32 to vector<16x1xf32>
    %22 = arith.addf %20, %21 : vector<16x1xf32>
    %23 = math.rsqrt %22 : vector<16x1xf32>
    %24 = vector.broadcast %23 : vector<16x1xf32> to vector<16x128xf32>
    %25 = arith.mulf %15, %24 : vector<16x128xf32>
    %26 = vector.broadcast %7 : vector<1x128xf32> to vector<16x128xf32>
    %27 = arith.mulf %25, %26 : vector<16x128xf32>
    %28 = vector.broadcast %9 : vector<1x128xf32> to vector<16x128xf32>
    %29 = arith.addf %27, %28 : vector<16x128xf32>
    %c0_18 = arith.constant 0 : index
    %c0_19 = arith.constant 0 : index
    %c0_20 = arith.constant 0 : index
    %30 = vector.load %arg6[%c0_18, %c0_19, %c0_20] : memref<2x128x384xf32, #tpu.memory_space<vmem>>, vector<1x128x384xf32>
    %31 = vector.shape_cast %30 : vector<1x128x384xf32> to vector<128x384xf32>
    %cst_21 = arith.constant dense<0.000000e+00> : vector<16x384xf32>
    %32 = tpu.matmul %29, %31, %cst_21 {dimension_numbers = #tpu.dot_dimension_numbers<[1], [0], [0], [1], [0, 0, 1, 1], [], []>} : vector<16x128xf32>, vector<128x384xf32>, vector<16x384xf32> -> vector<16x384xf32>
    %c0_22 = arith.constant 0 : index
    %c0_23 = arith.constant 0 : index
    %c0_24 = arith.constant 0 : index
    %33 = vector.load %arg7[%c0_22, %c0_23, %c0_24] : memref<2x1x384xf32, #tpu.memory_space<vmem>>, vector<1x1x384xf32>
    %34 = vector.shape_cast %33 : vector<1x1x384xf32> to vector<1x384xf32>
    %35 = vector.broadcast %34 : vector<1x384xf32> to vector<16x384xf32>
    %36 = arith.addf %32, %35 : vector<16x384xf32>
    %37 = vector.shape_cast %36 : vector<16x384xf32> to vector<2x8x384xf32>
    %38 = vector.extract_strided_slice %37 {offsets = [0, 0, 0], sizes = [2, 8, 32], strides = [1, 1, 1]} : vector<2x8x384xf32> to vector<2x8x32xf32>
    %39 = vector.extract_strided_slice %37 {offsets = [0, 0, 128], sizes = [2, 8, 32], strides = [1, 1, 1]} : vector<2x8x384xf32> to vector<2x8x32xf32>
    %40 = vector.extract_strided_slice %37 {offsets = [0, 0, 256], sizes = [2, 8, 32], strides = [1, 1, 1]} : vector<2x8x384xf32> to vector<2x8x32xf32>
    "tpu.trace_start"() <{level = 10 : i32, message = "bqd,bkd->bqk"}> : () -> ()
    %cst_25 = arith.constant dense<0.000000e+00> : vector<2x8x8xf32>
    %41 = tpu.matmul %38, %39, %cst_25 {dimension_numbers = #tpu.dot_dimension_numbers<[2], [2], [1], [1], [0, 0, 0, 1, 1, 1], [0], [0]>} : vector<2x8x32xf32>, vector<2x8x32xf32>, vector<2x8x8xf32> -> vector<2x8x8xf32>
    "tpu.trace_stop"() : () -> ()
    %cst_26 = arith.constant 0.176776692 : f32
    %42 = vector.broadcast %cst_26 : f32 to vector<2x8x8xf32>
    %43 = arith.mulf %41, %42 : vector<2x8x8xf32>
    %44 = vector.shape_cast %5 : vector<8x8xf32> to vector<1x8x8xf32>
    %45 = vector.broadcast %44 : vector<1x8x8xf32> to vector<2x8x8xf32>
    %46 = arith.addf %43, %45 : vector<2x8x8xf32>
    %cst_27 = arith.constant dense<0xFF800000> : vector<2x8xf32>
    %47 = vector.multi_reduction <maximumf>, %46, %cst_27 [2] : vector<2x8x8xf32> to vector<2x8xf32>
    %48 = vector.shape_cast %47 : vector<2x8xf32> to vector<2x8x1xf32>
    %49 = vector.broadcast %48 : vector<2x8x1xf32> to vector<2x8x8xf32>
    %50 = arith.subf %46, %49 : vector<2x8x8xf32>
    %51 = math.exp %50 : vector<2x8x8xf32>
    %cst_28 = arith.constant dense<0.000000e+00> : vector<2x8xf32>
    %52 = vector.multi_reduction <add>, %51, %cst_28 [2] : vector<2x8x8xf32> to vector<2x8xf32>
    %53 = vector.shape_cast %52 : vector<2x8xf32> to vector<2x8x1xf32>
    %54 = tpu.reciprocal %53 {approx = true} : vector<2x8x1xf32> -> vector<2x8x1xf32>
    %55 = vector.broadcast %54 : vector<2x8x1xf32> to vector<2x8x8xf32>
    %56 = arith.mulf %51, %55 : vector<2x8x8xf32>
    "tpu.trace_start"() <{level = 10 : i32, message = "bqk,bkd->bqd"}> : () -> ()
    %cst_29 = arith.constant dense<0.000000e+00> : vector<2x8x32xf32>
    %57 = tpu.matmul %56, %40, %cst_29 {dimension_numbers = #tpu.dot_dimension_numbers<[2], [1], [1], [2], [0, 0, 0, 1, 1, 2], [0], [0]>} : vector<2x8x8xf32>, vector<2x8x32xf32>, vector<2x8x32xf32> -> vector<2x8x32xf32>
    "tpu.trace_stop"() : () -> ()
    %58 = vector.extract_strided_slice %37 {offsets = [0, 0, 32], sizes = [2, 8, 32], strides = [1, 1, 1]} : vector<2x8x384xf32> to vector<2x8x32xf32>
    %59 = vector.extract_strided_slice %37 {offsets = [0, 0, 160], sizes = [2, 8, 32], strides = [1, 1, 1]} : vector<2x8x384xf32> to vector<2x8x32xf32>
    %60 = vector.extract_strided_slice %37 {offsets = [0, 0, 288], sizes = [2, 8, 32], strides = [1, 1, 1]} : vector<2x8x384xf32> to vector<2x8x32xf32>
    "tpu.trace_start"() <{level = 10 : i32, message = "bqd,bkd->bqk"}> : () -> ()
    %cst_30 = arith.constant dense<0.000000e+00> : vector<2x8x8xf32>
    %61 = tpu.matmul %58, %59, %cst_30 {dimension_numbers = #tpu.dot_dimension_numbers<[2], [2], [1], [1], [0, 0, 0, 1, 1, 1], [0], [0]>} : vector<2x8x32xf32>, vector<2x8x32xf32>, vector<2x8x8xf32> -> vector<2x8x8xf32>
    "tpu.trace_stop"() : () -> ()
    %cst_31 = arith.constant 0.176776692 : f32
    %62 = vector.broadcast %cst_31 : f32 to vector<2x8x8xf32>
    %63 = arith.mulf %61, %62 : vector<2x8x8xf32>
    %64 = vector.shape_cast %5 : vector<8x8xf32> to vector<1x8x8xf32>
    %65 = vector.broadcast %64 : vector<1x8x8xf32> to vector<2x8x8xf32>
    %66 = arith.addf %63, %65 : vector<2x8x8xf32>
    %cst_32 = arith.constant dense<0xFF800000> : vector<2x8xf32>
    %67 = vector.multi_reduction <maximumf>, %66, %cst_32 [2] : vector<2x8x8xf32> to vector<2x8xf32>
    %68 = vector.shape_cast %67 : vector<2x8xf32> to vector<2x8x1xf32>
    %69 = vector.broadcast %68 : vector<2x8x1xf32> to vector<2x8x8xf32>
    %70 = arith.subf %66, %69 : vector<2x8x8xf32>
    %71 = math.exp %70 : vector<2x8x8xf32>
    %cst_33 = arith.constant dense<0.000000e+00> : vector<2x8xf32>
    %72 = vector.multi_reduction <add>, %71, %cst_33 [2] : vector<2x8x8xf32> to vector<2x8xf32>
    %73 = vector.shape_cast %72 : vector<2x8xf32> to vector<2x8x1xf32>
    %74 = tpu.reciprocal %73 {approx = true} : vector<2x8x1xf32> -> vector<2x8x1xf32>
    %75 = vector.broadcast %74 : vector<2x8x1xf32> to vector<2x8x8xf32>
    %76 = arith.mulf %71, %75 : vector<2x8x8xf32>
    "tpu.trace_start"() <{level = 10 : i32, message = "bqk,bkd->bqd"}> : () -> ()
    %cst_34 = arith.constant dense<0.000000e+00> : vector<2x8x32xf32>
    %77 = tpu.matmul %76, %60, %cst_34 {dimension_numbers = #tpu.dot_dimension_numbers<[2], [1], [1], [2], [0, 0, 0, 1, 1, 2], [0], [0]>} : vector<2x8x8xf32>, vector<2x8x32xf32>, vector<2x8x32xf32> -> vector<2x8x32xf32>
    "tpu.trace_stop"() : () -> ()
    %78 = vector.extract_strided_slice %37 {offsets = [0, 0, 64], sizes = [2, 8, 32], strides = [1, 1, 1]} : vector<2x8x384xf32> to vector<2x8x32xf32>
    %79 = vector.extract_strided_slice %37 {offsets = [0, 0, 192], sizes = [2, 8, 32], strides = [1, 1, 1]} : vector<2x8x384xf32> to vector<2x8x32xf32>
    %80 = vector.extract_strided_slice %37 {offsets = [0, 0, 320], sizes = [2, 8, 32], strides = [1, 1, 1]} : vector<2x8x384xf32> to vector<2x8x32xf32>
    "tpu.trace_start"() <{level = 10 : i32, message = "bqd,bkd->bqk"}> : () -> ()
    %cst_35 = arith.constant dense<0.000000e+00> : vector<2x8x8xf32>
    %81 = tpu.matmul %78, %79, %cst_35 {dimension_numbers = #tpu.dot_dimension_numbers<[2], [2], [1], [1], [0, 0, 0, 1, 1, 1], [0], [0]>} : vector<2x8x32xf32>, vector<2x8x32xf32>, vector<2x8x8xf32> -> vector<2x8x8xf32>
    "tpu.trace_stop"() : () -> ()
    %cst_36 = arith.constant 0.176776692 : f32
    %82 = vector.broadcast %cst_36 : f32 to vector<2x8x8xf32>
    %83 = arith.mulf %81, %82 : vector<2x8x8xf32>
    %84 = vector.shape_cast %5 : vector<8x8xf32> to vector<1x8x8xf32>
    %85 = vector.broadcast %84 : vector<1x8x8xf32> to vector<2x8x8xf32>
    %86 = arith.addf %83, %85 : vector<2x8x8xf32>
    %cst_37 = arith.constant dense<0xFF800000> : vector<2x8xf32>
    %87 = vector.multi_reduction <maximumf>, %86, %cst_37 [2] : vector<2x8x8xf32> to vector<2x8xf32>
    %88 = vector.shape_cast %87 : vector<2x8xf32> to vector<2x8x1xf32>
    %89 = vector.broadcast %88 : vector<2x8x1xf32> to vector<2x8x8xf32>
    %90 = arith.subf %86, %89 : vector<2x8x8xf32>
    %91 = math.exp %90 : vector<2x8x8xf32>
    %cst_38 = arith.constant dense<0.000000e+00> : vector<2x8xf32>
    %92 = vector.multi_reduction <add>, %91, %cst_38 [2] : vector<2x8x8xf32> to vector<2x8xf32>
    %93 = vector.shape_cast %92 : vector<2x8xf32> to vector<2x8x1xf32>
    %94 = tpu.reciprocal %93 {approx = true} : vector<2x8x1xf32> -> vector<2x8x1xf32>
    %95 = vector.broadcast %94 : vector<2x8x1xf32> to vector<2x8x8xf32>
    %96 = arith.mulf %91, %95 : vector<2x8x8xf32>
    "tpu.trace_start"() <{level = 10 : i32, message = "bqk,bkd->bqd"}> : () -> ()
    %cst_39 = arith.constant dense<0.000000e+00> : vector<2x8x32xf32>
    %97 = tpu.matmul %96, %80, %cst_39 {dimension_numbers = #tpu.dot_dimension_numbers<[2], [1], [1], [2], [0, 0, 0, 1, 1, 2], [0], [0]>} : vector<2x8x8xf32>, vector<2x8x32xf32>, vector<2x8x32xf32> -> vector<2x8x32xf32>
    "tpu.trace_stop"() : () -> ()
    %98 = vector.extract_strided_slice %37 {offsets = [0, 0, 96], sizes = [2, 8, 32], strides = [1, 1, 1]} : vector<2x8x384xf32> to vector<2x8x32xf32>
    %99 = vector.extract_strided_slice %37 {offsets = [0, 0, 224], sizes = [2, 8, 32], strides = [1, 1, 1]} : vector<2x8x384xf32> to vector<2x8x32xf32>
    %100 = vector.extract_strided_slice %37 {offsets = [0, 0, 352], sizes = [2, 8, 32], strides = [1, 1, 1]} : vector<2x8x384xf32> to vector<2x8x32xf32>
    "tpu.trace_start"() <{level = 10 : i32, message = "bqd,bkd->bqk"}> : () -> ()
    %cst_40 = arith.constant dense<0.000000e+00> : vector<2x8x8xf32>
    %101 = tpu.matmul %98, %99, %cst_40 {dimension_numbers = #tpu.dot_dimension_numbers<[2], [2], [1], [1], [0, 0, 0, 1, 1, 1], [0], [0]>} : vector<2x8x32xf32>, vector<2x8x32xf32>, vector<2x8x8xf32> -> vector<2x8x8xf32>
    "tpu.trace_stop"() : () -> ()
    %cst_41 = arith.constant 0.176776692 : f32
    %102 = vector.broadcast %cst_41 : f32 to vector<2x8x8xf32>
    %103 = arith.mulf %101, %102 : vector<2x8x8xf32>
    %104 = vector.shape_cast %5 : vector<8x8xf32> to vector<1x8x8xf32>
    %105 = vector.broadcast %104 : vector<1x8x8xf32> to vector<2x8x8xf32>
    %106 = arith.addf %103, %105 : vector<2x8x8xf32>
    %cst_42 = arith.constant dense<0xFF800000> : vector<2x8xf32>
    %107 = vector.multi_reduction <maximumf>, %106, %cst_42 [2] : vector<2x8x8xf32> to vector<2x8xf32>
    %108 = vector.shape_cast %107 : vector<2x8xf32> to vector<2x8x1xf32>
    %109 = vector.broadcast %108 : vector<2x8x1xf32> to vector<2x8x8xf32>
    %110 = arith.subf %106, %109 : vector<2x8x8xf32>
    %111 = math.exp %110 : vector<2x8x8xf32>
    %cst_43 = arith.constant dense<0.000000e+00> : vector<2x8xf32>
    %112 = vector.multi_reduction <add>, %111, %cst_43 [2] : vector<2x8x8xf32> to vector<2x8xf32>
    %113 = vector.shape_cast %112 : vector<2x8xf32> to vector<2x8x1xf32>
    %114 = tpu.reciprocal %113 {approx = true} : vector<2x8x1xf32> -> vector<2x8x1xf32>
    %115 = vector.broadcast %114 : vector<2x8x1xf32> to vector<2x8x8xf32>
    %116 = arith.mulf %111, %115 : vector<2x8x8xf32>
    "tpu.trace_start"() <{level = 10 : i32, message = "bqk,bkd->bqd"}> : () -> ()
    %cst_44 = arith.constant dense<0.000000e+00> : vector<2x8x32xf32>
    %117 = tpu.matmul %116, %100, %cst_44 {dimension_numbers = #tpu.dot_dimension_numbers<[2], [1], [1], [2], [0, 0, 0, 1, 1, 2], [0], [0]>} : vector<2x8x8xf32>, vector<2x8x32xf32>, vector<2x8x32xf32> -> vector<2x8x32xf32>
    "tpu.trace_stop"() : () -> ()
    %118 = tpu.concatenate %57, %77, %97, %117 in 2 : vector<2x8x32xf32>, vector<2x8x32xf32>, vector<2x8x32xf32>, vector<2x8x32xf32> -> vector<2x8x128xf32>
    %119 = vector.shape_cast %118 : vector<2x8x128xf32> to vector<16x128xf32>
    %c0_45 = arith.constant 0 : index
    %c0_46 = arith.constant 0 : index
    %c0_47 = arith.constant 0 : index
    %120 = vector.load %arg8[%c0_45, %c0_46, %c0_47] : memref<2x128x128xf32, #tpu.memory_space<vmem>>, vector<1x128x128xf32>
    %121 = vector.shape_cast %120 : vector<1x128x128xf32> to vector<128x128xf32>
    %cst_48 = arith.constant dense<0.000000e+00> : vector<16x128xf32>
    %122 = tpu.matmul %119, %121, %cst_48 {dimension_numbers = #tpu.dot_dimension_numbers<[1], [0], [0], [1], [0, 0, 1, 1], [], []>} : vector<16x128xf32>, vector<128x128xf32>, vector<16x128xf32> -> vector<16x128xf32>
    %123 = arith.addf %4, %122 : vector<16x128xf32>
    %c0_49 = arith.constant 0 : index
    %c0_50 = arith.constant 0 : index
    %c0_51 = arith.constant 0 : index
    %124 = vector.load %arg9[%c0_49, %c0_50, %c0_51] : memref<2x1x128xf32, #tpu.memory_space<vmem>>, vector<1x1x128xf32>
    %125 = vector.shape_cast %124 : vector<1x1x128xf32> to vector<1x128xf32>
    %126 = vector.broadcast %125 : vector<1x128xf32> to vector<16x128xf32>
    %127 = arith.addf %123, %126 : vector<16x128xf32>
    %c0_52 = arith.constant 0 : index
    %c0_53 = arith.constant 0 : index
    %c0_54 = arith.constant 0 : index
    %128 = vector.load %arg10[%c0_52, %c0_53, %c0_54] : memref<2x1x128xf32, #tpu.memory_space<vmem>>, vector<1x1x128xf32>
    %129 = vector.shape_cast %128 : vector<1x1x128xf32> to vector<1x128xf32>
    %c0_55 = arith.constant 0 : index
    %c0_56 = arith.constant 0 : index
    %c0_57 = arith.constant 0 : index
    %130 = vector.load %arg11[%c0_55, %c0_56, %c0_57] : memref<2x1x128xf32, #tpu.memory_space<vmem>>, vector<1x1x128xf32>
    %131 = vector.shape_cast %130 : vector<1x1x128xf32> to vector<1x128xf32>
    %cst_58 = arith.constant dense<0.000000e+00> : vector<16xf32>
    %132 = vector.multi_reduction <add>, %127, %cst_58 [1] : vector<16x128xf32> to vector<16xf32>
    %133 = vector.shape_cast %132 : vector<16xf32> to vector<16x1xf32>
    %cst_59 = arith.constant 1.280000e+02 : f32
    %134 = vector.broadcast %cst_59 : f32 to vector<16x1xf32>
    %135 = arith.divf %133, %134 : vector<16x1xf32>
    %136 = vector.broadcast %135 : vector<16x1xf32> to vector<16x128xf32>
    %137 = arith.subf %127, %136 : vector<16x128xf32>
    %138 = arith.mulf %137, %137 : vector<16x128xf32>
    %cst_60 = arith.constant dense<0.000000e+00> : vector<16xf32>
    %139 = vector.multi_reduction <add>, %138, %cst_60 [1] : vector<16x128xf32> to vector<16xf32>
    %140 = vector.shape_cast %139 : vector<16xf32> to vector<16x1xf32>
    %cst_61 = arith.constant 1.280000e+02 : f32
    %141 = vector.broadcast %cst_61 : f32 to vector<16x1xf32>
    %142 = arith.divf %140, %141 : vector<16x1xf32>
    %cst_62 = arith.constant 9.99999996E-13 : f32
    %143 = vector.broadcast %cst_62 : f32 to vector<16x1xf32>
    %144 = arith.addf %142, %143 : vector<16x1xf32>
    %145 = math.rsqrt %144 : vector<16x1xf32>
    %146 = vector.broadcast %145 : vector<16x1xf32> to vector<16x128xf32>
    %147 = arith.mulf %137, %146 : vector<16x128xf32>
    %148 = vector.broadcast %129 : vector<1x128xf32> to vector<16x128xf32>
    %149 = arith.mulf %147, %148 : vector<16x128xf32>
    %150 = vector.broadcast %131 : vector<1x128xf32> to vector<16x128xf32>
    %151 = arith.addf %149, %150 : vector<16x128xf32>
    %c0_63 = arith.constant 0 : index
    %c0_64 = arith.constant 0 : index
    %c0_65 = arith.constant 0 : index
    %152 = vector.load %arg12[%c0_63, %c0_64, %c0_65] : memref<2x128x512xf32, #tpu.memory_space<vmem>>, vector<1x128x512xf32>
    %153 = vector.shape_cast %152 : vector<1x128x512xf32> to vector<128x512xf32>
    %cst_66 = arith.constant dense<0.000000e+00> : vector<16x512xf32>
    %154 = tpu.matmul %151, %153, %cst_66 {dimension_numbers = #tpu.dot_dimension_numbers<[1], [0], [0], [1], [0, 0, 1, 1], [], []>} : vector<16x128xf32>, vector<128x512xf32>, vector<16x512xf32> -> vector<16x512xf32>
    %c0_67 = arith.constant 0 : index
    %c0_68 = arith.constant 0 : index
    %c0_69 = arith.constant 0 : index
    %155 = vector.load %arg13[%c0_67, %c0_68, %c0_69] : memref<2x1x512xf32, #tpu.memory_space<vmem>>, vector<1x1x512xf32>
    %156 = vector.shape_cast %155 : vector<1x1x512xf32> to vector<1x512xf32>
    %157 = vector.broadcast %156 : vector<1x512xf32> to vector<16x512xf32>
    %158 = arith.addf %154, %157 : vector<16x512xf32>
    %159 = arith.mulf %158, %158 : vector<16x512xf32>
    %160 = arith.mulf %158, %159 : vector<16x512xf32>
    %cst_70 = arith.constant 4.471500e-02 : f32
    %161 = vector.broadcast %cst_70 : f32 to vector<16x512xf32>
    %162 = arith.mulf %161, %160 : vector<16x512xf32>
    %163 = arith.addf %158, %162 : vector<16x512xf32>
    %cst_71 = arith.constant 0.797884583 : f32
    %164 = vector.broadcast %cst_71 : f32 to vector<16x512xf32>
    %165 = arith.mulf %164, %163 : vector<16x512xf32>
    %166 = math.tanh %165 : vector<16x512xf32>
    %cst_72 = arith.constant 1.000000e+00 : f32
    %167 = vector.broadcast %cst_72 : f32 to vector<16x512xf32>
    %168 = arith.addf %167, %166 : vector<16x512xf32>
    %cst_73 = arith.constant 5.000000e-01 : f32
    %169 = vector.broadcast %cst_73 : f32 to vector<16x512xf32>
    %170 = arith.mulf %169, %168 : vector<16x512xf32>
    %171 = arith.mulf %158, %170 : vector<16x512xf32>
    %c0_74 = arith.constant 0 : index
    %c0_75 = arith.constant 0 : index
    %c0_76 = arith.constant 0 : index
    %172 = vector.load %arg14[%c0_74, %c0_75, %c0_76] : memref<2x512x128xf32, #tpu.memory_space<vmem>>, vector<1x512x128xf32>
    %173 = vector.shape_cast %172 : vector<1x512x128xf32> to vector<512x128xf32>
    %cst_77 = arith.constant dense<0.000000e+00> : vector<16x128xf32>
    %174 = tpu.matmul %171, %173, %cst_77 {dimension_numbers = #tpu.dot_dimension_numbers<[1], [0], [0], [1], [0, 0, 1, 1], [], []>} : vector<16x512xf32>, vector<512x128xf32>, vector<16x128xf32> -> vector<16x128xf32>
    %175 = arith.addf %127, %174 : vector<16x128xf32>
    %c0_78 = arith.constant 0 : index
    %c0_79 = arith.constant 0 : index
    %c0_80 = arith.constant 0 : index
    %176 = vector.load %arg15[%c0_78, %c0_79, %c0_80] : memref<2x1x128xf32, #tpu.memory_space<vmem>>, vector<1x1x128xf32>
    %177 = vector.shape_cast %176 : vector<1x1x128xf32> to vector<1x128xf32>
    %178 = vector.broadcast %177 : vector<1x128xf32> to vector<16x128xf32>
    %179 = arith.addf %175, %178 : vector<16x128xf32>
    %c1 = arith.constant 1 : index
    %c0_81 = arith.constant 0 : index
    %c0_82 = arith.constant 0 : index
    %180 = vector.load %arg4[%c1, %c0_81, %c0_82] : memref<2x1x128xf32, #tpu.memory_space<vmem>>, vector<1x1x128xf32>
    %181 = vector.shape_cast %180 : vector<1x1x128xf32> to vector<1x128xf32>
    %c1_83 = arith.constant 1 : index
    %c0_84 = arith.constant 0 : index
    %c0_85 = arith.constant 0 : index
    %182 = vector.load %arg5[%c1_83, %c0_84, %c0_85] : memref<2x1x128xf32, #tpu.memory_space<vmem>>, vector<1x1x128xf32>
    %183 = vector.shape_cast %182 : vector<1x1x128xf32> to vector<1x128xf32>
    %cst_86 = arith.constant dense<0.000000e+00> : vector<16xf32>
    %184 = vector.multi_reduction <add>, %179, %cst_86 [1] : vector<16x128xf32> to vector<16xf32>
    %185 = vector.shape_cast %184 : vector<16xf32> to vector<16x1xf32>
    %cst_87 = arith.constant 1.280000e+02 : f32
    %186 = vector.broadcast %cst_87 : f32 to vector<16x1xf32>
    %187 = arith.divf %185, %186 : vector<16x1xf32>
    %188 = vector.broadcast %187 : vector<16x1xf32> to vector<16x128xf32>
    %189 = arith.subf %179, %188 : vector<16x128xf32>
    %190 = arith.mulf %189, %189 : vector<16x128xf32>
    %cst_88 = arith.constant dense<0.000000e+00> : vector<16xf32>
    %191 = vector.multi_reduction <add>, %190, %cst_88 [1] : vector<16x128xf32> to vector<16xf32>
    %192 = vector.shape_cast %191 : vector<16xf32> to vector<16x1xf32>
    %cst_89 = arith.constant 1.280000e+02 : f32
    %193 = vector.broadcast %cst_89 : f32 to vector<16x1xf32>
    %194 = arith.divf %192, %193 : vector<16x1xf32>
    %cst_90 = arith.constant 9.99999996E-13 : f32
    %195 = vector.broadcast %cst_90 : f32 to vector<16x1xf32>
    %196 = arith.addf %194, %195 : vector<16x1xf32>
    %197 = math.rsqrt %196 : vector<16x1xf32>
    %198 = vector.broadcast %197 : vector<16x1xf32> to vector<16x128xf32>
    %199 = arith.mulf %189, %198 : vector<16x128xf32>
    %200 = vector.broadcast %181 : vector<1x128xf32> to vector<16x128xf32>
    %201 = arith.mulf %199, %200 : vector<16x128xf32>
    %202 = vector.broadcast %183 : vector<1x128xf32> to vector<16x128xf32>
    %203 = arith.addf %201, %202 : vector<16x128xf32>
    %c1_91 = arith.constant 1 : index
    %c0_92 = arith.constant 0 : index
    %c0_93 = arith.constant 0 : index
    %204 = vector.load %arg6[%c1_91, %c0_92, %c0_93] : memref<2x128x384xf32, #tpu.memory_space<vmem>>, vector<1x128x384xf32>
    %205 = vector.shape_cast %204 : vector<1x128x384xf32> to vector<128x384xf32>
    %cst_94 = arith.constant dense<0.000000e+00> : vector<16x384xf32>
    %206 = tpu.matmul %203, %205, %cst_94 {dimension_numbers = #tpu.dot_dimension_numbers<[1], [0], [0], [1], [0, 0, 1, 1], [], []>} : vector<16x128xf32>, vector<128x384xf32>, vector<16x384xf32> -> vector<16x384xf32>
    %c1_95 = arith.constant 1 : index
    %c0_96 = arith.constant 0 : index
    %c0_97 = arith.constant 0 : index
    %207 = vector.load %arg7[%c1_95, %c0_96, %c0_97] : memref<2x1x384xf32, #tpu.memory_space<vmem>>, vector<1x1x384xf32>
    %208 = vector.shape_cast %207 : vector<1x1x384xf32> to vector<1x384xf32>
    %209 = vector.broadcast %208 : vector<1x384xf32> to vector<16x384xf32>
    %210 = arith.addf %206, %209 : vector<16x384xf32>
    %211 = vector.shape_cast %210 : vector<16x384xf32> to vector<2x8x384xf32>
    %212 = vector.extract_strided_slice %211 {offsets = [0, 0, 0], sizes = [2, 8, 32], strides = [1, 1, 1]} : vector<2x8x384xf32> to vector<2x8x32xf32>
    %213 = vector.extract_strided_slice %211 {offsets = [0, 0, 128], sizes = [2, 8, 32], strides = [1, 1, 1]} : vector<2x8x384xf32> to vector<2x8x32xf32>
    %214 = vector.extract_strided_slice %211 {offsets = [0, 0, 256], sizes = [2, 8, 32], strides = [1, 1, 1]} : vector<2x8x384xf32> to vector<2x8x32xf32>
    "tpu.trace_start"() <{level = 10 : i32, message = "bqd,bkd->bqk"}> : () -> ()
    %cst_98 = arith.constant dense<0.000000e+00> : vector<2x8x8xf32>
    %215 = tpu.matmul %212, %213, %cst_98 {dimension_numbers = #tpu.dot_dimension_numbers<[2], [2], [1], [1], [0, 0, 0, 1, 1, 1], [0], [0]>} : vector<2x8x32xf32>, vector<2x8x32xf32>, vector<2x8x8xf32> -> vector<2x8x8xf32>
    "tpu.trace_stop"() : () -> ()
    %cst_99 = arith.constant 0.176776692 : f32
    %216 = vector.broadcast %cst_99 : f32 to vector<2x8x8xf32>
    %217 = arith.mulf %215, %216 : vector<2x8x8xf32>
    %218 = vector.shape_cast %5 : vector<8x8xf32> to vector<1x8x8xf32>
    %219 = vector.broadcast %218 : vector<1x8x8xf32> to vector<2x8x8xf32>
    %220 = arith.addf %217, %219 : vector<2x8x8xf32>
    %cst_100 = arith.constant dense<0xFF800000> : vector<2x8xf32>
    %221 = vector.multi_reduction <maximumf>, %220, %cst_100 [2] : vector<2x8x8xf32> to vector<2x8xf32>
    %222 = vector.shape_cast %221 : vector<2x8xf32> to vector<2x8x1xf32>
    %223 = vector.broadcast %222 : vector<2x8x1xf32> to vector<2x8x8xf32>
    %224 = arith.subf %220, %223 : vector<2x8x8xf32>
    %225 = math.exp %224 : vector<2x8x8xf32>
    %cst_101 = arith.constant dense<0.000000e+00> : vector<2x8xf32>
    %226 = vector.multi_reduction <add>, %225, %cst_101 [2] : vector<2x8x8xf32> to vector<2x8xf32>
    %227 = vector.shape_cast %226 : vector<2x8xf32> to vector<2x8x1xf32>
    %228 = tpu.reciprocal %227 {approx = true} : vector<2x8x1xf32> -> vector<2x8x1xf32>
    %229 = vector.broadcast %228 : vector<2x8x1xf32> to vector<2x8x8xf32>
    %230 = arith.mulf %225, %229 : vector<2x8x8xf32>
    "tpu.trace_start"() <{level = 10 : i32, message = "bqk,bkd->bqd"}> : () -> ()
    %cst_102 = arith.constant dense<0.000000e+00> : vector<2x8x32xf32>
    %231 = tpu.matmul %230, %214, %cst_102 {dimension_numbers = #tpu.dot_dimension_numbers<[2], [1], [1], [2], [0, 0, 0, 1, 1, 2], [0], [0]>} : vector<2x8x8xf32>, vector<2x8x32xf32>, vector<2x8x32xf32> -> vector<2x8x32xf32>
    "tpu.trace_stop"() : () -> ()
    %232 = vector.extract_strided_slice %211 {offsets = [0, 0, 32], sizes = [2, 8, 32], strides = [1, 1, 1]} : vector<2x8x384xf32> to vector<2x8x32xf32>
    %233 = vector.extract_strided_slice %211 {offsets = [0, 0, 160], sizes = [2, 8, 32], strides = [1, 1, 1]} : vector<2x8x384xf32> to vector<2x8x32xf32>
    %234 = vector.extract_strided_slice %211 {offsets = [0, 0, 288], sizes = [2, 8, 32], strides = [1, 1, 1]} : vector<2x8x384xf32> to vector<2x8x32xf32>
    "tpu.trace_start"() <{level = 10 : i32, message = "bqd,bkd->bqk"}> : () -> ()
    %cst_103 = arith.constant dense<0.000000e+00> : vector<2x8x8xf32>
    %235 = tpu.matmul %232, %233, %cst_103 {dimension_numbers = #tpu.dot_dimension_numbers<[2], [2], [1], [1], [0, 0, 0, 1, 1, 1], [0], [0]>} : vector<2x8x32xf32>, vector<2x8x32xf32>, vector<2x8x8xf32> -> vector<2x8x8xf32>
    "tpu.trace_stop"() : () -> ()
    %cst_104 = arith.constant 0.176776692 : f32
    %236 = vector.broadcast %cst_104 : f32 to vector<2x8x8xf32>
    %237 = arith.mulf %235, %236 : vector<2x8x8xf32>
    %238 = vector.shape_cast %5 : vector<8x8xf32> to vector<1x8x8xf32>
    %239 = vector.broadcast %238 : vector<1x8x8xf32> to vector<2x8x8xf32>
    %240 = arith.addf %237, %239 : vector<2x8x8xf32>
    %cst_105 = arith.constant dense<0xFF800000> : vector<2x8xf32>
    %241 = vector.multi_reduction <maximumf>, %240, %cst_105 [2] : vector<2x8x8xf32> to vector<2x8xf32>
    %242 = vector.shape_cast %241 : vector<2x8xf32> to vector<2x8x1xf32>
    %243 = vector.broadcast %242 : vector<2x8x1xf32> to vector<2x8x8xf32>
    %244 = arith.subf %240, %243 : vector<2x8x8xf32>
    %245 = math.exp %244 : vector<2x8x8xf32>
    %cst_106 = arith.constant dense<0.000000e+00> : vector<2x8xf32>
    %246 = vector.multi_reduction <add>, %245, %cst_106 [2] : vector<2x8x8xf32> to vector<2x8xf32>
    %247 = vector.shape_cast %246 : vector<2x8xf32> to vector<2x8x1xf32>
    %248 = tpu.reciprocal %247 {approx = true} : vector<2x8x1xf32> -> vector<2x8x1xf32>
    %249 = vector.broadcast %248 : vector<2x8x1xf32> to vector<2x8x8xf32>
    %250 = arith.mulf %245, %249 : vector<2x8x8xf32>
    "tpu.trace_start"() <{level = 10 : i32, message = "bqk,bkd->bqd"}> : () -> ()
    %cst_107 = arith.constant dense<0.000000e+00> : vector<2x8x32xf32>
    %251 = tpu.matmul %250, %234, %cst_107 {dimension_numbers = #tpu.dot_dimension_numbers<[2], [1], [1], [2], [0, 0, 0, 1, 1, 2], [0], [0]>} : vector<2x8x8xf32>, vector<2x8x32xf32>, vector<2x8x32xf32> -> vector<2x8x32xf32>
    "tpu.trace_stop"() : () -> ()
    %252 = vector.extract_strided_slice %211 {offsets = [0, 0, 64], sizes = [2, 8, 32], strides = [1, 1, 1]} : vector<2x8x384xf32> to vector<2x8x32xf32>
    %253 = vector.extract_strided_slice %211 {offsets = [0, 0, 192], sizes = [2, 8, 32], strides = [1, 1, 1]} : vector<2x8x384xf32> to vector<2x8x32xf32>
    %254 = vector.extract_strided_slice %211 {offsets = [0, 0, 320], sizes = [2, 8, 32], strides = [1, 1, 1]} : vector<2x8x384xf32> to vector<2x8x32xf32>
    "tpu.trace_start"() <{level = 10 : i32, message = "bqd,bkd->bqk"}> : () -> ()
    %cst_108 = arith.constant dense<0.000000e+00> : vector<2x8x8xf32>
    %255 = tpu.matmul %252, %253, %cst_108 {dimension_numbers = #tpu.dot_dimension_numbers<[2], [2], [1], [1], [0, 0, 0, 1, 1, 1], [0], [0]>} : vector<2x8x32xf32>, vector<2x8x32xf32>, vector<2x8x8xf32> -> vector<2x8x8xf32>
    "tpu.trace_stop"() : () -> ()
    %cst_109 = arith.constant 0.176776692 : f32
    %256 = vector.broadcast %cst_109 : f32 to vector<2x8x8xf32>
    %257 = arith.mulf %255, %256 : vector<2x8x8xf32>
    %258 = vector.shape_cast %5 : vector<8x8xf32> to vector<1x8x8xf32>
    %259 = vector.broadcast %258 : vector<1x8x8xf32> to vector<2x8x8xf32>
    %260 = arith.addf %257, %259 : vector<2x8x8xf32>
    %cst_110 = arith.constant dense<0xFF800000> : vector<2x8xf32>
    %261 = vector.multi_reduction <maximumf>, %260, %cst_110 [2] : vector<2x8x8xf32> to vector<2x8xf32>
    %262 = vector.shape_cast %261 : vector<2x8xf32> to vector<2x8x1xf32>
    %263 = vector.broadcast %262 : vector<2x8x1xf32> to vector<2x8x8xf32>
    %264 = arith.subf %260, %263 : vector<2x8x8xf32>
    %265 = math.exp %264 : vector<2x8x8xf32>
    %cst_111 = arith.constant dense<0.000000e+00> : vector<2x8xf32>
    %266 = vector.multi_reduction <add>, %265, %cst_111 [2] : vector<2x8x8xf32> to vector<2x8xf32>
    %267 = vector.shape_cast %266 : vector<2x8xf32> to vector<2x8x1xf32>
    %268 = tpu.reciprocal %267 {approx = true} : vector<2x8x1xf32> -> vector<2x8x1xf32>
    %269 = vector.broadcast %268 : vector<2x8x1xf32> to vector<2x8x8xf32>
    %270 = arith.mulf %265, %269 : vector<2x8x8xf32>
    "tpu.trace_start"() <{level = 10 : i32, message = "bqk,bkd->bqd"}> : () -> ()
    %cst_112 = arith.constant dense<0.000000e+00> : vector<2x8x32xf32>
    %271 = tpu.matmul %270, %254, %cst_112 {dimension_numbers = #tpu.dot_dimension_numbers<[2], [1], [1], [2], [0, 0, 0, 1, 1, 2], [0], [0]>} : vector<2x8x8xf32>, vector<2x8x32xf32>, vector<2x8x32xf32> -> vector<2x8x32xf32>
    "tpu.trace_stop"() : () -> ()
    %272 = vector.extract_strided_slice %211 {offsets = [0, 0, 96], sizes = [2, 8, 32], strides = [1, 1, 1]} : vector<2x8x384xf32> to vector<2x8x32xf32>
    %273 = vector.extract_strided_slice %211 {offsets = [0, 0, 224], sizes = [2, 8, 32], strides = [1, 1, 1]} : vector<2x8x384xf32> to vector<2x8x32xf32>
    %274 = vector.extract_strided_slice %211 {offsets = [0, 0, 352], sizes = [2, 8, 32], strides = [1, 1, 1]} : vector<2x8x384xf32> to vector<2x8x32xf32>
    "tpu.trace_start"() <{level = 10 : i32, message = "bqd,bkd->bqk"}> : () -> ()
    %cst_113 = arith.constant dense<0.000000e+00> : vector<2x8x8xf32>
    %275 = tpu.matmul %272, %273, %cst_113 {dimension_numbers = #tpu.dot_dimension_numbers<[2], [2], [1], [1], [0, 0, 0, 1, 1, 1], [0], [0]>} : vector<2x8x32xf32>, vector<2x8x32xf32>, vector<2x8x8xf32> -> vector<2x8x8xf32>
    "tpu.trace_stop"() : () -> ()
    %cst_114 = arith.constant 0.176776692 : f32
    %276 = vector.broadcast %cst_114 : f32 to vector<2x8x8xf32>
    %277 = arith.mulf %275, %276 : vector<2x8x8xf32>
    %278 = vector.shape_cast %5 : vector<8x8xf32> to vector<1x8x8xf32>
    %279 = vector.broadcast %278 : vector<1x8x8xf32> to vector<2x8x8xf32>
    %280 = arith.addf %277, %279 : vector<2x8x8xf32>
    %cst_115 = arith.constant dense<0xFF800000> : vector<2x8xf32>
    %281 = vector.multi_reduction <maximumf>, %280, %cst_115 [2] : vector<2x8x8xf32> to vector<2x8xf32>
    %282 = vector.shape_cast %281 : vector<2x8xf32> to vector<2x8x1xf32>
    %283 = vector.broadcast %282 : vector<2x8x1xf32> to vector<2x8x8xf32>
    %284 = arith.subf %280, %283 : vector<2x8x8xf32>
    %285 = math.exp %284 : vector<2x8x8xf32>
    %cst_116 = arith.constant dense<0.000000e+00> : vector<2x8xf32>
    %286 = vector.multi_reduction <add>, %285, %cst_116 [2] : vector<2x8x8xf32> to vector<2x8xf32>
    %287 = vector.shape_cast %286 : vector<2x8xf32> to vector<2x8x1xf32>
    %288 = tpu.reciprocal %287 {approx = true} : vector<2x8x1xf32> -> vector<2x8x1xf32>
    %289 = vector.broadcast %288 : vector<2x8x1xf32> to vector<2x8x8xf32>
    %290 = arith.mulf %285, %289 : vector<2x8x8xf32>
    "tpu.trace_start"() <{level = 10 : i32, message = "bqk,bkd->bqd"}> : () -> ()
    %cst_117 = arith.constant dense<0.000000e+00> : vector<2x8x32xf32>
    %291 = tpu.matmul %290, %274, %cst_117 {dimension_numbers = #tpu.dot_dimension_numbers<[2], [1], [1], [2], [0, 0, 0, 1, 1, 2], [0], [0]>} : vector<2x8x8xf32>, vector<2x8x32xf32>, vector<2x8x32xf32> -> vector<2x8x32xf32>
    "tpu.trace_stop"() : () -> ()
    %292 = tpu.concatenate %231, %251, %271, %291 in 2 : vector<2x8x32xf32>, vector<2x8x32xf32>, vector<2x8x32xf32>, vector<2x8x32xf32> -> vector<2x8x128xf32>
    %293 = vector.shape_cast %292 : vector<2x8x128xf32> to vector<16x128xf32>
    %c1_118 = arith.constant 1 : index
    %c0_119 = arith.constant 0 : index
    %c0_120 = arith.constant 0 : index
    %294 = vector.load %arg8[%c1_118, %c0_119, %c0_120] : memref<2x128x128xf32, #tpu.memory_space<vmem>>, vector<1x128x128xf32>
    %295 = vector.shape_cast %294 : vector<1x128x128xf32> to vector<128x128xf32>
    %cst_121 = arith.constant dense<0.000000e+00> : vector<16x128xf32>
    %296 = tpu.matmul %293, %295, %cst_121 {dimension_numbers = #tpu.dot_dimension_numbers<[1], [0], [0], [1], [0, 0, 1, 1], [], []>} : vector<16x128xf32>, vector<128x128xf32>, vector<16x128xf32> -> vector<16x128xf32>
    %297 = arith.addf %179, %296 : vector<16x128xf32>
    %c1_122 = arith.constant 1 : index
    %c0_123 = arith.constant 0 : index
    %c0_124 = arith.constant 0 : index
    %298 = vector.load %arg9[%c1_122, %c0_123, %c0_124] : memref<2x1x128xf32, #tpu.memory_space<vmem>>, vector<1x1x128xf32>
    %299 = vector.shape_cast %298 : vector<1x1x128xf32> to vector<1x128xf32>
    %300 = vector.broadcast %299 : vector<1x128xf32> to vector<16x128xf32>
    %301 = arith.addf %297, %300 : vector<16x128xf32>
    %c1_125 = arith.constant 1 : index
    %c0_126 = arith.constant 0 : index
    %c0_127 = arith.constant 0 : index
    %302 = vector.load %arg10[%c1_125, %c0_126, %c0_127] : memref<2x1x128xf32, #tpu.memory_space<vmem>>, vector<1x1x128xf32>
    %303 = vector.shape_cast %302 : vector<1x1x128xf32> to vector<1x128xf32>
    %c1_128 = arith.constant 1 : index
    %c0_129 = arith.constant 0 : index
    %c0_130 = arith.constant 0 : index
    %304 = vector.load %arg11[%c1_128, %c0_129, %c0_130] : memref<2x1x128xf32, #tpu.memory_space<vmem>>, vector<1x1x128xf32>
    %305 = vector.shape_cast %304 : vector<1x1x128xf32> to vector<1x128xf32>
    %cst_131 = arith.constant dense<0.000000e+00> : vector<16xf32>
    %306 = vector.multi_reduction <add>, %301, %cst_131 [1] : vector<16x128xf32> to vector<16xf32>
    %307 = vector.shape_cast %306 : vector<16xf32> to vector<16x1xf32>
    %cst_132 = arith.constant 1.280000e+02 : f32
    %308 = vector.broadcast %cst_132 : f32 to vector<16x1xf32>
    %309 = arith.divf %307, %308 : vector<16x1xf32>
    %310 = vector.broadcast %309 : vector<16x1xf32> to vector<16x128xf32>
    %311 = arith.subf %301, %310 : vector<16x128xf32>
    %312 = arith.mulf %311, %311 : vector<16x128xf32>
    %cst_133 = arith.constant dense<0.000000e+00> : vector<16xf32>
    %313 = vector.multi_reduction <add>, %312, %cst_133 [1] : vector<16x128xf32> to vector<16xf32>
    %314 = vector.shape_cast %313 : vector<16xf32> to vector<16x1xf32>
    %cst_134 = arith.constant 1.280000e+02 : f32
    %315 = vector.broadcast %cst_134 : f32 to vector<16x1xf32>
    %316 = arith.divf %314, %315 : vector<16x1xf32>
    %cst_135 = arith.constant 9.99999996E-13 : f32
    %317 = vector.broadcast %cst_135 : f32 to vector<16x1xf32>
    %318 = arith.addf %316, %317 : vector<16x1xf32>
    %319 = math.rsqrt %318 : vector<16x1xf32>
    %320 = vector.broadcast %319 : vector<16x1xf32> to vector<16x128xf32>
    %321 = arith.mulf %311, %320 : vector<16x128xf32>
    %322 = vector.broadcast %303 : vector<1x128xf32> to vector<16x128xf32>
    %323 = arith.mulf %321, %322 : vector<16x128xf32>
    %324 = vector.broadcast %305 : vector<1x128xf32> to vector<16x128xf32>
    %325 = arith.addf %323, %324 : vector<16x128xf32>
    %c1_136 = arith.constant 1 : index
    %c0_137 = arith.constant 0 : index
    %c0_138 = arith.constant 0 : index
    %326 = vector.load %arg12[%c1_136, %c0_137, %c0_138] : memref<2x128x512xf32, #tpu.memory_space<vmem>>, vector<1x128x512xf32>
    %327 = vector.shape_cast %326 : vector<1x128x512xf32> to vector<128x512xf32>
    %cst_139 = arith.constant dense<0.000000e+00> : vector<16x512xf32>
    %328 = tpu.matmul %325, %327, %cst_139 {dimension_numbers = #tpu.dot_dimension_numbers<[1], [0], [0], [1], [0, 0, 1, 1], [], []>} : vector<16x128xf32>, vector<128x512xf32>, vector<16x512xf32> -> vector<16x512xf32>
    %c1_140 = arith.constant 1 : index
    %c0_141 = arith.constant 0 : index
    %c0_142 = arith.constant 0 : index
    %329 = vector.load %arg13[%c1_140, %c0_141, %c0_142] : memref<2x1x512xf32, #tpu.memory_space<vmem>>, vector<1x1x512xf32>
    %330 = vector.shape_cast %329 : vector<1x1x512xf32> to vector<1x512xf32>
    %331 = vector.broadcast %330 : vector<1x512xf32> to vector<16x512xf32>
    %332 = arith.addf %328, %331 : vector<16x512xf32>
    %333 = arith.mulf %332, %332 : vector<16x512xf32>
    %334 = arith.mulf %332, %333 : vector<16x512xf32>
    %cst_143 = arith.constant 4.471500e-02 : f32
    %335 = vector.broadcast %cst_143 : f32 to vector<16x512xf32>
    %336 = arith.mulf %335, %334 : vector<16x512xf32>
    %337 = arith.addf %332, %336 : vector<16x512xf32>
    %cst_144 = arith.constant 0.797884583 : f32
    %338 = vector.broadcast %cst_144 : f32 to vector<16x512xf32>
    %339 = arith.mulf %338, %337 : vector<16x512xf32>
    %340 = math.tanh %339 : vector<16x512xf32>
    %cst_145 = arith.constant 1.000000e+00 : f32
    %341 = vector.broadcast %cst_145 : f32 to vector<16x512xf32>
    %342 = arith.addf %341, %340 : vector<16x512xf32>
    %cst_146 = arith.constant 5.000000e-01 : f32
    %343 = vector.broadcast %cst_146 : f32 to vector<16x512xf32>
    %344 = arith.mulf %343, %342 : vector<16x512xf32>
    %345 = arith.mulf %332, %344 : vector<16x512xf32>
    %c1_147 = arith.constant 1 : index
    %c0_148 = arith.constant 0 : index
    %c0_149 = arith.constant 0 : index
    %346 = vector.load %arg14[%c1_147, %c0_148, %c0_149] : memref<2x512x128xf32, #tpu.memory_space<vmem>>, vector<1x512x128xf32>
    %347 = vector.shape_cast %346 : vector<1x512x128xf32> to vector<512x128xf32>
    %cst_150 = arith.constant dense<0.000000e+00> : vector<16x128xf32>
    %348 = tpu.matmul %345, %347, %cst_150 {dimension_numbers = #tpu.dot_dimension_numbers<[1], [0], [0], [1], [0, 0, 1, 1], [], []>} : vector<16x512xf32>, vector<512x128xf32>, vector<16x128xf32> -> vector<16x128xf32>
    %349 = arith.addf %301, %348 : vector<16x128xf32>
    %c1_151 = arith.constant 1 : index
    %c0_152 = arith.constant 0 : index
    %c0_153 = arith.constant 0 : index
    %350 = vector.load %arg15[%c1_151, %c0_152, %c0_153] : memref<2x1x128xf32, #tpu.memory_space<vmem>>, vector<1x1x128xf32>
    %351 = vector.shape_cast %350 : vector<1x1x128xf32> to vector<1x128xf32>
    %352 = vector.broadcast %351 : vector<1x128xf32> to vector<16x128xf32>
    %353 = arith.addf %349, %352 : vector<16x128xf32>
    %354 = vector.shape_cast %353 : vector<16x128xf32> to vector<2x8x128xf32>
    %355 = vector.extract_strided_slice %354 {offsets = [0, 0, 0], sizes = [2, 1, 128], strides = [1, 1, 1]} : vector<2x8x128xf32> to vector<2x1x128xf32>
    %356 = vector.shape_cast %355 : vector<2x1x128xf32> to vector<2x128xf32>
    %c0_154 = arith.constant 0 : index
    %c0_155 = arith.constant 0 : index
    %357 = vector.load %arg16[%c0_154, %c0_155] : memref<1x128xf32, #tpu.memory_space<vmem>>, vector<1x128xf32>
    %c0_156 = arith.constant 0 : index
    %c0_157 = arith.constant 0 : index
    %358 = vector.load %arg17[%c0_156, %c0_157] : memref<1x128xf32, #tpu.memory_space<vmem>>, vector<1x128xf32>
    %cst_158 = arith.constant dense<0.000000e+00> : vector<2xf32>
    %359 = vector.multi_reduction <add>, %356, %cst_158 [1] : vector<2x128xf32> to vector<2xf32>
    %360 = vector.shape_cast %359 : vector<2xf32> to vector<2x1xf32>
    %cst_159 = arith.constant 1.280000e+02 : f32
    %361 = vector.broadcast %cst_159 : f32 to vector<2x1xf32>
    %362 = arith.divf %360, %361 : vector<2x1xf32>
    %363 = vector.broadcast %362 : vector<2x1xf32> to vector<2x128xf32>
    %364 = arith.subf %356, %363 : vector<2x128xf32>
    %365 = arith.mulf %364, %364 : vector<2x128xf32>
    %cst_160 = arith.constant dense<0.000000e+00> : vector<2xf32>
    %366 = vector.multi_reduction <add>, %365, %cst_160 [1] : vector<2x128xf32> to vector<2xf32>
    %367 = vector.shape_cast %366 : vector<2xf32> to vector<2x1xf32>
    %cst_161 = arith.constant 1.280000e+02 : f32
    %368 = vector.broadcast %cst_161 : f32 to vector<2x1xf32>
    %369 = arith.divf %367, %368 : vector<2x1xf32>
    %cst_162 = arith.constant 9.99999996E-13 : f32
    %370 = vector.broadcast %cst_162 : f32 to vector<2x1xf32>
    %371 = arith.addf %369, %370 : vector<2x1xf32>
    %372 = math.rsqrt %371 : vector<2x1xf32>
    %373 = vector.broadcast %372 : vector<2x1xf32> to vector<2x128xf32>
    %374 = arith.mulf %364, %373 : vector<2x128xf32>
    %375 = vector.broadcast %357 : vector<1x128xf32> to vector<2x128xf32>
    %376 = arith.mulf %374, %375 : vector<2x128xf32>
    %377 = vector.broadcast %358 : vector<1x128xf32> to vector<2x128xf32>
    %378 = arith.addf %376, %377 : vector<2x128xf32>
    %c0_163 = arith.constant 0 : index
    %c0_164 = arith.constant 0 : index
    %379 = vector.load %arg18[%c0_163, %c0_164] : memref<128x128xf32, #tpu.memory_space<vmem>>, vector<128x128xf32>
    %cst_165 = arith.constant dense<0.000000e+00> : vector<2x128xf32>
    %380 = tpu.matmul %378, %379, %cst_165 {dimension_numbers = #tpu.dot_dimension_numbers<[1], [0], [0], [1], [0, 0, 1, 1], [], []>} : vector<2x128xf32>, vector<128x128xf32>, vector<2x128xf32> -> vector<2x128xf32>
    %c0_166 = arith.constant 0 : index
    %c0_167 = arith.constant 0 : index
    %381 = vector.load %arg19[%c0_166, %c0_167] : memref<1x128xf32, #tpu.memory_space<vmem>>, vector<1x128xf32>
    %382 = vector.broadcast %381 : vector<1x128xf32> to vector<2x128xf32>
    %383 = arith.addf %380, %382 : vector<2x128xf32>
    %cst_168 = arith.constant dense<0.000000e+00> : vector<128xf32>
    %384 = vector.multi_reduction <add>, %383, %cst_168 [0] : vector<2x128xf32> to vector<128xf32>
    %385 = vector.shape_cast %384 : vector<128xf32> to vector<1x128xf32>
    %cst_169 = arith.constant 2.000000e+00 : f32
    %386 = vector.broadcast %cst_169 : f32 to vector<1x128xf32>
    %387 = arith.divf %385, %386 : vector<1x128xf32>
    %388 = vector.broadcast %387 : vector<1x128xf32> to vector<2x128xf32>
    %389 = arith.subf %383, %388 : vector<2x128xf32>
    %390 = vector.broadcast %387 : vector<1x128xf32> to vector<2x128xf32>
    %391 = arith.subf %383, %390 : vector<2x128xf32>
    %392 = arith.mulf %389, %391 : vector<2x128xf32>
    %cst_170 = arith.constant dense<0.000000e+00> : vector<128xf32>
    %393 = vector.multi_reduction <add>, %392, %cst_170 [0] : vector<2x128xf32> to vector<128xf32>
    %394 = vector.shape_cast %393 : vector<128xf32> to vector<1x128xf32>
    %cst_171 = arith.constant 2.000000e+00 : f32
    %395 = vector.broadcast %cst_171 : f32 to vector<1x128xf32>
    %396 = arith.divf %394, %395 : vector<1x128xf32>
    %397 = vector.broadcast %387 : vector<1x128xf32> to vector<2x128xf32>
    %398 = arith.subf %383, %397 : vector<2x128xf32>
    %cst_172 = arith.constant 9.99999974E-6 : f32
    %399 = vector.broadcast %cst_172 : f32 to vector<1x128xf32>
    %400 = arith.addf %396, %399 : vector<1x128xf32>
    %401 = math.rsqrt %400 : vector<1x128xf32>
    %402 = vector.broadcast %401 : vector<1x128xf32> to vector<2x128xf32>
    %403 = arith.mulf %398, %402 : vector<2x128xf32>
    %c0_173 = arith.constant 0 : index
    %c0_174 = arith.constant 0 : index
    %404 = vector.load %arg20[%c0_173, %c0_174] : memref<1x128xf32, #tpu.memory_space<vmem>>, vector<1x128xf32>
    %405 = vector.broadcast %404 : vector<1x128xf32> to vector<2x128xf32>
    %406 = arith.mulf %403, %405 : vector<2x128xf32>
    %c0_175 = arith.constant 0 : index
    %c0_176 = arith.constant 0 : index
    %407 = vector.load %arg21[%c0_175, %c0_176] : memref<1x128xf32, #tpu.memory_space<vmem>>, vector<1x128xf32>
    %408 = vector.broadcast %407 : vector<1x128xf32> to vector<2x128xf32>
    %409 = arith.addf %406, %408 : vector<2x128xf32>
    %c0_177 = arith.constant 0 : index
    %c0_178 = arith.constant 0 : index
    %410 = vector.load %arg22[%c0_177, %c0_178] : memref<2x128xf32, #tpu.memory_space<vmem>>, vector<2x128xf32>
    tpu.vector_store %arg22[%c0_177, %c0_178], %409 {strides = array<i32>} : memref<2x128xf32, #tpu.memory_space<vmem>>, vector<2x128xf32>,
    return
  }
}

</mosaic_0001>

<bundles_post_ra>
// kernel: encoder_vit_forward.1
= control target key start
LH: loop header
LB: loop body
LE: loop exit
PB: predicated region body
PF: predicated region fallthrough
CT: control target
= control target key end

     0   :  { %s8582_s0 = inlined_call_operand.vmem [shape: f32[16,768], index: 0, kind: input, shape index: {}]   ;;  %s8583_s1 = inlined_call_operand.vmem [shape: f32[768,128], index: 1, kind: input, shape index: {}]   ;;  %s8584_s2 = inlined_call_operand.vmem [shape: f32[16,128], index: 2, kind: input, shape index: {}]   ;;  %s8585_s3 = inlined_call_operand.vmem [shape: f32[8,8], index: 3, kind: input, shape index: {}]   ;;  %s8586_s4 = inlined_call_operand.vmem [shape: f32[2,1,128], index: 4, kind: input, shape index: {}]   ;;  %s8587_s5 = inlined_call_operand.vmem [shape: f32[2,1,128], index: 5, kind: input, shape index: {}]   ;;  %s8588_s6 = inlined_call_operand.hbm [shape: f32[2,128,384], index: 6, kind: input, shape index: {}]   ;;  %s8589_s7 = inlined_call_operand.vmem [shape: f32[2,1,384], index: 7, kind: input, shape index: {}]   ;;  %s8590_s8 = inlined_call_operand.hbm [shape: f32[2,128,128], index: 8, kind: input, shape index: {}]   ;;  %s8591_s9 = inlined_call_operand.vmem [shape: f32[2,1,128], index: 9, kind: input, shape index: {}]   ;;  %s8592_s10 = inlined_call_operand.vmem [shape: f32[2,1,128], index: 10, kind: input, shape index: {}]   ;;  %s8593_s11 = inlined_call_operand.vmem [shape: f32[2,1,128], index: 11, kind: input, shape index: {}]   ;;  %s8594_s12 = inlined_call_operand.vmem [shape: f32[2,128,512], index: 12, kind: input, shape index: {}]   ;;  %s8595_s13 = inlined_call_operand.vmem [shape: f32[2,1,512], index: 13, kind: input, shape index: {}]   ;;  %s8596_s14 = inlined_call_operand.hbm [shape: f32[2,512,128], index: 14, kind: input, shape index: {}]   ;;  %s8597_s15 = inlined_call_operand.vmem [shape: f32[2,1,128], index: 15, kind: input, shape index: {}]   ;;  %s8598_s16 = inlined_call_operand.vmem [shape: f32[1,128], index: 16, kind: input, shape index: {}]   ;;  %s8599_s17 = inlined_call_operand.vmem [shape: f32[1,128], index: 17, kind: input, shape index: {}]   ;;  %s8600_s18 = inlined_call_operand.vmem [shape: f32[128,128], index: 18, kind: input, shape index: {}]   ;;  %s8601_s19 = inlined_call_operand.vmem [shape: f32[1,128], index: 19, kind: input, shape index: {}]   ;;  %s8602_s20 = inlined_call_operand.vmem [shape: f32[1,128], index: 20, kind: input, shape index: {}]   ;;  %s8603_s21 = inlined_call_operand.vmem [shape: f32[1,128], index: 21, kind: input, shape index: {}]   ;;  %s8604_s22 = inlined_call_operand.hbm [shape: f32[2,128], index: 22, kind: output, shape index: {}]  }
   0x1   :  { %8614 = sst [smem:[#allocation12_spill]] %s8582_s0 }
   0x2   :  { %8615 = sst [smem:[#allocation13_spill]] %s8583_s1 }
   0x3   :  { %8616 = sst [smem:[#allocation14_spill]] %s8584_s2 }
   0x4   :  { %8617 = sst [smem:[#allocation15_spill]] %s8585_s3 }
   0x5   :  { %8618 = sst [smem:[#allocation16_spill]] %s8586_s4 }
   0x6   :  { %8619 = sst [smem:[#allocation17_spill]] %s8587_s5 }
   0x7   :  { %8620 = sst [smem:[#allocation18_spill]] %s8588_s6 }
   0x8   :  { %8621 = sst [smem:[#allocation19_spill]] %s8604_s22 }
   0x9   :  { %27 = vsyncpa [#allocation3], 0 }
   0xa   :  { %28 = vsyncpa [#allocation6], 0 }
   0xb   :  { %29 = vsyncpa [#allocation4], 0  ;;  %s6975_s3 = smov [#allocation5]   ;;  %s6881_s4 = scalar_lea.hbm %s8590_s8, 4096 }
   0xc   :  { %s61_s28 = sshll.u32 %s6975_s3, 4  ;;  %p6882_p0 = scmp.ne.s32.totalorder %s8590_s8, %s6881_s4  ;;  %s62_s28 = int_to_ptr.vmem [resolvable:$true] %s61_s28 }
   0xd   :  { %p6885_p1 = scmp.lt.u32.totalorder %s6881_s4, %s8590_s8 }
   0xf   :  { %p6887_p2 = pnand %p6885_p1, %p6882_p0 }
  0x11   :  { %6890 = shalt.err (!%p6887_p2)
}
  0x12   :  { %s6891_s24 = scalar_lea.vmem %s62_s28, 4096  ;;  %p6896_p4 = scmp.lt.s32.totalorder %s62_s28, %s62_s28 }
  0x13   :  { %p6892_p3 = scmp.ne.s32.totalorder %s62_s28, %s6891_s24  ;;  %p6897_p5 = scmp.lt.s32.totalorder %s6891_s24, %s6891_s24 }
  0x15   :  { %p6898_p6 = por %p6897_p5, %p6896_p4 }
  0x17   :  { %p6899_p7 = pnand %p6898_p6, %p6892_p3 }
  0x19   :  { %6902 = shalt.err (!%p6899_p7)
}
  0x1a   :  { %s8613_s6 = smov 128   ;;  %s6977_s25 = smov 8  }
  0x1b   :  { %67 = dma.hbm_to_vmem [thread:$0]  %s8590_s8, 4096, %s62_s28, [#allocation6], %s8613_s6, %s8613_s6, %s6977_s25  }
  0x1c   :  { %s6978_s27 = smov [#allocation2]   ;;  %s8622_s4 = sld [smem:[#allocation18_spill]] }
  0x1d   :  { %s47_s3 = sshll.u32 %s6978_s27, 4  ;;  %s48_s3 = int_to_ptr.vmem [resolvable:$true] %s47_s3 }
  0x22   :  { %s6903_s0 = scalar_lea.hbm %s8622_s4, 12288 }
  0x23   :  { %p6904_p8 = scmp.ne.s32.totalorder %s8622_s4, %s6903_s0  ;;  %p6907_p9 = scmp.lt.u32.totalorder %s6903_s0, %s8622_s4 }
  0x25   :  { %p6909_p10 = pnand %p6907_p9, %p6904_p8 }
  0x27   :  { %6912 = shalt.err (!%p6909_p10)
}
  0x28   :  { %s6913_s22 = scalar_lea.vmem %s48_s3, 12288  ;;  %p6918_p12 = scmp.lt.s32.totalorder %s48_s3, %s48_s3 }
  0x29   :  { %p6914_p11 = scmp.ne.s32.totalorder %s48_s3, %s6913_s22  ;;  %p6919_p13 = scmp.lt.s32.totalorder %s6913_s22, %s6913_s22 }
  0x2b   :  { %p6920_p0 = por %p6919_p13, %p6918_p12 }
  0x2d   :  { %p6921_p1 = pnand %p6920_p0, %p6914_p11 }
  0x2f   :  { %6924 = shalt.err (!%p6921_p1)
}
  0x30   :  { %s6979_s8 = smov 384   ;;  %s6980_s28 = smov 24  }
  0x31   :  { %53 = dma.hbm_to_vmem [thread:$0]  %s8622_s4, 12288, %s48_s3, [#allocation3], %s6979_s8, %s6979_s8, %s6980_s28  }
  0x32   :  { %s6981_s27 = smov [#allocation7]   ;;  %s6925_s23 = scalar_lea.hbm %s8596_s14, 16384 }
  0x33   :  { %s83_s29 = sshll.u32 %s6981_s27, 4  ;;  %p6926_p2 = scmp.ne.s32.totalorder %s8596_s14, %s6925_s23  ;;  %s84_s29 = int_to_ptr.vmem [resolvable:$true] %s83_s29 }
  0x34   :  { %p6929_p3 = scmp.lt.u32.totalorder %s6925_s23, %s8596_s14 }
  0x36   :  { %p6931_p4 = pnand %p6929_p3, %p6926_p2 }
  0x38   :  { %6934 = shalt.err (!%p6931_p4)
}
  0x39   :  { %s6935_s6 = scalar_lea.vmem %s84_s29, 16384  ;;  %p6940_p6 = scmp.lt.s32.totalorder %s84_s29, %s84_s29 }
  0x3a   :  { %p6936_p5 = scmp.ne.s32.totalorder %s84_s29, %s6935_s6  ;;  %p6941_p7 = scmp.lt.s32.totalorder %s6935_s6, %s6935_s6 }
  0x3c   :  { %p6942_p8 = por %p6941_p7, %p6940_p6 }
  0x3e   :  { %p6943_p9 = pnand %p6942_p8, %p6936_p5 }
  0x40   :  { %6946 = shalt.err (!%p6943_p9)
}
  0x41   :  { %s8623_s3 = smov 128  }
  0x42   :  { %89 = dma.hbm_to_vmem [thread:$0]  %s8596_s14, 16384, %s84_s29, [#allocation6], %s8623_s3, %s8623_s3, %s6977_s25  }
  0x43   :  { %6969 = dma.done.wait [#allocation3], 12288  }
  0x44   :  { %6970 = vsyncadd [#allocation3], 4294955008 }
  0x45   :  { %6971 = dma.done.wait [#allocation6], 20480  }
  0x46   :  { %6972 = vsyncadd [#allocation6], 4294946816  ;;  %s8624_s2 = sld [smem:[#allocation13_spill]]  ;;  %s8625_s23 = sld [smem:[#allocation12_spill]]  ;;  %vm6983_vm0 = vmmov 0   ;;  %vm707_vm1 = vcmask 261120  }
  0x47   :  { %s8626_s6 = sld [smem:[#allocation14_spill]]  ;;  %s8627_s14 = sld [smem:[#allocation16_spill]]  ;;  %vm864_vm2 = vcmask 64512   ;;  %vm2063_vm3 = vcmask 523264   ;;  %vm2066_vm4 = vcmask 785408   ;;  %vm5059_vm5 = vcmask 1041409  }
  0x48   :  { %s8628_s5 = sld [smem:[#allocation17_spill]]  ;;  %s8629_s8 = sld [smem:[#allocation15_spill]]  ;;  %vm5062_vm6 = vcmask 1041408  }
  0x49   :  { %s6984_s28 = smov 96   ;;  %s6985_s26 = smov 64  }
  0x4c   :  { %v141_v0 = vld [vmem:[%s8624_s2 + $0x80] sm:$0xff]  ;;  %v142_v1 = vld [vmem:[%s8624_s2 + $0x88] sm:$0xff]  ;;  %v143_v11 = vld [vmem:[%s8624_s2 + $0x90] sm:$0xff] }
  0x4d   :  { %v125_v2 = vld [vmem:[%s8624_s2] sm:$0xff]  ;;  %v6152_v3 = vpack.c.bf16 %v142_v1, %v141_v0  ;;  %v126_v4 = vld [vmem:[%s8624_s2 + $0x8] sm:$0xff]  ;;  %v144_v13 = vld [vmem:[%s8624_s2 + $0x98] sm:$0xff] }
  0x4e   :  { %v173_v5 = vld [vmem:[%s8624_s2 + $0x180] sm:$0xff]  ;;  %v174_v6 = vld [vmem:[%s8624_s2 + $0x188] sm:$0xff]  ;;  %v6154_v7 = vpack.c.bf16 %v126_v4, %v125_v2  ;;  %v127_v14 = vld [vmem:[%s8624_s2 + $0x10] sm:$0xff]  ;;  %v6156_v16 = vpack.c.bf16 %v144_v13, %v143_v11 }
  0x4f   :  { %v6184_v8 = vpack.c.bf16 %v174_v6, %v173_v5  ;;  %v157_v9 = vld [vmem:[%s8624_s2 + $0x100] sm:$0xff]  ;;  %v158_v10 = vld [vmem:[%s8624_s2 + $0x108] sm:$0xff]  ;;  %6153 = vmatprep.subr.bf16.mxu0 %v6152_v3  ;;  %v128_v15 = vld [vmem:[%s8624_s2 + $0x18] sm:$0xff] }
  0x50   :  { %v6186_v12 = vpack.c.bf16 %v158_v10, %v157_v9  ;;  %6155 = vmatpush3.bf16.msra.mxu0 %v6154_v7  ;;  %v6158_v17 = vpack.c.bf16 %v128_v15, %v127_v14  ;;  %v175_v18 = vld [vmem:[%s8624_s2 + $0x190] sm:$0xff]  ;;  %v176_v19 = vld [vmem:[%s8624_s2 + $0x198] sm:$0xff]  ;;  %v145_v23 = vld [vmem:[%s8624_s2 + $0xa0] sm:$0xff] }
  0x51   :  { %6185 = vmatprep.subr.bf16.mxu1 %v6184_v8  ;;  %v159_v20 = vld [vmem:[%s8624_s2 + $0x110] sm:$0xff]  ;;  %v6188_v21 = vpack.c.bf16 %v176_v19, %v175_v18  ;;  %v160_v22 = vld [vmem:[%s8624_s2 + $0x118] sm:$0xff]  ;;  %v146_v24 = vld [vmem:[%s8624_s2 + $0xa8] sm:$0xff]  ;;  %6157 = vmatprep.subr.bf16.mxu0 %v6156_v16 }
  0x52   :  { %6187 = vmatpush3.bf16.msra.mxu1 %v6186_v12  ;;  %v6190_v25 = vpack.c.bf16 %v160_v22, %v159_v20  ;;  %v6160_v26 = vpack.c.bf16 %v146_v24, %v145_v23  ;;  %v129_v27 = vld [vmem:[%s8624_s2 + $0x20] sm:$0xff]  ;;  %v130_v28 = vld [vmem:[%s8624_s2 + $0x28] sm:$0xff]  ;;  %v147_v35 = vld [vmem:[%s8624_s2 + $0xb0] sm:$0xff] }
  0x53   :  { %v177_v29 = vld [vmem:[%s8624_s2 + $0x1a0] sm:$0xff]  ;;  %6189 = vmatprep.subr.bf16.mxu1 %v6188_v21  ;;  %v178_v30 = vld [vmem:[%s8624_s2 + $0x1a8] sm:$0xff]  ;;  %v6162_v33 = vpack.c.bf16 %v130_v28, %v129_v27  ;;  %v148_v36 = vld [vmem:[%s8624_s2 + $0xb8] sm:$0xff] }
  0x54   :  { %v161_v31 = vld [vmem:[%s8624_s2 + $0x120] sm:$0xff]  ;;  %v162_v32 = vld [vmem:[%s8624_s2 + $0x128] sm:$0xff]  ;;  %6159 = vmatpush3.bf16.msra.mxu0 %v6158_v17  ;;  %v6192_v34 = vpack.c.bf16 %v178_v30, %v177_v29  ;;  %v131_v37 = vld [vmem:[%s8624_s2 + $0x30] sm:$0xff]  ;;  %v6164_v39 = vpack.c.bf16 %v148_v36, %v147_v35 }
  0x55   :  { %6161 = vmatprep.subr.bf16.mxu0 %v6160_v26  ;;  %v6194_v38 = vpack.c.bf16 %v162_v32, %v161_v31  ;;  %v132_v40 = vld [vmem:[%s8624_s2 + $0x38] sm:$0xff]  ;;  %v179_v41 = vld [vmem:[%s8624_s2 + $0x1b0] sm:$0xff]  ;;  %v149_v46 = vld [vmem:[%s8624_s2 + $0xc0] sm:$0xff] }
  0x56   :  { %6191 = vmatpush3.bf16.msra.mxu1 %v6190_v25  ;;  %v180_v42 = vld [vmem:[%s8624_s2 + $0x1b8] sm:$0xff]  ;;  %v163_v44 = vld [vmem:[%s8624_s2 + $0x130] sm:$0xff]  ;;  %v150_v47 = vld [vmem:[%s8624_s2 + $0xc8] sm:$0xff]  ;;  %v6166_v48 = vpack.c.bf16 %v132_v40, %v131_v37 }
  0x57   :  { %6193 = vmatprep.subr.bf16.mxu1 %v6192_v34  ;;  %v6196_v43 = vpack.c.bf16 %v180_v42, %v179_v41  ;;  %v164_v45 = vld [vmem:[%s8624_s2 + $0x138] sm:$0xff]  ;;  %v181_v49 = vld [vmem:[%s8624_s2 + $0x1c0] sm:$0xff]  ;;  %v182_v50 = vld [vmem:[%s8624_s2 + $0x1c8] sm:$0xff]  ;;  %v6168_v52 = vpack.c.bf16 %v150_v47, %v149_v46 }
  0x58   :  { %6163 = vmatpush3.bf16.msra.mxu0 %v6162_v33  ;;  %v6198_v51 = vpack.c.bf16 %v164_v45, %v163_v44  ;;  %v133_v53 = vld [vmem:[%s8624_s2 + $0x40] sm:$0xff]  ;;  %v134_v54 = vld [vmem:[%s8624_s2 + $0x48] sm:$0xff]  ;;  %v6200_v56 = vpack.c.bf16 %v182_v50, %v181_v49  ;;  %v151_v58 = vld [vmem:[%s8624_s2 + $0xd0] sm:$0xff] }
  0x59   :  { %6165 = vmatprep.subr.bf16.mxu0 %v6164_v39  ;;  %v165_v55 = vld [vmem:[%s8624_s2 + $0x140] sm:$0xff]  ;;  %v166_v57 = vld [vmem:[%s8624_s2 + $0x148] sm:$0xff]  ;;  %v152_v59 = vld [vmem:[%s8624_s2 + $0xd8] sm:$0xff]  ;;  %v6170_v62 = vpack.c.bf16 %v134_v54, %v133_v53 }
  0x5a   :  { %6195 = vmatpush3.bf16.msra.mxu1 %v6194_v38  ;;  %v183_v60 = vld [vmem:[%s8624_s2 + $0x1d0] sm:$0xff]  ;;  %v184_v61 = vld [vmem:[%s8624_s2 + $0x1d8] sm:$0xff]  ;;  %v6202_v63 = vpack.c.bf16 %v166_v57, %v165_v55  ;;  %v6172_v0 = vpack.c.bf16 %v152_v59, %v151_v58  ;;  %v153_v6 = vld [vmem:[%s8624_s2 + $0xe0] sm:$0xff] }
  0x5b   :  { %6197 = vmatprep.subr.bf16.mxu1 %v6196_v43  ;;  %v135_v1 = vld [vmem:[%s8624_s2 + $0x50] sm:$0xff]  ;;  %v136_v2 = vld [vmem:[%s8624_s2 + $0x58] sm:$0xff]  ;;  %v6204_v4 = vpack.c.bf16 %v184_v61, %v183_v60  ;;  %v154_v7 = vld [vmem:[%s8624_s2 + $0xe8] sm:$0xff] }
  0x5c   :  { %6167 = vmatpush3.bf16.msra.mxu0 %v6166_v48  ;;  %v167_v3 = vld [vmem:[%s8624_s2 + $0x150] sm:$0xff]  ;;  %v168_v5 = vld [vmem:[%s8624_s2 + $0x158] sm:$0xff]  ;;  %v185_v8 = vld [vmem:[%s8624_s2 + $0x1e0] sm:$0xff]  ;;  %v6174_v10 = vpack.c.bf16 %v136_v2, %v135_v1  ;;  %v6176_v14 = vpack.c.bf16 %v154_v7, %v153_v6 }
  0x5d   :  { %6169 = vmatprep.subr.bf16.mxu0 %v6168_v52  ;;  %v186_v9 = vld [vmem:[%s8624_s2 + $0x1e8] sm:$0xff]  ;;  %v137_v11 = vld [vmem:[%s8624_s2 + $0x60] sm:$0xff]  ;;  %v6206_v13 = vpack.c.bf16 %v168_v5, %v167_v3  ;;  %v155_v19 = vld [vmem:[%s8624_s2 + $0xf0] sm:$0xff] }
  0x5e   :  { %6199 = vmatpush3.bf16.msra.mxu1 %v6198_v51  ;;  %v114_v12 = vld [vmem:[%s8625_s23 + $0x8] sm:$0xff]  ;;  %v169_v16 = vld [vmem:[%s8624_s2 + $0x160] sm:$0xff]  ;;  %v6208_v18 = vpack.c.bf16 %v186_v9, %v185_v8  ;;  %v156_v20 = vld [vmem:[%s8624_s2 + $0xf8] sm:$0xff] }
  0x5f   :  { %6201 = vmatprep.subr.bf16.mxu1 %v6200_v56  ;;  %v138_v15 = vld [vmem:[%s8624_s2 + $0x68] sm:$0xff]  ;;  %287 = vmatprep.mubr.f32.mxu0 %v114_v12  ;;  %v116_v21 = vld [vmem:[%s8625_s23 + $0x18] sm:$0xff]  ;;  %v187_v22 = vld [vmem:[%s8624_s2 + $0x1f0] sm:$0xff]  ;;  %v6180_v26 = vpack.c.bf16 %v156_v20, %v155_v19 }
  0x60   :  { %6171 = vmatpush3.bf16.msra.mxu0 %v6170_v62  ;;  %v170_v17 = vld [vmem:[%s8624_s2 + $0x168] sm:$0xff]  ;;  %v188_v23 = vld [vmem:[%s8624_s2 + $0x1f8] sm:$0xff]  ;;  %362 = vmatprep.mubr.f32.mxu1 %v116_v21  ;;  %v6178_v24 = vpack.c.bf16 %v138_v15, %v137_v11  ;;  %v139_v27 = vld [vmem:[%s8624_s2 + $0x70] sm:$0xff] }
  0x61   :  { %6173 = vmatprep.subr.bf16.mxu0 %v6172_v0  ;;  %v6210_v25 = vpack.c.bf16 %v170_v17, %v169_v16  ;;  %v140_v28 = vld [vmem:[%s8624_s2 + $0x78] sm:$0xff]  ;;  %v171_v29 = vld [vmem:[%s8624_s2 + $0x170] sm:$0xff]  ;;  %v6212_v30 = vpack.c.bf16 %v188_v23, %v187_v22  ;;  %v205_v32 = vld [vmem:[%s8624_s2 + $0x280] sm:$0xff] }
  0x62   :  { %6203 = vmatpush3.bf16.msra.mxu1 %v6202_v63  ;;  %v172_v31 = vld [vmem:[%s8624_s2 + $0x178] sm:$0xff]  ;;  %v206_v33 = vld [vmem:[%s8624_s2 + $0x288] sm:$0xff]  ;;  %v6182_v34 = vpack.c.bf16 %v140_v28, %v139_v27  ;;  %v189_v37 = vld [vmem:[%s8624_s2 + $0x200] sm:$0xff] }
  0x63   :  { %6205 = vmatprep.subr.bf16.mxu1 %v6204_v4  ;;  %v6214_v35 = vpack.c.bf16 %v172_v31, %v171_v29  ;;  %v6216_v36 = vpack.c.bf16 %v206_v33, %v205_v32  ;;  %v190_v38 = vld [vmem:[%s8624_s2 + $0x208] sm:$0xff]  ;;  %v207_v39 = vld [vmem:[%s8624_s2 + $0x290] sm:$0xff]  ;;  %v208_v40 = vld [vmem:[%s8624_s2 + $0x298] sm:$0xff] }
  0x64   :  { %6175 = vmatpush3.bf16.msra.mxu0 %v6174_v10  ;;  %v113_v41 = vld [vmem:[%s8625_s23] sm:$0xff]  ;;  %v6218_v42 = vpack.c.bf16 %v190_v38, %v189_v37  ;;  %v115_v43 = vld [vmem:[%s8625_s23 + $0x10] sm:$0xff]  ;;  %v6220_v44 = vpack.c.bf16 %v208_v40, %v207_v39  ;;  %v192_v46 = vld [vmem:[%s8624_s2 + $0x218] sm:$0xff] }
  0x65   :  { %6177 = vmatprep.subr.bf16.mxu0 %v6176_v14  ;;  %v191_v45 = vld [vmem:[%s8624_s2 + $0x210] sm:$0xff]  ;;  %v209_v47 = vld [vmem:[%s8624_s2 + $0x2a0] sm:$0xff]  ;;  %v210_v48 = vld [vmem:[%s8624_s2 + $0x2a8] sm:$0xff] }
  0x66   :  { %6207 = vmatpush3.bf16.msra.mxu1 %v6206_v13  ;;  %v120_v49 = vld [vmem:[%s8625_s23 + $0x38] sm:$0xff]  ;;  %v122_v50 = vld [vmem:[%s8625_s23 + $0x48] sm:$0xff]  ;;  %v6222_v51 = vpack.c.bf16 %v192_v46, %v191_v45  ;;  %v119_v52 = vld [vmem:[%s8625_s23 + $0x30] sm:$0xff]  ;;  %v6224_v53 = vpack.c.bf16 %v210_v48, %v209_v47 }
  0x67   :  { %6209 = vmatprep.subr.bf16.mxu1 %v6208_v18  ;;  %v193_v54 = vld [vmem:[%s8624_s2 + $0x220] sm:$0xff]  ;;  %v194_v55 = vld [vmem:[%s8624_s2 + $0x228] sm:$0xff]  ;;  %v211_v57 = vld [vmem:[%s8624_s2 + $0x2b0] sm:$0xff] }
  0x68   :  { %6179 = vmatpush3.bf16.msra.mxu0 %v6178_v24  ;;  %v121_v56 = vld [vmem:[%s8625_s23 + $0x40] sm:$0xff]  ;;  %v212_v58 = vld [vmem:[%s8624_s2 + $0x2b8] sm:$0xff]  ;;  %v118_v59 = vld [vmem:[%s8625_s23 + $0x28] sm:$0xff]  ;;  %v6226_v60 = vpack.c.bf16 %v194_v55, %v193_v54 }
  0x69   :  { %6181 = vmatprep.subr.bf16.mxu0 %v6180_v26  ;;  %v6228_v61 = vpack.c.bf16 %v212_v58, %v211_v57  ;;  %v195_v62 = vld [vmem:[%s8624_s2 + $0x230] sm:$0xff]  ;;  %v196_v63 = vld [vmem:[%s8624_s2 + $0x238] sm:$0xff]  ;;  %v213_v0 = vld [vmem:[%s8624_s2 + $0x2c0] sm:$0xff] }
  0x6a   :  { %6211 = vmatpush3.bf16.msra.mxu1 %v6210_v25  ;;  %v214_v1 = vld [vmem:[%s8624_s2 + $0x2c8] sm:$0xff]  ;;  %v6230_v2 = vpack.c.bf16 %v196_v63, %v195_v62  ;;  %v197_v4 = vld [vmem:[%s8624_s2 + $0x240] sm:$0xff]  ;;  %v215_v6 = vld [vmem:[%s8624_s2 + $0x2d0] sm:$0xff] }
  0x6b   :  { %6213 = vmatprep.subr.bf16.mxu1 %v6212_v30  ;;  %v6232_v3 = vpack.c.bf16 %v214_v1, %v213_v0  ;;  %v198_v5 = vld [vmem:[%s8624_s2 + $0x248] sm:$0xff]  ;;  %v216_v7 = vld [vmem:[%s8624_s2 + $0x2d8] sm:$0xff]  ;;  %v199_v10 = vld [vmem:[%s8624_s2 + $0x250] sm:$0xff] }
  0x6c   :  { %6183 = vmatpush3.bf16.msra.mxu0 %v6182_v34  ;;  %v6234_v8 = vpack.c.bf16 %v198_v5, %v197_v4  ;;  %v6236_v9 = vpack.c.bf16 %v216_v7, %v215_v6  ;;  %v200_v11 = vld [vmem:[%s8624_s2 + $0x258] sm:$0xff]  ;;  %v217_v12 = vld [vmem:[%s8624_s2 + $0x2e0] sm:$0xff]  ;;  %v218_v13 = vld [vmem:[%s8624_s2 + $0x2e8] sm:$0xff] }
  0x6d   :  { %6217 = vmatprep.subr.bf16.mxu0 %v6216_v36  ;;  %v6238_v14 = vpack.c.bf16 %v200_v11, %v199_v10  ;;  %v6240_v15 = vpack.c.bf16 %v218_v13, %v217_v12  ;;  %v201_v16 = vld [vmem:[%s8624_s2 + $0x260] sm:$0xff]  ;;  %v202_v17 = vld [vmem:[%s8624_s2 + $0x268] sm:$0xff]  ;;  %v219_v18 = vld [vmem:[%s8624_s2 + $0x2f0] sm:$0xff] }
  0x6e   :  { %6215 = vmatpush3.bf16.msra.mxu1 %v6214_v35  ;;  %v220_v19 = vld [vmem:[%s8624_s2 + $0x2f8] sm:$0xff]  ;;  %v6242_v20 = vpack.c.bf16 %v202_v17, %v201_v16  ;;  %v203_v22 = vld [vmem:[%s8624_s2 + $0x270] sm:$0xff]  ;;  %v117_v25 = vld [vmem:[%s8625_s23 + $0x20] sm:$0xff] }
  0x6f   :  { %288 = vmatmul.mubr.f32.vlgmr.msra.gmra.mrb[0].mxu0 %v113_v41  ;;  %v6244_v21 = vpack.c.bf16 %v220_v19, %v219_v18  ;;  %v204_v23 = vld [vmem:[%s8624_s2 + $0x278] sm:$0xff]  ;;  %v123_v27 = vld [vmem:[%s8625_s23 + $0x50] sm:$0xff]  ;;  %v221_v29 = vld [vmem:[%s8626_s6] sm:$0xff]  ;;  %s6986_s2 = smov 32  }
  0x70   :  { %6219 = vmatpush3.bf16.msra.mxu0 %v6218_v42  ;;  %292 = vmatprep.mubr.f32.mxu0 %v120_v49  ;;  %v6246_v24 = vpack.c.bf16 %v204_v23, %v203_v22  ;;  %v124_v26 = vld [vmem:[%s8625_s23 + $0x58] sm:$0xff]  ;;  %v222_v37 = vld [vmem:[%s8626_s6 + $0x8] sm:$0xff]  ;;  %v494_v55 = vld [vmem:[#allocation2 + $0x20] sm:$0xff] }
  0x71   :  { %363 = vmatmul.mubr.f32.vlgmr.msra.gmra.mrb[0].mxu1 %v115_v43  ;;  %6221 = vmatprep.subr.bf16.mxu0 %v6220_v44  ;;  %v491_v54 = vld [vmem:[#allocation2 + $0x8] sm:$0xff]  ;;  %v493_v58 = vld [vmem:[#allocation2 + $0x18] sm:$0xff]  ;;  %v492_v63 = vld [vmem:[#allocation2 + $0x10] sm:$0xff] }
  0x72   :  { %367 = vmatprep.mubr.f32.mxu1 %v122_v50  ;;  %v6248_v57 = vpack.c.bf16 %v494_v55, %v491_v54  ;;  %v495_v0 = vld [vmem:[#allocation2 + $0x28] sm:$0xff]  ;;  %v496_v1 = vld [vmem:[#allocation2 + $0x30] sm:$0xff]  ;;  %v506_v5 = vld [vmem:[#allocation2 + $0x80] sm:$0xff] }
  0x73   :  { %293 = vmatmul.mubr.f32.gmra.mrb[2].mxu0 %v119_v52  ;;  %v503_v4 = vld [vmem:[#allocation2 + $0x68] sm:$0xff]  ;;  %v498_v7 = vld [vmem:[#allocation2 + $0x40] sm:$0xff]  ;;  %v505_v12 = vld [vmem:[#allocation2 + $0x78] sm:$0xff] }
  0x74   :  { %6223 = vmatpush3.bf16.msra.mxu0 %v6222_v51  ;;  %437 = vmatprep.mubr.f32.mxu0 %v118_v59  ;;  %v497_v59 = vld [vmem:[#allocation2 + $0x38] sm:$0xff]  ;;  %v502_v11 = vld [vmem:[#allocation2 + $0x60] sm:$0xff]  ;;  %v512_v23 = vld [vmem:[#allocation2 + $0xb0] sm:$0xff] }
  0x75   :  { %368 = vmatmul.mubr.f32.gmra.mrb[2].mxu1 %v121_v56  ;;  %6225 = vmatprep.subr.bf16.mxu0 %v6224_v53  ;;  %v490_v56 = vld [vmem:[#allocation2] sm:$0xff]  ;;  %v6258_v13 = vpack.c.bf16 %v505_v12, %v502_v11  ;;  %v509_v22 = vld [vmem:[#allocation2 + $0x98] sm:$0xff] }
  0x76   :  { %6249 = vmatprep.subr.bf16.mxu1 %v6248_v57  ;;  %v525_v55 = vld [vmem:[#allocation2 + $0x118] sm:$0xff] }
  0x77   :  { %v529_v57 = vld [vmem:[#allocation2 + $0x138] sm:$0xff] }
  0x78   :  { %6227 = vmatpush3.bf16.msra.mxu0 %v6226_v60  ;;  %v500_v60 = vld [vmem:[#allocation2 + $0x50] sm:$0xff] }
  0x79   :  { %6229 = vmatprep.subr.bf16.mxu0 %v6228_v61  ;;  %v6250_v61 = vpack.c.bf16 %v493_v58, %v490_v56  ;;  %v6252_v62 = vpack.c.bf16 %v500_v60, %v497_v59  ;;  %v526_v56 = vld [vmem:[#allocation2 + $0x120] sm:$0xff]  ;;  %v533_v60 = vld [vmem:[#allocation2 + $0x158] sm:$0xff] }
  0x7a   :  { %v6274_v59 = vpack.c.bf16 %v529_v57, %v526_v56 }
  0x7b   :  { %6251 = vmatpush1.bf16.msra.mxu1 %v6250_v61  ;;  %v536_v61 = vld [vmem:[#allocation2 + $0x170] sm:$0xff] }
  0x7c   :  { %6231 = vmatpush3.bf16.msra.mxu0 %v6230_v2  ;;  %v6280_v2 = vpack.c.bf16 %v495_v0, %v492_v63  ;;  %6253 = vmatprep.subr.bf16.mxu1 %v6252_v62  ;;  %v528_v62 = vld [vmem:[#allocation2 + $0x130] sm:$0xff]  ;;  %v6276_v63 = vpack.c.bf16 %v536_v61, %v533_v60  ;;  %v531_v0 = vld [vmem:[#allocation2 + $0x148] sm:$0xff] }
  0x7d   :  { %6233 = vmatprep.subr.bf16.mxu0 %v6232_v3  ;;  %v499_v3 = vld [vmem:[#allocation2 + $0x48] sm:$0xff] }
  0x7e   :  { %v6254_v6 = vpack.c.bf16 %v499_v3, %v496_v1  ;;  %v532_v1 = vld [vmem:[#allocation2 + $0x150] sm:$0xff]  ;;  %v6304_v3 = vpack.c.bf16 %v531_v0, %v528_v62 }
  0x80   :  { %6235 = vmatpush3.bf16.msra.mxu0 %v6234_v8  ;;  %v501_v8 = vld [vmem:[#allocation2 + $0x58] sm:$0xff]  ;;  %6255 = vmatpush1.bf16.msra.mxu1 %v6254_v6  ;;  %v534_v6 = vld [vmem:[#allocation2 + $0x160] sm:$0xff] }
  0x81   :  { %6237 = vmatprep.subr.bf16.mxu0 %v6236_v9  ;;  %v6256_v9 = vpack.c.bf16 %v506_v5, %v503_v4  ;;  %v6284_v10 = vpack.c.bf16 %v501_v8, %v498_v7  ;;  %v6982_v5 = vmov 0.0   ;;  %v537_v7 = vld [vmem:[#allocation2 + $0x178] sm:$0xff] }
  0x82   :  { %619 = vmatprep.mubr.f32.mxu1 %v6982_v5  ;;  %v6308_v8 = vpack.c.bf16 %v537_v7, %v534_v6 }
  0x83   :  { %6257 = vmatprep.subr.bf16.mxu1 %v6256_v9 }
  0x84   :  { %6239 = vmatpush3.bf16.msra.mxu0 %v6238_v14  ;;  %6259 = vmatpush1.bf16.msra.mxu1 %v6258_v13 }
  0x85   :  { %6241 = vmatprep.subr.bf16.mxu0 %v6240_v15 }
  0x88   :  { %6243 = vmatpush3.bf16.msra.mxu0 %v6242_v20 }
  0x89   :  { %6245 = vmatprep.subr.bf16.mxu0 %v6244_v21 }
  0x8c   :  { %6247 = vmatpush3.bf16.msra.mxu0 %v6246_v24  ;;  %v504_v24 = vld [vmem:[#allocation2 + $0x70] sm:$0xff] }
  0x8d   :  { %6281 = vmatprep.subr.bf16.mxu0 %v6280_v2 }
  0x8f   :  { %438 = vmatmul.mubr.f32.vlgmr.msra.gmra.mrb[4].mxu0 %v117_v25  ;;  %v6260_v25 = vpack.c.bf16 %v512_v23, %v509_v22 }
  0x90   :  { %442 = vmatprep.mubr.f32.mxu0 %v124_v26  ;;  %6283 = vmatpush3.bf16.msra.mxu0 %v6280_v2  ;;  %v507_v26 = vld [vmem:[#allocation2 + $0x88] sm:$0xff] }
  0x91   :  { %6285 = vmatprep.subr.bf16.mxu0 %v6284_v10  ;;  %6261 = vmatprep.subr.bf16.mxu1 %v6260_v25  ;;  %v535_v2 = vld [vmem:[#allocation2 + $0x168] sm:$0xff] }
  0x92   :  { %v6278_v4 = vpack.c.bf16 %v535_v2, %v532_v1 }
  0x93   :  { %443 = vmatmul.mubr.f32.gmra.mrb[6].mxu0 %v123_v27  ;;  %v508_v27 = vld [vmem:[#allocation2 + $0x90] sm:$0xff] }
  0x94   :  { %6287 = vmatpush3.bf16.msra.mxu0 %v6284_v10 }
 0x142   :  { %v5430_v28 = vpop.f32.mrb[0].mxu0 }
 0x143   :  { %v5431_v30 = vpop.f32.mrb[1].mxu0 }
 0x144   :  { %v5468_v31 = vpop.f32.mrb[0].mxu1  ;;  %v5432_v32 = vadd.f32 %v5431_v30, %v5430_v28  ;;  %v511_v28 = vld [vmem:[#allocation2 + $0xa8] sm:$0xff] }
 0x145   :  { %v5469_v33 = vpop.f32.mrb[1].mxu1  ;;  %v6262_v30 = vpack.c.bf16 %v511_v28, %v508_v27  ;;  %v538_v28 = vld [vmem:[%s8589_s7] sm:$0x7] }
 0x146   :  { %v5470_v34 = vadd.f32 %v5469_v33, %v5468_v31  ;;  %v290_v35 = vadd.f32 %v5432_v32, %v221_v29  ;;  %v5433_v36 = vpop.f32.mrb[2].mxu0  ;;  %v6288_v29 = vpack.c.bf16 %v507_v26, %v504_v24  ;;  %v515_v31 = vld [vmem:[#allocation2 + $0xc8] sm:$0xff]  ;;  %v518_v32 = vld [vmem:[#allocation2 + $0xe0] sm:$0xff] }
 0x147   :  { %v5434_v38 = vpop.f32.mrb[3].mxu0  ;;  %6263 = vmatpush1.bf16.msra.mxu1 %v6262_v30  ;;  %v510_v33 = vld [vmem:[#allocation2 + $0xa0] sm:$0xff] }
 0x148   :  { %v5471_v39 = vpop.f32.mrb[2].mxu1  ;;  %v365_v40 = vadd.f32 %v5470_v34, %v290_v35  ;;  %v5435_v41 = vadd.f32 %v5434_v38, %v5433_v36  ;;  %6289 = vmatprep.subr.bf16.mxu0 %v6288_v29  ;;  %v6264_v34 = vpack.c.bf16 %v518_v32, %v515_v31  ;;  %v513_v35 = vld [vmem:[#allocation2 + $0xb8] sm:$0xff]  ;;  %v514_v36 = vld [vmem:[#allocation2 + $0xc0] sm:$0xff] }
 0x149   :  { %v5472_v42 = vpop.f32.mrb[3].mxu1  ;;  %6291 = vmatpush3.bf16.msra.mxu0 %v6288_v29  ;;  %v6292_v38 = vpack.c.bf16 %v513_v35, %v510_v33 }
 0x14a   :  { %v5473_v43 = vadd.f32 %v5472_v42, %v5471_v39  ;;  %v295_v44 = vadd.f32 %v5435_v41, %v222_v37  ;;  %v517_v37 = vld [vmem:[#allocation2 + $0xd8] sm:$0xff]  ;;  %6265 = vmatprep.subr.bf16.mxu1 %v6264_v34  ;;  %v524_v41 = vld [vmem:[#allocation2 + $0x110] sm:$0xff] }
 0x14b   :  { %v6266_v39 = vpack.c.bf16 %v517_v37, %v514_v36  ;;  %6293 = vmatprep.subr.bf16.mxu0 %v6292_v38  ;;  %v516_v42 = vld [vmem:[#allocation2 + $0xd0] sm:$0xff] }
 0x14c   :  { %v370_v45 = vadd.f32 %v5473_v43, %v295_v44  ;;  %v519_v44 = vld [vmem:[#allocation2 + $0xe8] sm:$0xff] }
 0x14d   :  { %6267 = vmatpush1.bf16.msra.mxu1 %v6266_v39  ;;  %6295 = vmatpush3.bf16.msra.mxu0 %v6292_v38 }
 0x162   :  { %v5506_v46 = vpop.f32.mrb[4].mxu0 }
 0x163   :  { %v5507_v47 = vpop.f32.mrb[5].mxu0 }
 0x164   :  { %v5508_v48 = vadd.f32 %v5507_v47, %v5506_v46  ;;  %v523_v46 = vld [vmem:[#allocation2 + $0x108] sm:$0xff]  ;;  %v6296_v47 = vpack.c.bf16 %v519_v44, %v516_v42 }
 0x166   :  { %v7476_v49 = vadd.f32 %v5508_v48, %v365_v40  ;;  %v5509_v50 = vpop.f32.mrb[6].mxu0  ;;  %v521_v40 = vld [vmem:[#allocation2 + $0xf8] sm:$0xff]  ;;  %6297 = vmatprep.subr.bf16.mxu0 %v6296_v47 }
 0x167   :  { %v5510_v51 = vpop.f32.mrb[7].mxu0  ;;  %v6268_v43 = vpack.c.bf16 %v524_v41, %v521_v40  ;;  %6299 = vmatpush3.bf16.msra.mxu0 %v6296_v47  ;;  %v7556_v47 = vld [vmem:[%s8629_s8] sm:$0xff] }
 0x168   :  { %v5511_v52 = vadd.f32 %v5510_v51, %v5509_v50  ;;  %451 = vadd.xlane.f32.xlu0 %v7476_v49  ;;  %v527_v50 = vld [vmem:[#allocation2 + $0x128] sm:$0xff]  ;;  %v530_v51 = vld [vmem:[#allocation2 + $0x140] sm:$0xff] }
 0x169   :  { %6269 = vmatprep.subr.bf16.mxu1 %v6268_v43  ;;  %v6272_v54 = vpack.c.bf16 %v530_v51, %v527_v50 }
 0x16a   :  { %v7479_v53 = vadd.f32 %v5511_v52, %v370_v45  ;;  %v520_v45 = vld [vmem:[#allocation2 + $0xf0] sm:$0xff]  ;;  %v522_v52 = vld [vmem:[#allocation2 + $0x100] sm:$0xff] }
 0x16b   :  { %v6270_v48 = vpack.c.bf16 %v523_v46, %v520_v45  ;;  %v6300_v58 = vpack.c.bf16 %v525_v55, %v522_v52 }
 0x16c   :  { %453 = vadd.xlane.f32.xlu0 %v7479_v53 }
 0x16d   :  { %6271 = vmatpush1.bf16.msra.mxu1 %v6270_v48  ;;  %6301 = vmatprep.subr.bf16.mxu0 %v6300_v58 }
 0x16e   :  { %6273 = vmatprep.subr.bf16.mxu1 %v6272_v54  ;;  %6303 = vmatpush3.bf16.msra.mxu0 %v6300_v58 }
 0x16f   :  { %6305 = vmatprep.subr.bf16.mxu0 %v6304_v3 }
 0x171   :  { %6275 = vmatpush1.bf16.msra.mxu1 %v6274_v59 }
 0x172   :  { %6277 = vmatprep.subr.bf16.mxu1 %v6276_v63  ;;  %6307 = vmatpush3.bf16.msra.mxu0 %v6304_v3 }
 0x173   :  { %6309 = vmatprep.subr.bf16.mxu0 %v6308_v8 }
 0x175   :  { %6279 = vmatpush1.bf16.msra.mxu1 %v6278_v4 }
 0x176   :  { %5852 = vmatprep.subr.mxu1 %v6982_v5  ;;  %6311 = vmatpush3.bf16.msra.mxu0 %v6308_v8 }
 0x177   :  { %5887 = vmatprep.subr.mxu0 %v6982_v5 }
 0x1f5   :  { %v452_v14 = vpop.xlane.xlu0 %451 }
 0x1f6   :  { %v456_v15 = vmul.f32 0.0078125, %v452_v14 }
 0x1f8   :  { %v7483_v16 = vsub.f32 %v7476_v49, %v456_v15 }
 0x1f9   :  { %v454_v17 = vpop.xlane.xlu0 %453 }
 0x1fa   :  { %v457_v18 = vmul.f32 0.0078125, %v454_v17  ;;  %v460_v19 = vmul.f32 %v7483_v16, %v7483_v16  ;;  %v5261_v17 = vld [vmem:[%s8627_s14] ss:$0 sm:$0xff] }
 0x1fc   :  { %v7488_v20 = vsub.f32 %v7479_v53, %v457_v18  ;;  %462 = vadd.xlane.f32.xlu1 %v460_v19  ;;  %v5262_v19 = vld [vmem:[%s8628_s5] ss:$0 sm:$0xff] }
 0x1fe   :  { %v461_v21 = vmul.f32 %v7488_v20, %v7488_v20 }
 0x200   :  { %464 = vadd.xlane.f32.xlu1 %v461_v21 }
 0x289   :  { %v463_v9 = vpop.xlane.xlu1 %462 }
 0x28a   :  { %v466_v10 = vmul.f32 0.0078125, %v463_v9 }
 0x28c   :  { %v468_v11 = vadd.f32 1e-12, %v466_v10 }
 0x28d   :  { %v465_v12 = vpop.xlane.xlu1 %464 }
 0x28e   :  { %6764 = vrsqrt.f32 %v468_v11  ;;  %v467_v13 = vmul.f32 0.0078125, %v465_v12 }
 0x290   :  { %v469_v14 = vadd.f32 1e-12, %v467_v13 }
 0x292   :  { %6766 = vrsqrt.f32 %v469_v14 }
 0x298   :  { %v6765_v15 = vpop.eup %6764 }
 0x299   :  { %v472_v18 = vmul.f32 %v6765_v15, %v7483_v16  ;;  %v540_v16 = vlaneseq }
 0x29b   :  { %v480_v21 = vmul.f32 %v5261_v17, %v472_v18  ;;  %v7508_v27 = vshrl.u32 %v540_v16, 7 }
 0x29c   :  { %v6767_v22 = vpop.eup %6766 }
 0x29d   :  { %v488_v23 = vadd.f32 %v5262_v19, %v480_v21  ;;  %v473_v24 = vmul.f32 %v6767_v22, %v7488_v20  ;;  %v7511_v20 = vsub.s32 1, %v7508_v27  ;;  %v7517_v29 = vsub.s32 0, %v7508_v27 }
 0x29e   :  { %v7520_v30 = vsub.s32 2, %v7508_v27 }
 0x29f   :  { %620 = vmatmul.mubr.f32.vlgmr.msra.gmra.mrb[4].mxu1 %v488_v23  ;;  %5849 = vmatprep.mubr.f32.mxu0 %v488_v23  ;;  %v481_v25 = vmul.f32 %v5261_v17, %v473_v24  ;;  %v547_v31 = vrot.slane %v538_v28, %v7511_v20  ;;  %v543_v33 = vrot.slane %v538_v28, %v7517_v29 }
 0x2a0   :  { %625 = vmatprep.mubr.f32.mxu1 %v6982_v5  ;;  %v551_v35 = vrot.slane %v538_v28, %v7520_v30 }
 0x2a1   :  { %v489_v26 = vadd.f32 %v5262_v19, %v481_v25 }
 0x2a3   :  { %626 = vmatmul.mubr.f32.gmra.mrb[6].mxu1 %v489_v26  ;;  %5850 = vmatmul.mubr.f32.vlgmr.msra.gmra.mrb[8].mxu0 %v489_v26 }
 0x2a4   :  { %5854 = vmatprep.mubr.msk.f32.mxu1 %vm6983_vm0, %v6982_v5  ;;  %5889 = vmatprep.mubr.msk.f32.mxu0 %vm6983_vm0, %v6982_v5 }
 0x372   :  { %v621_v32 = vpop.f32.mrb[4].mxu1 }
 0x373   :  { %v623_v34 = vpop.f32.mrb[5].mxu1  ;;  %v7529_v39 = vadd.f32 %v621_v32, %v543_v33 }
 0x374   :  { %v7525_v36 = vadd.f32 %v623_v34, %v547_v31 }
 0x376   :  { %v627_v37 = vpop.f32.mrb[6].mxu1  ;;  %v5851_v38 = vpop.f32.mrb[8].mxu0  ;;  %5853 = vmatpush3.xpose.msk.msra.mxu1 %vm707_vm1, %v7525_v36 }
 0x377   :  { %v7531_v40 = vadd.f32 %v5851_v38, %v551_v35  ;;  %v629_v41 = vpop.f32.mrb[7].mxu1  ;;  %v698_v42 = vpop.f32.mrb[9].mxu0  ;;  %5857 = vmatprep.subr.mxu1 %v6982_v5  ;;  %v7542_v44 = vadd.f32 %v627_v37, %v543_v33 }
 0x378   :  { %v7534_v43 = vadd.f32 %v629_v41, %v547_v31  ;;  %v7545_v45 = vadd.f32 %v698_v42, %v551_v35 }
 0x379   :  { %5855 = vmatmul.mubr.msk.f32.vlgmr.msra.gmra.mrb[8].mxu1 %vm707_vm1, %v7529_v39 }
 0x37a   :  { %5858 = vmatpush3.xpose.msk.msra.mxu1 %vm707_vm1, %v7534_v43  ;;  %5859 = vmatprep.mubr.msk.f32.mxu1 %vm6983_vm0, %v6982_v5 }
 0x37b   :  { %5862 = vmatprep.subr.mxu1 %v6982_v5 }
 0x37d   :  { %5860 = vmatmul.mubr.msk.f32.vlgmr.msra.gmra.mrb[10].mxu1 %vm707_vm1, %v7542_v44 }
 0x37e   :  { %5863 = vmatpush3.msra.mxu1 %v7545_v45  ;;  %5864 = vmatprep.mubr.msk.f32.mxu1 %vm6983_vm0, %v6982_v5 }
 0x37f   :  { %5867 = vmatprep.subr.mxu1 %v6982_v5 }
 0x44c   :  { %v780_v46 = vpop.f32.mrb[8].mxu1 }
 0x44d   :  { %v860_v48 = vmul.f32 0.17677669, %v780_v46  ;;  %v5856_v50 = vpop.f32.mrb[9].mxu1 }
 0x44f   :  { %v862_v51 = vadd.f32 %v860_v48, %v7556_v47 }
 0x450   :  { %v856_v52 = vpop.f32.mrb[10].mxu1 }
 0x451   :  { %v861_v54 = vmul.f32 0.17677669, %v856_v52  ;;  %v5861_v55 = vpop.f32.mrb[11].mxu1  ;;  %v865_v56 = vsel %vm864_vm2, %v862_v51, -inf }
 0x452   :  { %866 = vmax.xlane.f32.xlu0 %v865_v56 }
 0x453   :  { %v863_v57 = vadd.f32 %v861_v54, %v7556_v47 }
 0x455   :  { %v868_v58 = vsel %vm864_vm2, %v863_v57, -inf }
 0x456   :  { %869 = vmax.xlane.f32.xlu1 %v868_v58 }
 0x467   :  { %1033 = vrot.lane.b32.xlu1 %v7529_v39, %s6984_s28 }
 0x46b   :  { %1113 = vrot.lane.b32.xlu1 %v7534_v43, %s6984_s28 }
 0x4df   :  { %v867_v59 = vpop.xlane.xlu0 %866 }
 0x4e0   :  { %v871_v60 = vsub.f32 %v862_v51, %v867_v59 }
 0x4e2   :  { %v873_v61 = vmul.f32 1.442695, %v871_v60 }
 0x4e3   :  { %v870_v62 = vpop.xlane.xlu1 %869 }
 0x4e4   :  { %6768 = vpow2.f32 %v873_v61  ;;  %v872_v63 = vsub.f32 %v863_v57, %v870_v62 }
 0x4e6   :  { %v875_v0 = vmul.f32 1.442695, %v872_v63 }
 0x4e7   :  { %v1034_v6 = vpop.permute.xlu1 %1033 }
 0x4e8   :  { %6770 = vpow2.f32 %v875_v0 }
 0x4eb   :  { %v1114_v7 = vpop.permute.xlu1 %1113 }
 0x4ee   :  { %v6769_v1 = vpop.eup %6768 }
 0x4ef   :  { %v877_v2 = vsel %vm864_vm2, %v6769_v1, 0.0 }
 0x4f0   :  { %878 = vadd.xlane.f32.xlu0 %v877_v2 }
 0x4f2   :  { %v6771_v3 = vpop.eup %6770 }
 0x4f3   :  { %v880_v4 = vsel %vm864_vm2, %v6771_v3, 0.0 }
 0x4f4   :  { %881 = vadd.xlane.f32.xlu1 %v880_v4 }
 0x505   :  { %1111 = vrot.lane.b32.xlu1 %v7542_v44, %s6984_s28 }
 0x506   :  { %1035 = vrot.lane.b32.xlu0 %v7525_v36, %s6984_s28 }
 0x57d   :  { %v879_v8 = vpop.xlane.xlu0 %878 }
 0x57e   :  { %6772 = vrcp.f32 %v879_v8 }
 0x581   :  { %v882_v9 = vpop.xlane.xlu1 %881  ;;  %v1036_v14 = vpop.permute.xlu0 %1035 }
 0x582   :  { %6774 = vrcp.f32 %v882_v9 }
 0x585   :  { %v1112_v15 = vpop.permute.xlu1 %1111 }
 0x588   :  { %v6773_v10 = vpop.eup %6772 }
 0x589   :  { %v885_v11 = vmul.f32 %v6773_v10, %v6769_v1 }
 0x58b   :  { %5865 = vmatmul.mubr.msk.f32.vlgmr.msra.gmra.mrb[12].mxu1 %vm864_vm2, %v885_v11 }
 0x58c   :  { %v6775_v12 = vpop.eup %6774  ;;  %5868 = vmatpush3.msra.mxu1 %v7531_v40  ;;  %5869 = vmatprep.mubr.msk.f32.mxu1 %vm6983_vm0, %v6982_v5 }
 0x58d   :  { %v886_v13 = vmul.f32 %v6775_v12, %v6771_v3  ;;  %5872 = vmatprep.subr.mxu1 %v6982_v5 }
 0x58f   :  { %5870 = vmatmul.mubr.msk.f32.vlgmr.msra.gmra.mrb[14].mxu1 %vm864_vm2, %v886_v13 }
 0x590   :  { %5874 = vmatprep.mubr.msk.f32.mxu1 %vm6983_vm0, %v6982_v5 }
 0x593   :  { %5873 = vmatpush3.xpose.msk.msra.mxu1 %vm707_vm1, %v1036_v14 }
 0x594   :  { %5877 = vmatprep.subr.mxu1 %v6982_v5 }
 0x596   :  { %5875 = vmatmul.mubr.msk.f32.vlgmr.msra.gmra.mrb[16].mxu1 %vm707_vm1, %v1034_v6 }
 0x597   :  { %5878 = vmatpush3.xpose.msk.msra.mxu1 %vm707_vm1, %v1114_v7  ;;  %5879 = vmatprep.mubr.msk.f32.mxu1 %vm6983_vm0, %v6982_v5 }
 0x598   :  { %5882 = vmatprep.subr.mxu1 %v6982_v5 }
 0x59a   :  { %5880 = vmatmul.mubr.msk.f32.vlgmr.msra.gmra.mrb[18].mxu1 %vm707_vm1, %v1112_v15 }
 0x59b   :  { %5884 = vmatprep.mubr.msk.f32.mxu1 %vm6983_vm0, %v6982_v5 }
 0x65e   :  { %v7590_v17 = vpop.f32.mrb[12].mxu1 }
 0x65f   :  { %v5866_v18 = vpop.f32.mrb[13].mxu1 }
 0x662   :  { %v7592_v19 = vpop.f32.mrb[14].mxu1 }
 0x663   :  { %v5871_v21 = vpop.f32.mrb[15].mxu1 }
 0x669   :  { %v1107_v22 = vpop.f32.mrb[16].mxu1 }
 0x66a   :  { %v1189_v23 = vmul.f32 0.17677669, %v1107_v22  ;;  %v5876_v24 = vpop.f32.mrb[17].mxu1 }
 0x66c   :  { %v1191_v25 = vadd.f32 %v1189_v23, %v7556_v47 }
 0x66d   :  { %v1185_v26 = vpop.f32.mrb[18].mxu1 }
 0x66e   :  { %v1190_v16 = vmul.f32 0.17677669, %v1185_v26  ;;  %v5881_v28 = vpop.f32.mrb[19].mxu1  ;;  %v1193_v31 = vsel %vm864_vm2, %v1191_v25, -inf }
 0x66f   :  { %1194 = vmax.xlane.f32.xlu0 %v1193_v31 }
 0x670   :  { %v1192_v32 = vadd.f32 %v1190_v16, %v7556_v47 }
 0x672   :  { %v1196_v33 = vsel %vm864_vm2, %v1192_v32, -inf }
 0x673   :  { %1197 = vmax.xlane.f32.xlu1 %v1196_v33 }
 0x684   :  { %1293 = vrot.lane.b32.xlu1 %v7531_v40, %s6984_s28 }
 0x685   :  { %1216 = vrot.lane.b32.xlu0 %v7545_v45, %s6984_s28 }
 0x688   :  { %1371 = vrot.lane.b32.xlu1 %v7525_v36, %s6985_s26 }
 0x68c   :  { %1449 = vrot.lane.b32.xlu1 %v7534_v43, %s6985_s26 }
 0x690   :  { %1447 = vrot.lane.b32.xlu1 %v7542_v44, %s6985_s26 }
 0x6fc   :  { %v1195_v34 = vpop.xlane.xlu0 %1194 }
 0x6fd   :  { %v1199_v35 = vsub.f32 %v1191_v25, %v1195_v34 }
 0x6ff   :  { %v1201_v37 = vmul.f32 1.442695, %v1199_v35 }
 0x700   :  { %v1217_v38 = vpop.permute.xlu0 %1216  ;;  %v1198_v41 = vpop.xlane.xlu1 %1197 }
 0x701   :  { %6776 = vpow2.f32 %v1201_v37  ;;  %v1200_v42 = vsub.f32 %v1192_v32, %v1198_v41  ;;  %5883 = vmatpush3.msra.mxu1 %v1217_v38 }
 0x702   :  { %5892 = vmatprep.subr.mxu1 %v6982_v5 }
 0x703   :  { %v1203_v46 = vmul.f32 1.442695, %v1200_v42 }
 0x704   :  { %v1294_v48 = vpop.permute.xlu1 %1293 }
 0x705   :  { %6778 = vpow2.f32 %v1203_v46  ;;  %5888 = vmatpush3.msra.mxu0 %v1294_v48 }
 0x706   :  { %5897 = vmatprep.subr.mxu0 %v6982_v5 }
 0x708   :  { %v1372_v57 = vpop.permute.xlu1 %1371 }
 0x70b   :  { %v6777_v50 = vpop.eup %6776 }
 0x70c   :  { %v1205_v51 = vsel %vm864_vm2, %v6777_v50, 0.0  ;;  %v1450_v61 = vpop.permute.xlu1 %1449 }
 0x70d   :  { %1206 = vadd.xlane.f32.xlu0 %v1205_v51 }
 0x70f   :  { %v6779_v52 = vpop.eup %6778 }
 0x710   :  { %v1208_v54 = vsel %vm864_vm2, %v6779_v52, 0.0  ;;  %v1448_v0 = vpop.permute.xlu1 %1447 }
 0x711   :  { %1209 = vadd.xlane.f32.xlu0 %v1208_v54 }
 0x727   :  { %1369 = vrot.lane.b32.xlu0 %v7529_v39, %s6985_s26 }
 0x79a   :  { %v1207_v55 = vpop.xlane.xlu0 %1206 }
 0x79b   :  { %6780 = vrcp.f32 %v1207_v55 }
 0x79e   :  { %v1210_v56 = vpop.xlane.xlu0 %1209 }
 0x79f   :  { %6782 = vrcp.f32 %v1210_v56 }
 0x7a2   :  { %v1370_v63 = vpop.permute.xlu0 %1369 }
 0x7a5   :  { %v6781_v58 = vpop.eup %6780 }
 0x7a6   :  { %v1213_v59 = vmul.f32 %v6781_v58, %v6777_v50 }
 0x7a8   :  { %5885 = vmatmul.mubr.msk.f32.vlgmr.msra.gmra.mrb[20].mxu1 %vm864_vm2, %v1213_v59 }
 0x7a9   :  { %v6783_v60 = vpop.eup %6782  ;;  %5893 = vmatpush3.xpose.msk.msra.mxu1 %vm707_vm1, %v1372_v57  ;;  %5894 = vmatprep.mubr.msk.f32.mxu1 %vm6983_vm0, %v6982_v5 }
 0x7aa   :  { %v1214_v62 = vmul.f32 %v6783_v60, %v6779_v52  ;;  %5902 = vmatprep.subr.mxu1 %v6982_v5 }
 0x7ac   :  { %5890 = vmatmul.mubr.msk.f32.vlgmr.msra.gmra.mrb[10].mxu0 %vm864_vm2, %v1214_v62  ;;  %5895 = vmatmul.mubr.msk.f32.vlgmr.msra.gmra.mrb[22].mxu1 %vm707_vm1, %v1370_v63 }
 0x7ad   :  { %5898 = vmatpush3.xpose.msk.msra.mxu0 %vm707_vm1, %v1450_v61  ;;  %5899 = vmatprep.mubr.msk.f32.mxu0 %vm6983_vm0, %v6982_v5 }
 0x7ae   :  { %5907 = vmatprep.subr.mxu0 %v6982_v5  ;;  %5904 = vmatprep.mubr.msk.f32.mxu1 %vm6983_vm0, %v6982_v5 }
 0x7b0   :  { %5900 = vmatmul.mubr.msk.f32.vlgmr.msra.gmra.mrb[12].mxu0 %vm707_vm1, %v1448_v0 }
 0x7b1   :  { %5909 = vmatprep.mubr.msk.f32.mxu0 %vm6983_vm0, %v6982_v5 }
 0x87b   :  { %v7630_v1 = vpop.f32.mrb[20].mxu1 }
 0x87c   :  { %v5886_v2 = vpop.f32.mrb[21].mxu1 }
 0x87f   :  { %v7632_v3 = vpop.f32.mrb[10].mxu0  ;;  %v1443_v4 = vpop.f32.mrb[22].mxu1 }
 0x880   :  { %v6734_v6 = vpack.i.bf16 %v7632_v3, %v7630_v1  ;;  %v1525_v7 = vmul.f32 0.17677669, %v1443_v4  ;;  %v5891_v8 = vpop.f32.mrb[11].mxu0  ;;  %v5896_v9 = vpop.f32.mrb[23].mxu1 }
 0x882   :  { %v1527_v10 = vadd.f32 %v1525_v7, %v7556_v47 }
 0x883   :  { %v1521_v11 = vpop.f32.mrb[12].mxu0 }
 0x884   :  { %v1526_v12 = vmul.f32 0.17677669, %v1521_v11  ;;  %v5901_v13 = vpop.f32.mrb[13].mxu0  ;;  %v1529_v14 = vsel %vm864_vm2, %v1527_v10, -inf }
 0x885   :  { %1530 = vmax.xlane.f32.xlu0 %v1529_v14 }
 0x886   :  { %v1528_v15 = vadd.f32 %v1526_v12, %v7556_v47 }
 0x888   :  { %v1532_v18 = vsel %vm864_vm2, %v1528_v15, -inf }
 0x889   :  { %1533 = vmax.xlane.f32.xlu1 %v1532_v18 }
 0x89a   :  { %1627 = vrot.lane.b32.xlu1 %v7531_v40, %s6985_s26 }
 0x89b   :  { %1551 = vrot.lane.b32.xlu0 %v7545_v45, %s6985_s26 }
 0x89e   :  { %1705 = vrot.lane.b32.xlu1 %v7525_v36, %s6986_s2 }
 0x8a2   :  { %1783 = vrot.lane.b32.xlu1 %v7534_v43, %s6986_s2 }
 0x8a6   :  { %1781 = vrot.lane.b32.xlu1 %v7542_v44, %s6986_s2 }
 0x912   :  { %v1531_v21 = vpop.xlane.xlu0 %1530 }
 0x913   :  { %v1535_v22 = vsub.f32 %v1527_v10, %v1531_v21 }
 0x915   :  { %v1537_v23 = vmul.f32 1.442695, %v1535_v22  ;;  %v2069_v22 = vld [vmem:[#allocation5] sm:$0xff] }
 0x916   :  { %v1534_v24 = vpop.xlane.xlu1 %1533  ;;  %v1552_v25 = vpop.permute.xlu0 %1551 }
 0x917   :  { %6784 = vpow2.f32 %v1537_v23  ;;  %v1536_v26 = vsub.f32 %v1528_v15, %v1534_v24  ;;  %5903 = vmatpush3.msra.mxu1 %v1552_v25  ;;  %v2070_v23 = vld [vmem:[#allocation5 + $0x8] sm:$0xff]  ;;  %v2071_v24 = vld [vmem:[#allocation5 + $0x10] sm:$0xff]  ;;  %v2072_v25 = vld [vmem:[#allocation5 + $0x18] sm:$0xff] }
 0x918   :  { %5912 = vmatprep.subr.mxu1 %v6982_v5 }
 0x919   :  { %v1539_v16 = vmul.f32 1.442695, %v1536_v26  ;;  %v6316_v26 = vpack.c.bf16 %v2072_v25, %v2071_v24  ;;  %v2217_v24 = vld [vmem:[%s8594_s12 + $0x30] sm:$0xff] }
 0x91a   :  { %v1628_v28 = vpop.permute.xlu1 %1627 }
 0x91b   :  { %6786 = vpow2.f32 %v1539_v16  ;;  %5908 = vmatpush3.msra.mxu0 %v1628_v28  ;;  %v2073_v16 = vld [vmem:[#allocation5 + $0x20] sm:$0xff]  ;;  %v2074_v28 = vld [vmem:[#allocation5 + $0x28] sm:$0xff] }
 0x91c   :  { %5917 = vmatprep.subr.mxu0 %v6982_v5 }
 0x91e   :  { %v1706_v34 = vpop.permute.xlu1 %1705 }
 0x921   :  { %v6785_v36 = vpop.eup %6784 }
 0x922   :  { %v1541_v43 = vsel %vm864_vm2, %v6785_v36, 0.0  ;;  %v1784_v41 = vpop.permute.xlu1 %1783 }
 0x923   :  { %1542 = vadd.xlane.f32.xlu0 %v1541_v43  ;;  %v2075_v43 = vld [vmem:[#allocation5 + $0x30] sm:$0xff] }
 0x925   :  { %v6787_v44 = vpop.eup %6786 }
 0x926   :  { %v1544_v31 = vsel %vm864_vm2, %v6787_v44, 0.0  ;;  %v1782_v46 = vpop.permute.xlu1 %1781 }
 0x927   :  { %1545 = vadd.xlane.f32.xlu0 %v1544_v31 }
 0x93d   :  { %1703 = vrot.lane.b32.xlu0 %v7529_v39, %s6986_s2 }
 0x9b0   :  { %v1543_v32 = vpop.xlane.xlu0 %1542 }
 0x9b1   :  { %6788 = vrcp.f32 %v1543_v32  ;;  %v2077_v32 = vld [vmem:[#allocation5 + $0x40] sm:$0xff] }
 0x9b4   :  { %v1546_v33 = vpop.xlane.xlu0 %1545 }
 0x9b5   :  { %6790 = vrcp.f32 %v1546_v33  ;;  %v2078_v33 = vld [vmem:[#allocation5 + $0x48] sm:$0xff] }
 0x9b8   :  { %v1704_v39 = vpop.permute.xlu0 %1703 }
 0x9bb   :  { %v6789_v35 = vpop.eup %6788 }
 0x9bc   :  { %v1549_v37 = vmul.f32 %v6789_v35, %v6785_v36  ;;  %v6320_v36 = vpack.c.bf16 %v2074_v28, %v2073_v16  ;;  %v2079_v35 = vld [vmem:[#allocation5 + $0x50] sm:$0xff]  ;;  %v2222_v16 = vld [vmem:[%s8594_s12 + $0x58] sm:$0xff] }
 0x9bd   :  { %v2226_v28 = vld [vmem:[%s8594_s12 + $0x78] sm:$0xff] }
 0x9be   :  { %5905 = vmatmul.mubr.msk.f32.vlgmr.msra.gmra.mrb[24].mxu1 %vm864_vm2, %v1549_v37  ;;  %v2080_v37 = vld [vmem:[#allocation5 + $0x58] sm:$0xff] }
 0x9bf   :  { %v6791_v38 = vpop.eup %6790  ;;  %5913 = vmatpush3.xpose.msk.msra.mxu1 %vm707_vm1, %v1706_v34  ;;  %5914 = vmatprep.mubr.msk.f32.mxu1 %vm6983_vm0, %v6982_v5  ;;  %v6328_v34 = vpack.c.bf16 %v2078_v33, %v2077_v32  ;;  %v2221_v32 = vld [vmem:[%s8594_s12 + $0x50] sm:$0xff] }
 0x9c0   :  { %v1550_v42 = vmul.f32 %v6791_v38, %v6787_v44  ;;  %5922 = vmatprep.subr.mxu1 %v6982_v5  ;;  %v2076_v44 = vld [vmem:[#allocation5 + $0x38] sm:$0xff]  ;;  %v6332_v38 = vpack.c.bf16 %v2080_v37, %v2079_v35  ;;  %v2228_v35 = vld [vmem:[%s8594_s12 + $0x88] sm:$0xff] }
 0x9c1   :  { %v6324_v31 = vpack.c.bf16 %v2076_v44, %v2075_v43  ;;  %v6380_v43 = vpack.c.bf16 %v2226_v28, %v2222_v16  ;;  %v2219_v44 = vld [vmem:[%s8594_s12 + $0x40] sm:$0xff]  ;;  %v2232_v37 = vld [vmem:[%s8594_s12 + $0xa8] sm:$0xff]  ;;  %v2258_v28 = vld [vmem:[%s8594_s12 + $0x178] sm:$0xff] }
 0x9c2   :  { %5910 = vmatmul.mubr.msk.f32.vlgmr.msra.gmra.mrb[14].mxu0 %vm864_vm2, %v1550_v42  ;;  %5915 = vmatmul.mubr.msk.f32.vlgmr.msra.gmra.mrb[26].mxu1 %vm707_vm1, %v1704_v39  ;;  %v2082_v42 = vld [vmem:[#allocation5 + $0x68] sm:$0xff] }
 0x9c3   :  { %5918 = vmatpush3.xpose.msk.msra.mxu0 %vm707_vm1, %v1784_v41  ;;  %5919 = vmatprep.mubr.msk.f32.mxu0 %vm6983_vm0, %v6982_v5  ;;  %v2081_v41 = vld [vmem:[#allocation5 + $0x60] sm:$0xff] }
 0x9c4   :  { %5927 = vmatprep.subr.mxu0 %v6982_v5  ;;  %5924 = vmatprep.mubr.msk.f32.mxu1 %vm6983_vm0, %v6982_v5  ;;  %v6336_v39 = vpack.c.bf16 %v2082_v42, %v2081_v41  ;;  %v6352_v41 = vpack.c.bf16 %v2232_v37, %v2228_v35  ;;  %v2230_v42 = vld [vmem:[%s8594_s12 + $0x98] sm:$0xff]  ;;  %v2264_v37 = vld [vmem:[%s8594_s12 + $0x1a8] sm:$0xff] }
 0x9c6   :  { %5920 = vmatmul.mubr.msk.f32.vlgmr.msra.gmra.mrb[16].mxu0 %vm707_vm1, %v1782_v46  ;;  %v2083_v46 = vld [vmem:[#allocation5 + $0x70] sm:$0xff] }
 0x9c7   :  { %5929 = vmatprep.mubr.msk.f32.mxu0 %vm6983_vm0, %v6982_v5 }
 0xa91   :  { %v1623_v48 = vpop.f32.mrb[24].mxu1 }
 0xa92   :  { %v5906_v50 = vpop.f32.mrb[25].mxu1 }
 0xa95   :  { %v1699_v51 = vpop.f32.mrb[14].mxu0  ;;  %v1777_v52 = vpop.f32.mrb[26].mxu1 }
 0xa96   :  { %v6739_v54 = vpack.i.bf16 %v1699_v51, %v1623_v48  ;;  %v1859_v55 = vmul.f32 0.17677669, %v1777_v52  ;;  %v5911_v56 = vpop.f32.mrb[15].mxu0  ;;  %v5916_v57 = vpop.f32.mrb[27].mxu1  ;;  %v2084_v48 = vld [vmem:[#allocation5 + $0x78] sm:$0xff] }
 0xa97   :  { %v6340_v50 = vpack.c.bf16 %v2084_v48, %v2083_v46  ;;  %v2227_v46 = vld [vmem:[%s8594_s12 + $0x80] sm:$0xff] }
 0xa98   :  { %v1861_v58 = vadd.f32 %v1859_v55, %v7556_v47 }
 0xa99   :  { %v1855_v59 = vpop.f32.mrb[16].mxu0 }
 0xa9a   :  { %v1860_v60 = vmul.f32 0.17677669, %v1855_v59  ;;  %v5921_v61 = vpop.f32.mrb[17].mxu0  ;;  %v1863_v62 = vsel %vm864_vm2, %v1861_v58, -inf }
 0xa9b   :  { %1864 = vmax.xlane.f32.xlu0 %v1863_v62 }
 0xa9c   :  { %v1862_v63 = vadd.f32 %v1860_v60, %v7556_v47 }
 0xa9e   :  { %v1866_v0 = vsel %vm864_vm2, %v1862_v63, -inf }
 0xa9f   :  { %1867 = vmax.xlane.f32.xlu1 %v1866_v0 }
 0xab0   :  { %1961 = vrot.lane.b32.xlu1 %v7531_v40, %s6986_s2 }
 0xab4   :  { %6735 = vrot.lane.b32.xlu1 %v6734_v6, %s6986_s2 }
 0xab8   :  { %6740 = vrot.lane.b32.xlu1 %v6739_v54, %s6985_s26 }
 0xb28   :  { %v1865_v2 = vpop.xlane.xlu0 %1864 }
 0xb29   :  { %v1869_v4 = vsub.f32 %v1861_v58, %v1865_v2 }
 0xb2b   :  { %v1871_v7 = vmul.f32 1.442695, %v1869_v4 }
 0xb2c   :  { %v1868_v8 = vpop.xlane.xlu1 %1867 }
 0xb2d   :  { %6792 = vpow2.f32 %v1871_v7  ;;  %v1870_v9 = vsub.f32 %v1862_v63, %v1868_v8 }
 0xb2f   :  { %v1873_v47 = vmul.f32 1.442695, %v1870_v9 }
 0xb30   :  { %v1962_v10 = vpop.permute.xlu1 %1961 }
 0xb31   :  { %6794 = vpow2.f32 %v1873_v47  ;;  %5928 = vmatpush3.msra.mxu0 %v1962_v10 }
 0xb34   :  { %v6736_v57 = vpop.permute.xlu1 %6735 }
 0xb35   :  { %v6738_v59 = vunpack.i.h.bf16 %v6736_v57  ;;  %v6737_v60 = vunpack.i.l.bf16 %v6736_v57 }
 0xb37   :  { %v6793_v11 = vpop.eup %6792  ;;  %v2062_v0 = vsel %vm707_vm1, %v7592_v19, %v6738_v59  ;;  %v2061_v7 = vsel %vm707_vm1, %v7590_v17, %v6737_v60  ;;  %v5287_v19 = vld [vmem:[%s8591_s9] ss:$0 sm:$0xff] }
 0xb38   :  { %v1875_v40 = vsel %vm864_vm2, %v6793_v11, 0.0  ;;  %v6741_v58 = vpop.permute.xlu1 %6740 }
 0xb39   :  { %1876 = vadd.xlane.f32.xlu0 %v1875_v40  ;;  %v6743_v61 = vunpack.i.h.bf16 %v6741_v58  ;;  %v6742_v62 = vunpack.i.l.bf16 %v6741_v58 }
 0xb3b   :  { %v6795_v12 = vpop.eup %6794  ;;  %v2064_v8 = vsel %vm2063_vm3, %v2061_v7, %v6742_v62  ;;  %v2065_v9 = vsel %vm2063_vm3, %v2062_v0, %v6743_v61  ;;  %v2236_v0 = vld [vmem:[%s8594_s12 + $0xc8] sm:$0xff] }
 0xb3c   :  { %v1878_v1 = vsel %vm864_vm2, %v6795_v12, 0.0 }
 0xb3d   :  { %1879 = vadd.xlane.f32.xlu0 %v1878_v1 }
 0xb53   :  { %1885 = vrot.lane.b32.xlu0 %v7545_v45, %s6986_s2  ;;  %v6312_v45 = vpack.c.bf16 %v2070_v23, %v2069_v22  ;;  %v2213_v23 = vld [vmem:[%s8594_s12 + $0x10] sm:$0xff] }
 0xb54   :  { %v6378_v25 = vpack.c.bf16 %v2217_v24, %v2213_v23  ;;  %v2249_v23 = vld [vmem:[%s8594_s12 + $0x130] sm:$0xff] }
 0xbc6   :  { %v1877_v3 = vpop.xlane.xlu0 %1876 }
 0xbc7   :  { %6796 = vrcp.f32 %v1877_v3 }
 0xbca   :  { %v1880_v6 = vpop.xlane.xlu0 %1879 }
 0xbcb   :  { %6798 = vrcp.f32 %v1880_v6  ;;  %v2212_v6 = vld [vmem:[%s8594_s12 + $0x8] sm:$0xff] }
 0xbce   :  { %v1886_v13 = vpop.permute.xlu0 %1885 }
 0xbcf   :  { %5923 = vmatpush3.msra.mxu1 %v1886_v13  ;;  %v2216_v13 = vld [vmem:[%s8594_s12 + $0x28] sm:$0xff] }
 0xbd0   :  { %6313 = vmatprep.subr.bf16.mxu1 %v6312_v45 }
 0xbd1   :  { %v6797_v14 = vpop.eup %6796 }
 0xbd2   :  { %v1883_v15 = vmul.f32 %v6797_v14, %v6793_v11  ;;  %v2218_v14 = vld [vmem:[%s8594_s12 + $0x38] sm:$0xff] }
 0xbd4   :  { %5925 = vmatmul.mubr.msk.f32.vlgmr.msra.gmra.mrb[28].mxu1 %vm864_vm2, %v1883_v15  ;;  %v2211_v15 = vld [vmem:[%s8594_s12] sm:$0xff] }
 0xbd5   :  { %v6799_v18 = vpop.eup %6798  ;;  %6315 = vmatpush3.bf16.msra.mxu1 %v6312_v45  ;;  %v2220_v45 = vld [vmem:[%s8594_s12 + $0x48] sm:$0xff] }
 0xbd6   :  { %v1884_v21 = vmul.f32 %v6799_v18, %v6795_v12  ;;  %6317 = vmatprep.subr.bf16.mxu1 %v6316_v26  ;;  %v2215_v18 = vld [vmem:[%s8594_s12 + $0x20] sm:$0xff] }
 0xbd7   :  { %v6346_v22 = vpack.c.bf16 %v2215_v18, %v2211_v15  ;;  %v2247_v15 = vld [vmem:[%s8594_s12 + $0x120] sm:$0xff] }
 0xbd8   :  { %5930 = vmatmul.mubr.msk.f32.vlgmr.msra.gmra.mrb[18].mxu0 %vm864_vm2, %v1884_v21 }
 0xbd9   :  { %2361 = vmatprep.mubr.f32.mxu0 %v6982_v5  ;;  %6319 = vmatpush3.bf16.msra.mxu1 %v6316_v26  ;;  %v2224_v26 = vld [vmem:[%s8594_s12 + $0x68] sm:$0xff] }
 0xbda   :  { %6321 = vmatprep.subr.bf16.mxu1 %v6320_v36 }
 0xbdd   :  { %6323 = vmatpush3.bf16.msra.mxu1 %v6320_v36  ;;  %v6348_v36 = vpack.c.bf16 %v2224_v26, %v2220_v45  ;;  %v2252_v45 = vld [vmem:[%s8594_s12 + $0x148] sm:$0xff]  ;;  %v2254_v26 = vld [vmem:[%s8594_s12 + $0x158] sm:$0xff] }
 0xbde   :  { %6325 = vmatprep.subr.bf16.mxu1 %v6324_v31 }
 0xbe1   :  { %6327 = vmatpush3.bf16.msra.mxu1 %v6324_v31  ;;  %v2223_v31 = vld [vmem:[%s8594_s12 + $0x60] sm:$0xff] }
 0xbe2   :  { %6329 = vmatprep.subr.bf16.mxu1 %v6328_v34  ;;  %v6350_v33 = vpack.c.bf16 %v2223_v31, %v2219_v44  ;;  %v6396_v44 = vpack.c.bf16 %v2258_v28, %v2254_v26  ;;  %v2524_v26 = vld [vmem:[#allocation7 + $0x8] sm:$0xff] }
 0xbe5   :  { %6331 = vmatpush3.bf16.msra.mxu1 %v6328_v34  ;;  %v2225_v34 = vld [vmem:[%s8594_s12 + $0x70] sm:$0xff] }
 0xbe6   :  { %6333 = vmatprep.subr.bf16.mxu1 %v6332_v38 }
 0xbe9   :  { %6335 = vmatpush3.bf16.msra.mxu1 %v6332_v38  ;;  %v6382_v38 = vpack.c.bf16 %v2225_v34, %v2221_v32  ;;  %v2253_v32 = vld [vmem:[%s8594_s12 + $0x150] sm:$0xff]  ;;  %v2260_v34 = vld [vmem:[%s8594_s12 + $0x188] sm:$0xff] }
 0xbea   :  { %6337 = vmatprep.subr.bf16.mxu1 %v6336_v39 }
 0xbed   :  { %6339 = vmatpush3.bf16.msra.mxu1 %v6336_v39  ;;  %v2234_v39 = vld [vmem:[%s8594_s12 + $0xb8] sm:$0xff] }
 0xbee   :  { %6341 = vmatprep.subr.bf16.mxu1 %v6340_v50  ;;  %v6384_v48 = vpack.c.bf16 %v2234_v39, %v2230_v42  ;;  %v6368_v42 = vpack.c.bf16 %v2264_v37, %v2260_v34  ;;  %v2574_v34 = vld [vmem:[#allocation7 + $0x198] sm:$0xff] }
 0xbef   :  { %v2526_v37 = vld [vmem:[#allocation7 + $0x18] sm:$0xff] }
 0xbf1   :  { %6343 = vmatpush3.bf16.msra.mxu1 %v6340_v50  ;;  %v2231_v50 = vld [vmem:[%s8594_s12 + $0xa0] sm:$0xff] }
 0xca7   :  { %v1957_v51 = vpop.f32.mrb[28].mxu1 }
 0xca8   :  { %v5926_v52 = vpop.f32.mrb[29].mxu1 }
 0xca9   :  { %v2233_v52 = vld [vmem:[%s8594_s12 + $0xb0] sm:$0xff] }
 0xcab   :  { %v2033_v54 = vpop.f32.mrb[18].mxu0 }
 0xcac   :  { %v6744_v55 = vpack.i.bf16 %v2033_v54, %v1957_v51  ;;  %v5931_v56 = vpop.f32.mrb[19].mxu0  ;;  %v2229_v51 = vld [vmem:[%s8594_s12 + $0x90] sm:$0xff]  ;;  %v6354_v54 = vpack.c.bf16 %v2231_v50, %v2227_v46  ;;  %v2259_v46 = vld [vmem:[%s8594_s12 + $0x180] sm:$0xff] }
 0xcad   :  { %v2261_v50 = vld [vmem:[%s8594_s12 + $0x190] sm:$0xff] }
 0xcae   :  { %6745 = vrot.lane.b32.xlu0 %v6744_v55, %s6984_s28  ;;  %v6386_v55 = vpack.c.bf16 %v2233_v52, %v2229_v51  ;;  %v2265_v52 = vld [vmem:[%s8594_s12 + $0x1b0] sm:$0xff] }
 0xd20   :  { %v6746_v63 = vpop.permute.xlu0 %6745 }
 0xd21   :  { %v6748_v2 = vunpack.i.h.bf16 %v6746_v63  ;;  %v6747_v4 = vunpack.i.l.bf16 %v6746_v63 }
 0xd23   :  { %v2067_v47 = vsel %vm2066_vm4, %v2064_v8, %v6747_v4  ;;  %v2068_v10 = vsel %vm2066_vm4, %v2065_v9, %v6748_v2  ;;  %v2240_v2 = vld [vmem:[%s8594_s12 + $0xe8] sm:$0xff]  ;;  %v2238_v4 = vld [vmem:[%s8594_s12 + $0xd8] sm:$0xff]  ;;  %v2235_v9 = vld [vmem:[%s8594_s12 + $0xc0] sm:$0xff] }
 0xd24   :  { %5964 = vmatprep.mubr.f32.mxu1 %v2067_v47  ;;  %v6356_v7 = vpack.c.bf16 %v2240_v2, %v2236_v0  ;;  %v2242_v8 = vld [vmem:[%s8594_s12 + $0xf8] sm:$0xff]  ;;  %v2239_v47 = vld [vmem:[%s8594_s12 + $0xe0] sm:$0xff]  ;;  %v2269_v2 = vld [vmem:[%s8594_s12 + $0x1d0] sm:$0xff] }
 0xd25   :  { %5965 = vmatmul.mubr.f32.vlgmr.msra.gmra.mrb[30].mxu1 %v2068_v10  ;;  %v6388_v10 = vpack.c.bf16 %v2242_v8, %v2238_v4  ;;  %v2271_v0 = vld [vmem:[%s8594_s12 + $0x1e0] sm:$0xff]  ;;  %v2273_v4 = vld [vmem:[%s8594_s12 + $0x1f0] sm:$0xff] }
 0xd26   :  { %2438 = vmatprep.mubr.f32.mxu1 %v6982_v5  ;;  %v6406_v8 = vpack.c.bf16 %v2273_v4, %v2269_v2  ;;  %v2546_v2 = vld [vmem:[#allocation7 + $0xb8] sm:$0xff]  ;;  %v2577_v4 = vld [vmem:[#allocation7 + $0x1b0] sm:$0xff] }
 0xdf8   :  { %v5966_v11 = vpop.f32.mrb[30].mxu1 }
 0xdf9   :  { %v2161_v40 = vadd.f32 %v5966_v11, %v7479_v53  ;;  %v2151_v17 = vpop.f32.mrb[31].mxu1  ;;  %v6344_v53 = vpack.c.bf16 %v2216_v13, %v2212_v6  ;;  %v6358_v11 = vpack.c.bf16 %v2239_v47, %v2235_v9  ;;  %v2248_v6 = vld [vmem:[%s8594_s12 + $0x128] sm:$0xff]  ;;  %v2246_v13 = vld [vmem:[%s8594_s12 + $0x118] sm:$0xff] }
 0xdfa   :  { %v2160_v12 = vadd.f32 %v2151_v17, %v7476_v49  ;;  %v2214_v49 = vld [vmem:[%s8594_s12 + $0x18] sm:$0xff] }
 0xdfb   :  { %v7705_v1 = vadd.f32 %v5287_v19, %v2161_v40  ;;  %v6376_v21 = vpack.c.bf16 %v2218_v14, %v2214_v49  ;;  %6345 = vmatprep.subr.bf16.mxu0 %v6344_v53  ;;  %v2241_v40 = vld [vmem:[%s8594_s12 + $0xf0] sm:$0xff]  ;;  %v2250_v53 = vld [vmem:[%s8594_s12 + $0x138] sm:$0xff]  ;;  %v2243_v14 = vld [vmem:[%s8594_s12 + $0x100] sm:$0xff] }
 0xdfc   :  { %v7707_v3 = vadd.f32 %v5287_v19, %v2160_v12  ;;  %6347 = vmatpush1.bf16.msra.mxu0 %v6346_v22  ;;  %v2237_v19 = vld [vmem:[%s8594_s12 + $0xd0] sm:$0xff]  ;;  %v2244_v12 = vld [vmem:[%s8594_s12 + $0x108] sm:$0xff]  ;;  %v6392_v18 = vpack.c.bf16 %v2250_v53, %v2246_v13  ;;  %v5289_v13 = vld [vmem:[%s8593_s11] ss:$0 sm:$0xff] }
 0xdfd   :  { %2175 = vadd.xlane.f32.xlu0 %v7705_v1  ;;  %6377 = vmatprep.subr.bf16.mxu1 %v6376_v21  ;;  %v6390_v17 = vpack.c.bf16 %v2241_v40, %v2237_v19  ;;  %v6360_v49 = vpack.c.bf16 %v2248_v6, %v2244_v12  ;;  %v6362_v21 = vpack.c.bf16 %v2247_v15, %v2243_v14  ;;  %v2245_v22 = vld [vmem:[%s8594_s12 + $0x110] sm:$0xff]  ;;  %v5288_v12 = vld [vmem:[%s8592_s10] ss:$0 sm:$0xff] }
 0xdfe   :  { %2173 = vadd.xlane.f32.xlu1 %v7707_v3  ;;  %6379 = vmatpush1.bf16.msra.mxu1 %v6378_v25  ;;  %v6394_v24 = vpack.c.bf16 %v2249_v23, %v2245_v22  ;;  %v2256_v25 = vld [vmem:[%s8594_s12 + $0x168] sm:$0xff]  ;;  %v2571_v23 = vld [vmem:[#allocation7 + $0x180] sm:$0xff] }
 0xdff   :  { %6349 = vmatprep.subr.bf16.mxu0 %v6348_v36  ;;  %6381 = vmatprep.subr.bf16.mxu1 %v6380_v43  ;;  %v6364_v16 = vpack.c.bf16 %v2256_v25, %v2252_v45  ;;  %v2251_v36 = vld [vmem:[%s8594_s12 + $0x140] sm:$0xff]  ;;  %v2540_v22 = vld [vmem:[#allocation7 + $0x88] sm:$0xff] }
 0xe00   :  { %6351 = vmatpush1.bf16.msra.mxu0 %v6350_v33  ;;  %v2255_v43 = vld [vmem:[%s8594_s12 + $0x160] sm:$0xff]  ;;  %v2257_v33 = vld [vmem:[%s8594_s12 + $0x170] sm:$0xff]  ;;  %v2572_v45 = vld [vmem:[#allocation7 + $0x188] sm:$0xff] }
 0xe01   :  { %6353 = vmatprep.subr.bf16.mxu0 %v6352_v41  ;;  %v6366_v31 = vpack.c.bf16 %v2255_v43, %v2251_v36  ;;  %v6398_v35 = vpack.c.bf16 %v2257_v33, %v2253_v32  ;;  %v2266_v41 = vld [vmem:[%s8594_s12 + $0x1b8] sm:$0xff]  ;;  %v2523_v25 = vld [vmem:[#allocation7] sm:$0xff]  ;;  %v2556_v36 = vld [vmem:[#allocation7 + $0x108] sm:$0xff] }
 0xe02   :  { %6383 = vmatpush1.bf16.msra.mxu1 %v6382_v38  ;;  %v2262_v38 = vld [vmem:[%s8594_s12 + $0x198] sm:$0xff]  ;;  %v6410_v28 = vpack.c.bf16 %v2524_v26, %v2523_v25  ;;  %v2573_v32 = vld [vmem:[#allocation7 + $0x190] sm:$0xff] }
 0xe03   :  { %6385 = vmatprep.subr.bf16.mxu1 %v6384_v48  ;;  %v6400_v39 = vpack.c.bf16 %v2266_v41, %v2262_v38  ;;  %v2263_v48 = vld [vmem:[%s8594_s12 + $0x1a0] sm:$0xff]  ;;  %v6444_v38 = vpack.c.bf16 %v2574_v34, %v2573_v32  ;;  %v2581_v25 = vld [vmem:[#allocation7 + $0x1d0] sm:$0xff]  ;;  %v2552_v34 = vld [vmem:[#allocation7 + $0xe8] sm:$0xff] }
 0xe04   :  { %6355 = vmatpush1.bf16.msra.mxu0 %v6354_v54  ;;  %v6370_v51 = vpack.c.bf16 %v2263_v48, %v2259_v46  ;;  %v2268_v54 = vld [vmem:[%s8594_s12 + $0x1c8] sm:$0xff]  ;;  %v2543_v48 = vld [vmem:[#allocation7 + $0xa0] sm:$0xff] }
 0xe05   :  { %6357 = vmatprep.subr.bf16.mxu0 %v6356_v7 }
 0xe06   :  { %6387 = vmatpush1.bf16.msra.mxu1 %v6386_v55  ;;  %v2272_v55 = vld [vmem:[%s8594_s12 + $0x1e8] sm:$0xff] }
 0xe07   :  { %6389 = vmatprep.subr.bf16.mxu1 %v6388_v10 }
 0xe08   :  { %6359 = vmatpush1.bf16.msra.mxu0 %v6358_v11 }
 0xe09   :  { %6361 = vmatprep.subr.bf16.mxu0 %v6360_v49 }
 0xe0a   :  { %6391 = vmatpush1.bf16.msra.mxu1 %v6390_v17 }
 0xe0b   :  { %6393 = vmatprep.subr.bf16.mxu1 %v6392_v18 }
 0xe0c   :  { %6363 = vmatpush1.bf16.msra.mxu0 %v6362_v21 }
 0xe0d   :  { %6365 = vmatprep.subr.bf16.mxu0 %v6364_v16  ;;  %v6440_v16 = vpack.c.bf16 %v2572_v45, %v2571_v23  ;;  %v2550_v45 = vld [vmem:[#allocation7 + $0xd8] sm:$0xff] }
 0xe0e   :  { %6395 = vmatpush1.bf16.msra.mxu1 %v6394_v24 }
 0xe0f   :  { %6397 = vmatprep.subr.bf16.mxu1 %v6396_v44  ;;  %v2541_v44 = vld [vmem:[#allocation7 + $0x90] sm:$0xff] }
 0xe10   :  { %6367 = vmatpush1.bf16.msra.mxu0 %v6366_v31  ;;  %v2542_v31 = vld [vmem:[#allocation7 + $0x98] sm:$0xff] }
 0xe11   :  { %6369 = vmatprep.subr.bf16.mxu0 %v6368_v42  ;;  %v6412_v33 = vpack.c.bf16 %v2542_v31, %v2541_v44  ;;  %v2557_v42 = vld [vmem:[#allocation7 + $0x110] sm:$0xff]  ;;  %v2566_v31 = vld [vmem:[#allocation7 + $0x158] sm:$0xff] }
 0xe12   :  { %6399 = vmatpush1.bf16.msra.mxu1 %v6398_v35  ;;  %v2525_v35 = vld [vmem:[#allocation7 + $0x10] sm:$0xff] }
 0xe13   :  { %6401 = vmatprep.subr.bf16.mxu1 %v6400_v39  ;;  %v6414_v41 = vpack.c.bf16 %v2526_v37, %v2525_v35  ;;  %v2558_v39 = vld [vmem:[#allocation7 + $0x118] sm:$0xff]  ;;  %v2565_v44 = vld [vmem:[#allocation7 + $0x150] sm:$0xff]  ;;  %v2583_v35 = vld [vmem:[#allocation7 + $0x1e0] sm:$0xff] }
 0xe14   :  { %6371 = vmatpush1.bf16.msra.mxu0 %v6370_v51  ;;  %v6446_v46 = vpack.c.bf16 %v2558_v39, %v2557_v42  ;;  %v2575_v51 = vld [vmem:[#allocation7 + $0x1a0] sm:$0xff]  ;;  %v6462_v32 = vpack.c.bf16 %v2566_v31, %v2565_v44  ;;  %v2536_v42 = vld [vmem:[#allocation7 + $0x68] sm:$0xff] }
 0xe8a   :  { %v2176_v56 = vpop.xlane.xlu0 %2175 }
 0xe8b   :  { %v2174_v57 = vpop.xlane.xlu1 %2173  ;;  %v2178_v58 = vmul.f32 0.0078125, %v2176_v56  ;;  %v6402_v56 = vpack.c.bf16 %v2265_v52, %v2261_v50  ;;  %v2544_v50 = vld [vmem:[#allocation7 + $0xa8] sm:$0xff] }
 0xe8c   :  { %v2177_v59 = vmul.f32 0.0078125, %v2174_v57  ;;  %v6372_v57 = vpack.c.bf16 %v2272_v55, %v2268_v54  ;;  %v6416_v52 = vpack.c.bf16 %v2544_v50, %v2543_v48  ;;  %v2576_v54 = vld [vmem:[#allocation7 + $0x1a8] sm:$0xff]  ;;  %v2527_v55 = vld [vmem:[#allocation7 + $0x20] sm:$0xff] }
 0xe8d   :  { %v7787_v61 = vsub.f32 %v7705_v1, %v2178_v58  ;;  %v2270_v58 = vld [vmem:[%s8594_s12 + $0x1d8] sm:$0xff]  ;;  %6403 = vmatpush1.bf16.msra.mxu1 %v6402_v56  ;;  %v2528_v56 = vld [vmem:[#allocation7 + $0x28] sm:$0xff]  ;;  %v2567_v48 = vld [vmem:[#allocation7 + $0x160] sm:$0xff] }
 0xe8e   :  { %v7784_v60 = vsub.f32 %v7707_v3, %v2177_v59  ;;  %v2274_v59 = vld [vmem:[%s8594_s12 + $0x1f8] sm:$0xff]  ;;  %6373 = vmatprep.subr.bf16.mxu0 %v6372_v57  ;;  %v6448_v57 = vpack.c.bf16 %v2576_v54, %v2575_v51  ;;  %v2568_v50 = vld [vmem:[#allocation7 + $0x168] sm:$0xff] }
 0xe8f   :  { %v2182_v63 = vmul.f32 %v7787_v61, %v7787_v61  ;;  %v6466_v51 = vpack.c.bf16 %v2568_v50, %v2567_v48  ;;  %v2554_v54 = vld [vmem:[#allocation7 + $0xf8] sm:$0xff] }
 0xe90   :  { %v2181_v62 = vmul.f32 %v7784_v60, %v7784_v60 }
 0xe92   :  { %2183 = vadd.xlane.f32.xlu0 %v2181_v62  ;;  %v2267_v62 = vld [vmem:[%s8594_s12 + $0x1c0] sm:$0xff] }
 0xe93   :  { %v6374_v7 = vpack.c.bf16 %v2271_v0, %v2267_v62  ;;  %v2560_v62 = vld [vmem:[#allocation7 + $0x128] sm:$0xff]  ;;  %v2545_v0 = vld [vmem:[#allocation7 + $0xb0] sm:$0xff] }
 0xe95   :  { %6375 = vmatpush1.bf16.msra.mxu0 %v6374_v7  ;;  %v6420_v7 = vpack.c.bf16 %v2546_v2, %v2545_v0  ;;  %v2569_v0 = vld [vmem:[#allocation7 + $0x170] sm:$0xff]  ;;  %v2570_v2 = vld [vmem:[#allocation7 + $0x178] sm:$0xff] }
 0xe96   :  { %2185 = vadd.xlane.f32.xlu0 %v2182_v63  ;;  %v6404_v63 = vpack.c.bf16 %v2274_v59, %v2270_v58  ;;  %v6418_v58 = vpack.c.bf16 %v2528_v56, %v2527_v55  ;;  %v2559_v59 = vld [vmem:[#allocation7 + $0x120] sm:$0xff]  ;;  %v2585_v55 = vld [vmem:[#allocation7 + $0x1f0] sm:$0xff] }
 0xe98   :  { %6405 = vmatprep.subr.bf16.mxu1 %v6404_v63  ;;  %v6450_v63 = vpack.c.bf16 %v2560_v62, %v2559_v59  ;;  %v2538_v59 = vld [vmem:[#allocation7 + $0x78] sm:$0xff] }
 0xe99   :  { %6407 = vmatpush1.bf16.msra.mxu1 %v6406_v8  ;;  %v2578_v8 = vld [vmem:[#allocation7 + $0x1b8] sm:$0xff] }
 0xe9a   :  { %6441 = vmatprep.subr.bf16.mxu1 %v6440_v16  ;;  %v2582_v16 = vld [vmem:[#allocation7 + $0x1d8] sm:$0xff] }
 0xf1f   :  { %v2184_v9 = vpop.xlane.xlu0 %2183 }
 0xf20   :  { %v2187_v47 = vmul.f32 0.0078125, %v2184_v9  ;;  %v2529_v9 = vld [vmem:[#allocation7 + $0x30] sm:$0xff] }
 0xf22   :  { %v2189_v10 = vadd.f32 1e-12, %v2187_v47  ;;  %v2530_v47 = vld [vmem:[#allocation7 + $0x38] sm:$0xff] }
 0xf23   :  { %v2186_v11 = vpop.xlane.xlu0 %2185 }
 0xf24   :  { %6800 = vrsqrt.f32 %v2189_v10  ;;  %v2188_v19 = vmul.f32 0.0078125, %v2186_v11  ;;  %v6452_v10 = vpack.c.bf16 %v2578_v8, %v2577_v4  ;;  %v6422_v11 = vpack.c.bf16 %v2530_v47, %v2529_v9 }
 0xf25   :  { %v6470_v4 = vpack.c.bf16 %v2570_v2, %v2569_v0  ;;  %v2291_v8 = vsub.s32 3, %v7508_v27 }
 0xf26   :  { %v2190_v40 = vadd.f32 1e-12, %v2188_v19  ;;  %v2561_v19 = vld [vmem:[#allocation7 + $0x130] sm:$0xff] }
 0xf28   :  { %6802 = vrsqrt.f32 %v2190_v40  ;;  %v2562_v40 = vld [vmem:[#allocation7 + $0x138] sm:$0xff] }
 0xf2e   :  { %v6801_v17 = vpop.eup %6800 }
 0xf2f   :  { %v2193_v6 = vmul.f32 %v6801_v17, %v7784_v60  ;;  %v2539_v60 = vld [vmem:[#allocation7 + $0x80] sm:$0xff]  ;;  %v6454_v17 = vpack.c.bf16 %v2562_v40, %v2561_v19 }
 0xf30   :  { %v6408_v24 = vpack.c.bf16 %v2540_v22, %v2539_v60  ;;  %v2563_v60 = vld [vmem:[#allocation7 + $0x140] sm:$0xff]  ;;  %v2564_v22 = vld [vmem:[#allocation7 + $0x148] sm:$0xff] }
 0xf31   :  { %v2201_v49 = vmul.f32 %v5288_v12, %v2193_v6  ;;  %v2548_v6 = vld [vmem:[#allocation7 + $0xc8] sm:$0xff]  ;;  %v6458_v23 = vpack.c.bf16 %v2564_v22, %v2563_v60 }
 0xf32   :  { %v6803_v53 = vpop.eup %6802  ;;  %6409 = vmatprep.subr.bf16.mxu0 %v6408_v24  ;;  %v2549_v24 = vld [vmem:[#allocation7 + $0xd0] sm:$0xff] }
 0xf33   :  { %v2209_v14 = vadd.f32 %v5289_v13, %v2201_v49  ;;  %v2194_v15 = vmul.f32 %v6803_v53, %v7787_v61  ;;  %v2555_v61 = vld [vmem:[#allocation7 + $0x100] sm:$0xff]  ;;  %v2580_v53 = vld [vmem:[#allocation7 + $0x1c8] sm:$0xff]  ;;  %v6428_v26 = vpack.c.bf16 %v2550_v45, %v2549_v24 }
 0xf34   :  { %v6442_v43 = vpack.c.bf16 %v2556_v36, %v2555_v61  ;;  %v2534_v61 = vld [vmem:[#allocation7 + $0x58] sm:$0xff]  ;;  %v6460_v36 = vpack.c.bf16 %v2582_v16, %v2581_v25 }
 0xf35   :  { %2362 = vmatmul.mubr.f32.vlgmr.msra.gmra.mrb[20].mxu0 %v2209_v14  ;;  %2439 = vmatmul.mubr.f32.vlgmr.msra.gmra.mrb[32].mxu1 %v2209_v14  ;;  %v2202_v18 = vmul.f32 %v5288_v12, %v2194_v15  ;;  %v2547_v12 = vld [vmem:[#allocation7 + $0xc0] sm:$0xff]  ;;  %v2532_v15 = vld [vmem:[#allocation7 + $0x48] sm:$0xff] }
 0xf36   :  { %2367 = vmatprep.mubr.f32.mxu0 %v6982_v5  ;;  %2444 = vmatprep.mubr.f32.mxu1 %v6982_v5  ;;  %v6424_v49 = vpack.c.bf16 %v2548_v6, %v2547_v12  ;;  %v2531_v14 = vld [vmem:[#allocation7 + $0x40] sm:$0xff] }
 0xf37   :  { %v2210_v21 = vadd.f32 %v5289_v13, %v2202_v18  ;;  %6411 = vmatpush3.bf16.msra.mxu0 %v6410_v28  ;;  %6443 = vmatpush3.bf16.msra.mxu1 %v6442_v43  ;;  %v2579_v13 = vld [vmem:[#allocation7 + $0x1c0] sm:$0xff]  ;;  %v2533_v28 = vld [vmem:[#allocation7 + $0x50] sm:$0xff] }
 0xf38   :  { %6413 = vmatprep.subr.bf16.mxu0 %v6412_v33  ;;  %6445 = vmatprep.subr.bf16.mxu1 %v6444_v38  ;;  %v6456_v18 = vpack.c.bf16 %v2580_v53, %v2579_v13  ;;  %v6430_v43 = vpack.c.bf16 %v2534_v61, %v2533_v28  ;;  %v2551_v33 = vld [vmem:[#allocation7 + $0xe0] sm:$0xff]  ;;  %v2584_v38 = vld [vmem:[#allocation7 + $0x1e8] sm:$0xff] }
 0xf39   :  { %2368 = vmatmul.mubr.f32.gmra.mrb[22].mxu0 %v2210_v21  ;;  %2445 = vmatmul.mubr.f32.gmra.mrb[34].mxu1 %v2210_v21  ;;  %v6426_v21 = vpack.c.bf16 %v2532_v15, %v2531_v14  ;;  %v6432_v37 = vpack.c.bf16 %v2552_v34, %v2551_v33  ;;  %v6464_v39 = vpack.c.bf16 %v2584_v38, %v2583_v35 }
 0xf3b   :  { %6415 = vmatpush3.bf16.msra.mxu0 %v6414_v41  ;;  %6447 = vmatpush3.bf16.msra.mxu1 %v6446_v46  ;;  %v2535_v41 = vld [vmem:[#allocation7 + $0x60] sm:$0xff] }
 0xf3c   :  { %6417 = vmatprep.subr.bf16.mxu0 %v6416_v52  ;;  %6449 = vmatprep.subr.bf16.mxu1 %v6448_v57  ;;  %v6434_v46 = vpack.c.bf16 %v2536_v42, %v2535_v41  ;;  %v2553_v52 = vld [vmem:[#allocation7 + $0xf0] sm:$0xff]  ;;  %v2586_v57 = vld [vmem:[#allocation7 + $0x1f8] sm:$0xff] }
 0xf3d   :  { %v6436_v56 = vpack.c.bf16 %v2554_v54, %v2553_v52  ;;  %v6468_v62 = vpack.c.bf16 %v2586_v57, %v2585_v55 }
 0xf3f   :  { %6419 = vmatpush3.bf16.msra.mxu0 %v6418_v58  ;;  %6451 = vmatpush3.bf16.msra.mxu1 %v6450_v63  ;;  %v2537_v58 = vld [vmem:[#allocation7 + $0x70] sm:$0xff] }
 0xf40   :  { %6421 = vmatprep.subr.bf16.mxu0 %v6420_v7  ;;  %6453 = vmatprep.subr.bf16.mxu1 %v6452_v10  ;;  %v6438_v63 = vpack.c.bf16 %v2538_v59, %v2537_v58  ;;  %v2275_v7 = vld [vmem:[%s8595_s13] sm:$0xf] }
 0xf41   :  { %v2280_v9 = vrot.slane %v2275_v7, %v7517_v29  ;;  %v2288_v47 = vrot.slane %v2275_v7, %v7520_v30  ;;  %v2284_v10 = vrot.slane %v2275_v7, %v7511_v20 }
 0xf43   :  { %6423 = vmatpush3.bf16.msra.mxu0 %v6422_v11  ;;  %6455 = vmatpush3.bf16.msra.mxu1 %v6454_v17  ;;  %v2292_v11 = vrot.slane %v2275_v7, %v2291_v8 }
 0xf44   :  { %6425 = vmatprep.subr.bf16.mxu0 %v6424_v49  ;;  %6457 = vmatprep.subr.bf16.mxu1 %v6456_v18 }
 0xf47   :  { %6427 = vmatpush3.bf16.msra.mxu0 %v6426_v21  ;;  %6459 = vmatpush3.bf16.msra.mxu1 %v6458_v23 }
 0xf48   :  { %6429 = vmatprep.subr.bf16.mxu0 %v6428_v26  ;;  %6461 = vmatprep.subr.bf16.mxu1 %v6460_v36 }
 0xf4b   :  { %6431 = vmatpush3.bf16.msra.mxu0 %v6430_v43  ;;  %6463 = vmatpush3.bf16.msra.mxu1 %v6462_v32 }
 0xf4c   :  { %6433 = vmatprep.subr.bf16.mxu0 %v6432_v37  ;;  %6465 = vmatprep.subr.bf16.mxu1 %v6464_v39 }
 0xf4f   :  { %6435 = vmatpush3.bf16.msra.mxu0 %v6434_v46  ;;  %6467 = vmatpush3.bf16.msra.mxu1 %v6466_v51 }
 0xf50   :  { %6437 = vmatprep.subr.bf16.mxu0 %v6436_v56  ;;  %6469 = vmatprep.subr.bf16.mxu1 %v6468_v62 }
 0xf53   :  { %6439 = vmatpush3.bf16.msra.mxu0 %v6438_v63  ;;  %6471 = vmatpush3.bf16.msra.mxu1 %v6470_v4 }
0x1008   :  { %v2363_v19 = vpop.f32.mrb[20].mxu0  ;;  %v2440_v40 = vpop.f32.mrb[32].mxu1 }
0x1009   :  { %v7932_v17 = vadd.f32 %v2363_v19, %v2280_v9  ;;  %v7934_v12 = vadd.f32 %v2440_v40, %v2288_v47  ;;  %v2365_v6 = vpop.f32.mrb[21].mxu0  ;;  %v2442_v13 = vpop.f32.mrb[33].mxu1 }
0x100a   :  { %v7936_v49 = vadd.f32 %v2365_v6, %v2284_v10  ;;  %v7938_v53 = vadd.f32 %v2442_v13, %v2292_v11 }
0x100b   :  { %v2451_v14 = vmul.f32 %v7932_v17, %v7932_v17  ;;  %v2453_v15 = vmul.f32 %v7934_v12, %v7934_v12 }
0x100c   :  { %v2452_v18 = vmul.f32 %v7936_v49, %v7936_v49  ;;  %v2454_v21 = vmul.f32 %v7938_v53, %v7938_v53  ;;  %v2369_v60 = vpop.f32.mrb[22].mxu0  ;;  %v2446_v22 = vpop.f32.mrb[34].mxu1 }
0x100d   :  { %v2459_v23 = vmul.f32 %v2451_v14, %v7932_v17  ;;  %v2461_v24 = vmul.f32 %v2453_v15, %v7934_v12  ;;  %v7950_v45 = vadd.f32 %v2369_v60, %v2280_v9  ;;  %v7952_v25 = vadd.f32 %v2446_v22, %v2288_v47  ;;  %v2371_v26 = vpop.f32.mrb[23].mxu0  ;;  %v2448_v16 = vpop.f32.mrb[35].mxu1 }
0x100e   :  { %v2460_v28 = vmul.f32 %v2452_v18, %v7936_v49  ;;  %v2462_v61 = vmul.f32 %v2454_v21, %v7938_v53  ;;  %v7956_v36 = vadd.f32 %v2371_v26, %v2284_v10  ;;  %v7958_v43 = vadd.f32 %v2448_v16, %v2292_v11 }
0x100f   :  { %v2467_v44 = vmul.f32 0.044715, %v2459_v23  ;;  %v2469_v31 = vmul.f32 0.044715, %v2461_v24  ;;  %v2455_v32 = vmul.f32 %v7950_v45, %v7950_v45  ;;  %v2457_v33 = vmul.f32 %v7952_v25, %v7952_v25 }
0x1010   :  { %v2468_v34 = vmul.f32 0.044715, %v2460_v28  ;;  %v2470_v35 = vmul.f32 0.044715, %v2462_v61  ;;  %v2456_v37 = vmul.f32 %v7956_v36, %v7956_v36  ;;  %v2458_v38 = vmul.f32 %v7958_v43, %v7958_v43 }
0x1011   :  { %v2475_v41 = vadd.f32 %v2467_v44, %v7932_v17  ;;  %v2477_v42 = vadd.f32 %v2469_v31, %v7934_v12  ;;  %v2463_v39 = vmul.f32 %v2455_v32, %v7950_v45  ;;  %v2465_v46 = vmul.f32 %v2457_v33, %v7952_v25 }
0x1012   :  { %v2476_v48 = vadd.f32 %v2468_v34, %v7936_v49  ;;  %v2478_v50 = vadd.f32 %v2470_v35, %v7938_v53  ;;  %v2464_v51 = vmul.f32 %v2456_v37, %v7956_v36  ;;  %v2466_v52 = vmul.f32 %v2458_v38, %v7958_v43 }
0x1013   :  { %v2483_v54 = vmul.f32 0.7978846, %v2475_v41  ;;  %v2485_v55 = vmul.f32 0.7978846, %v2477_v42  ;;  %v2471_v56 = vmul.f32 0.044715, %v2463_v39 }
0x1014   :  { %v2484_v57 = vmul.f32 0.7978846, %v2476_v48  ;;  %v2486_v58 = vmul.f32 0.7978846, %v2478_v50  ;;  %v2473_v59 = vmul.f32 0.044715, %v2465_v46 }
0x1015   :  { %6804 = vtanh.f32 %v2483_v54  ;;  %v2479_v62 = vadd.f32 %v2471_v56, %v7950_v45  ;;  %v2472_v63 = vmul.f32 0.044715, %v2464_v51  ;;  %v2474_v0 = vmul.f32 0.044715, %v2466_v52 }
0x1016   :  { %6806 = vtanh.f32 %v2485_v55  ;;  %v2481_v2 = vadd.f32 %v2473_v59, %v7952_v25 }
0x1017   :  { %v2487_v4 = vmul.f32 0.7978846, %v2479_v62  ;;  %v2480_v7 = vadd.f32 %v2472_v63, %v7956_v36  ;;  %v2482_v9 = vadd.f32 %v2474_v0, %v7958_v43  ;;  %6808 = vtanh.f32 %v2484_v57 }
0x1018   :  { %v2489_v47 = vmul.f32 0.7978846, %v2481_v2  ;;  %6810 = vtanh.f32 %v2486_v58 }
0x1019   :  { %v2488_v10 = vmul.f32 0.7978846, %v2480_v7  ;;  %v2490_v11 = vmul.f32 0.7978846, %v2482_v9  ;;  %6812 = vtanh.f32 %v2487_v4  ;;  %v2792_v7 = vld [vmem:[#allocation2 + $0x188] sm:$0xff]  ;;  %v2795_v9 = vld [vmem:[#allocation2 + $0x1a0] sm:$0xff] }
0x101a   :  { %6814 = vtanh.f32 %v2489_v47  ;;  %v2791_v47 = vld [vmem:[#allocation2 + $0x180] sm:$0xff] }
0x101b   :  { %6816 = vtanh.f32 %v2488_v10  ;;  %v6472_v10 = vpack.c.bf16 %v2795_v9, %v2792_v7  ;;  %v2824_v7 = vld [vmem:[#allocation2 + $0x288] sm:$0xff] }
0x101c   :  { %6818 = vtanh.f32 %v2490_v11  ;;  %v2794_v11 = vld [vmem:[#allocation2 + $0x198] sm:$0xff] }
0x101d   :  { %6473 = vmatprep.subr.bf16.mxu0 %v6472_v10  ;;  %v2828_v10 = vld [vmem:[#allocation2 + $0x2a8] sm:$0xff] }
0x101f   :  { %v6805_v19 = vpop.eup %6804 }
0x1020   :  { %v6807_v40 = vpop.eup %6806  ;;  %v2499_v6 = vadd.f32 1.0, %v6805_v19  ;;  %v2798_v19 = vld [vmem:[#allocation2 + $0x1b8] sm:$0xff] }
0x1021   :  { %v6809_v13 = vpop.eup %6808  ;;  %v2501_v14 = vadd.f32 1.0, %v6807_v40  ;;  %v2801_v40 = vld [vmem:[#allocation2 + $0x1d0] sm:$0xff] }
0x1022   :  { %v6811_v15 = vpop.eup %6810  ;;  %v2500_v18 = vadd.f32 1.0, %v6809_v13  ;;  %v2507_v60 = vmul.f32 0.5, %v2499_v6  ;;  %v6476_v6 = vpack.c.bf16 %v2801_v40, %v2798_v19  ;;  %v2793_v13 = vld [vmem:[#allocation2 + $0x190] sm:$0xff]  ;;  %v2823_v19 = vld [vmem:[#allocation2 + $0x280] sm:$0xff] }
0x1023   :  { %v6813_v21 = vpop.eup %6812  ;;  %v2502_v22 = vadd.f32 1.0, %v6811_v15  ;;  %v2509_v24 = vmul.f32 0.5, %v2501_v14  ;;  %v2796_v14 = vld [vmem:[#allocation2 + $0x1a8] sm:$0xff]  ;;  %v2797_v15 = vld [vmem:[#allocation2 + $0x1b0] sm:$0xff] }
0x1024   :  { %v6815_v23 = vpop.eup %6814  ;;  %v2508_v26 = vmul.f32 0.5, %v2500_v18  ;;  %v2503_v16 = vadd.f32 1.0, %v6813_v21  ;;  %v2515_v34 = vmul.f32 %v2507_v60, %v7932_v17  ;;  %v2800_v18 = vld [vmem:[#allocation2 + $0x1c8] sm:$0xff]  ;;  %v2807_v60 = vld [vmem:[#allocation2 + $0x200] sm:$0xff] }
0x1025   :  { %v6817_v28 = vpop.eup %6816  ;;  %v2510_v61 = vmul.f32 0.5, %v2502_v22  ;;  %v2505_v44 = vadd.f32 1.0, %v6815_v23  ;;  %v2517_v41 = vmul.f32 %v2509_v24, %v7934_v12  ;;  %v2804_v21 = vld [vmem:[#allocation2 + $0x1e8] sm:$0xff]  ;;  %v6478_v22 = vpack.c.bf16 %v2800_v18, %v2797_v15  ;;  %v2799_v23 = vld [vmem:[#allocation2 + $0x1c0] sm:$0xff]  ;;  %v2802_v24 = vld [vmem:[#allocation2 + $0x1d8] sm:$0xff] }
0x1026   :  { %v6819_v31 = vpop.eup %6818  ;;  %v2516_v32 = vmul.f32 %v2508_v26, %v7936_v49  ;;  %v2504_v33 = vadd.f32 1.0, %v6817_v28  ;;  %v2511_v38 = vmul.f32 0.5, %v2503_v16  ;;  %v6480_v26 = vpack.c.bf16 %v2807_v60, %v2804_v21  ;;  %v2803_v28 = vld [vmem:[#allocation2 + $0x1e0] sm:$0xff]  ;;  %v2837_v18 = vld [vmem:[#allocation2 + $0x2f0] sm:$0xff] }
0x1027   :  { %v2518_v35 = vmul.f32 %v2510_v61, %v7938_v53  ;;  %v2506_v37 = vadd.f32 1.0, %v6819_v31  ;;  %v2513_v39 = vmul.f32 0.5, %v2505_v44  ;;  %v6508_v16 = vpack.c.bf16 %v2802_v24, %v2799_v23  ;;  %v2806_v61 = vld [vmem:[#allocation2 + $0x1f8] sm:$0xff]  ;;  %v2829_v21 = vld [vmem:[#allocation2 + $0x2b0] sm:$0xff]  ;;  %v2836_v24 = vld [vmem:[#allocation2 + $0x2e8] sm:$0xff] }
0x1028   :  { %2651 = vmatprep.mubr.f32.mxu0 %v2516_v32  ;;  %v2512_v42 = vmul.f32 0.5, %v2504_v33  ;;  %v2519_v50 = vmul.f32 %v2511_v38, %v7950_v45  ;;  %v6482_v44 = vpack.c.bf16 %v2806_v61, %v2803_v28  ;;  %v2833_v23 = vld [vmem:[#allocation2 + $0x2d0] sm:$0xff]  ;;  %v2835_v28 = vld [vmem:[#allocation2 + $0x2e0] sm:$0xff]  ;;  %v2838_v61 = vld [vmem:[#allocation2 + $0x2f8] sm:$0xff] }
0x1029   :  { %2726 = vmatprep.mubr.f32.mxu1 %v2518_v35  ;;  %2652 = vmatmul.mubr.f32.vlgmr.msra.gmra.mrb[24].mxu0 %v2515_v34  ;;  %v2514_v46 = vmul.f32 0.5, %v2506_v37  ;;  %v2521_v17 = vmul.f32 %v2513_v39, %v7952_v25  ;;  %v5290_v25 = vld [vmem:[%s8597_s15] ss:$0 sm:$0xff]  ;;  %v2813_v39 = vld [vmem:[#allocation2 + $0x230] sm:$0xff] }
0x102a   :  { %2727 = vmatmul.mubr.f32.vlgmr.msra.gmra.mrb[36].mxu1 %v2517_v41  ;;  %v2520_v48 = vmul.f32 %v2512_v42, %v7956_v36  ;;  %v2810_v42 = vld [vmem:[#allocation2 + $0x218] sm:$0xff] }
0x102b   :  { %v2522_v49 = vmul.f32 %v2514_v46, %v7958_v43  ;;  %v2805_v46 = vld [vmem:[#allocation2 + $0x1f0] sm:$0xff] }
0x102c   :  { %2656 = vmatprep.mubr.f32.mxu0 %v2520_v48  ;;  %v6484_v48 = vpack.c.bf16 %v2813_v39, %v2810_v42  ;;  %v5293_v39 = vld [vmem:[%s8627_s14 + $0x1] ss:$0 sm:$0xff] }
0x102d   :  { %2731 = vmatprep.mubr.f32.mxu1 %v2522_v49  ;;  %2657 = vmatmul.mubr.f32.gmra.mrb[26].mxu0 %v2519_v50  ;;  %v2808_v49 = vld [vmem:[#allocation2 + $0x208] sm:$0xff]  ;;  %v2809_v50 = vld [vmem:[#allocation2 + $0x210] sm:$0xff] }
0x102e   :  { %2732 = vmatmul.mubr.f32.gmra.mrb[38].mxu1 %v2521_v17  ;;  %2921 = vmatprep.mubr.f32.mxu0 %v6982_v5  ;;  %v2812_v17 = vld [vmem:[#allocation2 + $0x228] sm:$0xff] }
0x10fc   :  { %v5612_v12 = vpop.f32.mrb[24].mxu0 }
0x10fd   :  { %v5650_v53 = vpop.f32.mrb[36].mxu1  ;;  %v5613_v51 = vpop.f32.mrb[25].mxu0 }
0x10fe   :  { %v5614_v52 = vadd.f32 %v5613_v51, %v5612_v12  ;;  %v5651_v54 = vpop.f32.mrb[37].mxu1  ;;  %v6512_v12 = vpack.c.bf16 %v2808_v49, %v2805_v46  ;;  %v2816_v51 = vld [vmem:[#allocation2 + $0x248] sm:$0xff] }
0x10ff   :  { %v5652_v55 = vadd.f32 %v5651_v54, %v5650_v53  ;;  %v6486_v53 = vpack.c.bf16 %v2812_v17, %v2809_v50  ;;  %v2811_v54 = vld [vmem:[#allocation2 + $0x220] sm:$0xff] }
0x1100   :  { %v5615_v56 = vpop.f32.mrb[26].mxu0 }
0x1101   :  { %v2729_v36 = vadd.f32 %v5652_v55, %v5614_v52  ;;  %v5653_v57 = vpop.f32.mrb[38].mxu1  ;;  %v5616_v43 = vpop.f32.mrb[27].mxu0  ;;  %v2819_v52 = vld [vmem:[#allocation2 + $0x260] sm:$0xff] }
0x1102   :  { %v5617_v58 = vadd.f32 %v5616_v43, %v5615_v56  ;;  %v5654_v45 = vpop.f32.mrb[39].mxu1  ;;  %v6488_v55 = vpack.c.bf16 %v2819_v52, %v2816_v51  ;;  %v2814_v56 = vld [vmem:[#allocation2 + $0x238] sm:$0xff] }
0x1103   :  { %v2737_v59 = vadd.f32 %v2729_v36, %v7707_v3  ;;  %v5655_v62 = vadd.f32 %v5654_v45, %v5653_v57  ;;  %v6474_v3 = vpack.c.bf16 %v2794_v11, %v2791_v47  ;;  %v2815_v36 = vld [vmem:[#allocation2 + $0x240] sm:$0xff]  ;;  %v2818_v57 = vld [vmem:[#allocation2 + $0x258] sm:$0xff]  ;;  %v6516_v43 = vpack.c.bf16 %v2814_v56, %v2811_v54 }
0x1104   :  { %v2822_v45 = vld [vmem:[#allocation2 + $0x278] sm:$0xff]  ;;  %v2831_v11 = vld [vmem:[#allocation2 + $0x2c0] sm:$0xff] }
0x1105   :  { %v2734_v63 = vadd.f32 %v5655_v62, %v5617_v58  ;;  %v7993_v0 = vadd.f32 %v5290_v25, %v2737_v59  ;;  %6475 = vmatpush1.bf16.msra.mxu0 %v6474_v3  ;;  %v6490_v58 = vpack.c.bf16 %v2818_v57, %v2815_v36  ;;  %v2817_v59 = vld [vmem:[#allocation2 + $0x250] sm:$0xff]  ;;  %v6496_v40 = vpack.c.bf16 %v2831_v11, %v2828_v10  ;;  %v2826_v3 = vld [vmem:[#allocation2 + $0x298] sm:$0xff]  ;;  %v8062_v10 = vld [vmem:[%s8629_s8] sm:$0xff] }
0x1106   :  { %6477 = vmatprep.subr.bf16.mxu0 %v6476_v6  ;;  %v2827_v6 = vld [vmem:[#allocation2 + $0x2a0] sm:$0xff] }
0x1107   :  { %v2738_v2 = vadd.f32 %v2734_v63, %v7705_v1  ;;  %2752 = vadd.xlane.f32.xlu1 %v7993_v0  ;;  %v6504_v1 = vpack.c.bf16 %v2796_v14, %v2793_v13  ;;  %v2820_v63 = vld [vmem:[#allocation2 + $0x268] sm:$0xff]  ;;  %v2830_v13 = vld [vmem:[#allocation2 + $0x2b8] sm:$0xff]  ;;  %v6524_v14 = vpack.c.bf16 %v2826_v3, %v2823_v19 }
0x1108   :  { %v6520_v9 = vpack.c.bf16 %v2820_v63, %v2817_v59  ;;  %v6498_v15 = vpack.c.bf16 %v2830_v13, %v2827_v6 }
0x1109   :  { %v7997_v4 = vadd.f32 %v5290_v25, %v2738_v2  ;;  %6505 = vmatprep.subr.bf16.mxu1 %v6504_v1  ;;  %6479 = vmatpush1.bf16.msra.mxu0 %v6478_v22  ;;  %v2825_v25 = vld [vmem:[#allocation2 + $0x290] sm:$0xff]  ;;  %v2832_v22 = vld [vmem:[#allocation2 + $0x2c8] sm:$0xff] }
0x110a   :  { %6507 = vmatpush3.bf16.msra.mxu1 %v6504_v1  ;;  %6481 = vmatprep.subr.bf16.mxu0 %v6480_v26  ;;  %v6492_v62 = vpack.c.bf16 %v2825_v25, %v2822_v45  ;;  %v2821_v2 = vld [vmem:[#allocation2 + $0x270] sm:$0xff]  ;;  %v2834_v1 = vld [vmem:[#allocation2 + $0x2d8] sm:$0xff]  ;;  %v6528_v26 = vpack.c.bf16 %v2832_v22, %v2829_v21 }
0x110b   :  { %2754 = vadd.xlane.f32.xlu0 %v7997_v4  ;;  %6509 = vmatprep.subr.bf16.mxu1 %v6508_v16  ;;  %v6494_v47 = vpack.c.bf16 %v2824_v7, %v2821_v2  ;;  %v6500_v60 = vpack.c.bf16 %v2837_v18, %v2834_v1 }
0x110d   :  { %6483 = vmatpush1.bf16.msra.mxu0 %v6482_v44  ;;  %v6532_v44 = vpack.c.bf16 %v2838_v61, %v2835_v28 }
0x110e   :  { %6511 = vmatpush3.bf16.msra.mxu1 %v6508_v16  ;;  %6485 = vmatprep.subr.bf16.mxu0 %v6484_v48  ;;  %v6502_v16 = vpack.c.bf16 %v2836_v24, %v2833_v23  ;;  %v5294_v48 = vld [vmem:[%s8628_s5 + $0x1] ss:$0 sm:$0xff] }
0x110f   :  { %6513 = vmatprep.subr.bf16.mxu1 %v6512_v12 }
0x1111   :  { %6487 = vmatpush1.bf16.msra.mxu0 %v6486_v53 }
0x1112   :  { %6515 = vmatpush3.bf16.msra.mxu1 %v6512_v12  ;;  %6489 = vmatprep.subr.bf16.mxu0 %v6488_v55 }
0x1113   :  { %6517 = vmatprep.subr.bf16.mxu1 %v6516_v43 }
0x1115   :  { %6491 = vmatpush1.bf16.msra.mxu0 %v6490_v58 }
0x1116   :  { %6519 = vmatpush3.bf16.msra.mxu1 %v6516_v43  ;;  %6493 = vmatprep.subr.bf16.mxu0 %v6492_v62 }
0x1117   :  { %6521 = vmatprep.subr.bf16.mxu1 %v6520_v9 }
0x1119   :  { %6495 = vmatpush1.bf16.msra.mxu0 %v6494_v47 }
0x111a   :  { %6523 = vmatpush3.bf16.msra.mxu1 %v6520_v9  ;;  %6497 = vmatprep.subr.bf16.mxu0 %v6496_v40 }
0x111b   :  { %6525 = vmatprep.subr.bf16.mxu1 %v6524_v14 }
0x111d   :  { %6499 = vmatpush1.bf16.msra.mxu0 %v6498_v15 }
0x111e   :  { %6527 = vmatpush3.bf16.msra.mxu1 %v6524_v14  ;;  %6501 = vmatprep.subr.bf16.mxu0 %v6500_v60 }
0x111f   :  { %6529 = vmatprep.subr.bf16.mxu1 %v6528_v26 }
0x1121   :  { %6503 = vmatpush1.bf16.msra.mxu0 %v6502_v16 }
0x1122   :  { %6531 = vmatpush3.bf16.msra.mxu1 %v6528_v26  ;;  %6002 = vmatprep.subr.mxu0 %v6982_v5 }
0x1123   :  { %6533 = vmatprep.subr.bf16.mxu1 %v6532_v44 }
0x1126   :  { %6535 = vmatpush3.bf16.msra.mxu1 %v6532_v44 }
0x1127   :  { %6037 = vmatprep.subr.mxu1 %v6982_v5 }
0x1194   :  { %v2753_v31 = vpop.xlane.xlu1 %2752 }
0x1195   :  { %v2756_v32 = vmul.f32 0.0078125, %v2753_v31 }
0x1197   :  { %v8001_v33 = vsub.f32 %v7993_v0, %v2756_v32 }
0x1198   :  { %v2755_v34 = vpop.xlane.xlu0 %2754 }
0x1199   :  { %v2757_v35 = vmul.f32 0.0078125, %v2755_v34  ;;  %v2760_v37 = vmul.f32 %v8001_v33, %v8001_v33 }
0x119b   :  { %v8006_v38 = vsub.f32 %v7997_v4, %v2757_v35  ;;  %2762 = vadd.xlane.f32.xlu1 %v2760_v37 }
0x119d   :  { %v2761_v41 = vmul.f32 %v8006_v38, %v8006_v38 }
0x119f   :  { %2764 = vadd.xlane.f32.xlu0 %v2761_v41 }
0x1228   :  { %v2763_v31 = vpop.xlane.xlu1 %2762 }
0x1229   :  { %v2766_v32 = vmul.f32 0.0078125, %v2763_v31 }
0x122b   :  { %v2768_v34 = vadd.f32 1e-12, %v2766_v32 }
0x122c   :  { %v2765_v35 = vpop.xlane.xlu0 %2764 }
0x122d   :  { %6820 = vrsqrt.f32 %v2768_v34  ;;  %v2767_v37 = vmul.f32 0.0078125, %v2765_v35 }
0x122f   :  { %v2769_v41 = vadd.f32 1e-12, %v2767_v37 }
0x1231   :  { %6822 = vrsqrt.f32 %v2769_v41 }
0x1237   :  { %v6821_v42 = vpop.eup %6820 }
0x1238   :  { %v2772_v46 = vmul.f32 %v6821_v42, %v8001_v33  ;;  %v5295_v33 = vld [vmem:[%s8589_s7 + $0x3] sm:$0x7] }
0x1239   :  { %v2845_v54 = vrot.slane %v5295_v33, %v7517_v29  ;;  %v2853_v56 = vrot.slane %v5295_v33, %v7520_v30 }
0x123a   :  { %v2780_v49 = vmul.f32 %v5293_v39, %v2772_v46 }
0x123b   :  { %v6823_v50 = vpop.eup %6822 }
0x123c   :  { %v2788_v17 = vadd.f32 %v5294_v48, %v2780_v49  ;;  %v2773_v12 = vmul.f32 %v6823_v50, %v8006_v38  ;;  %v2849_v38 = vrot.slane %v5295_v33, %v7511_v20 }
0x123e   :  { %2922 = vmatmul.mubr.f32.vlgmr.msra.gmra.mrb[28].mxu0 %v2788_v17  ;;  %5999 = vmatprep.mubr.f32.mxu1 %v2788_v17  ;;  %v2781_v53 = vmul.f32 %v5293_v39, %v2773_v12 }
0x123f   :  { %2927 = vmatprep.mubr.f32.mxu0 %v6982_v5 }
0x1240   :  { %v2789_v51 = vadd.f32 %v5294_v48, %v2781_v53 }
0x1242   :  { %2928 = vmatmul.mubr.f32.gmra.mrb[30].mxu0 %v2789_v51  ;;  %6000 = vmatmul.mubr.f32.vlgmr.msra.gmra.mrb[40].mxu1 %v2789_v51 }
0x1243   :  { %6004 = vmatprep.mubr.msk.f32.mxu0 %vm6983_vm0, %v6982_v5  ;;  %6039 = vmatprep.mubr.msk.f32.mxu1 %vm6983_vm0, %v6982_v5 }
0x1311   :  { %v2923_v52 = vpop.f32.mrb[28].mxu0 }
0x1312   :  { %v2925_v55 = vpop.f32.mrb[29].mxu0  ;;  %v8035_v58 = vadd.f32 %v2923_v52, %v2845_v54 }
0x1313   :  { %v8031_v36 = vadd.f32 %v2925_v55, %v2849_v38 }
0x1315   :  { %v2929_v57 = vpop.f32.mrb[30].mxu0  ;;  %v6001_v43 = vpop.f32.mrb[40].mxu1  ;;  %6003 = vmatpush3.xpose.msk.msra.mxu0 %vm707_vm1, %v8031_v36 }
0x1316   :  { %v8037_v45 = vadd.f32 %v6001_v43, %v2853_v56  ;;  %v2931_v25 = vpop.f32.mrb[31].mxu0  ;;  %v3000_v59 = vpop.f32.mrb[41].mxu1  ;;  %6007 = vmatprep.subr.mxu0 %v6982_v5  ;;  %v8048_v63 = vadd.f32 %v2929_v57, %v2845_v54 }
0x1317   :  { %v8040_v62 = vadd.f32 %v2931_v25, %v2849_v38  ;;  %v8051_v2 = vadd.f32 %v3000_v59, %v2853_v56 }
0x1318   :  { %6005 = vmatmul.mubr.msk.f32.vlgmr.msra.gmra.mrb[32].mxu0 %vm707_vm1, %v8035_v58 }
0x1319   :  { %6008 = vmatpush3.xpose.msk.msra.mxu0 %vm707_vm1, %v8040_v62  ;;  %6009 = vmatprep.mubr.msk.f32.mxu0 %vm6983_vm0, %v6982_v5 }
0x131a   :  { %6012 = vmatprep.subr.mxu0 %v6982_v5 }
0x131c   :  { %6010 = vmatmul.mubr.msk.f32.vlgmr.msra.gmra.mrb[34].mxu0 %vm707_vm1, %v8048_v63 }
0x131d   :  { %6013 = vmatpush3.msra.mxu0 %v8051_v2  ;;  %6014 = vmatprep.mubr.msk.f32.mxu0 %vm6983_vm0, %v6982_v5 }
0x131e   :  { %6017 = vmatprep.subr.mxu0 %v6982_v5 }
0x13eb   :  { %v3081_v7 = vpop.f32.mrb[32].mxu0 }
0x13ec   :  { %v3161_v9 = vmul.f32 0.17677669, %v3081_v7  ;;  %v6006_v47 = vpop.f32.mrb[33].mxu0 }
0x13ee   :  { %v3163_v11 = vadd.f32 %v8062_v10, %v3161_v9 }
0x13ef   :  { %v3157_v19 = vpop.f32.mrb[34].mxu0 }
0x13f0   :  { %v3162_v40 = vmul.f32 0.17677669, %v3157_v19  ;;  %v6011_v3 = vpop.f32.mrb[35].mxu0  ;;  %v3165_v6 = vsel %vm864_vm2, %v3163_v11, -inf }
0x13f1   :  { %3166 = vmax.xlane.f32.xlu1 %v3165_v6 }
0x13f2   :  { %v3164_v13 = vadd.f32 %v8062_v10, %v3162_v40 }
0x13f4   :  { %v3168_v14 = vsel %vm864_vm2, %v3164_v13, -inf }
0x13f5   :  { %3169 = vmax.xlane.f32.xlu0 %v3168_v14 }
0x147e   :  { %v3167_v15 = vpop.xlane.xlu1 %3166 }
0x147f   :  { %v3171_v1 = vsub.f32 %v3163_v11, %v3167_v15 }
0x1481   :  { %v3173_v18 = vmul.f32 1.442695, %v3171_v1 }
0x1482   :  { %v3170_v21 = vpop.xlane.xlu0 %3169 }
0x1483   :  { %6824 = vpow2.f32 %v3173_v18  ;;  %v3172_v60 = vsub.f32 %v3164_v13, %v3170_v21 }
0x1485   :  { %v3175_v22 = vmul.f32 1.442695, %v3172_v60 }
0x1487   :  { %6826 = vpow2.f32 %v3175_v22 }
0x148d   :  { %v6825_v23 = vpop.eup %6824 }
0x148e   :  { %v3177_v24 = vsel %vm864_vm2, %v6825_v23, 0.0 }
0x148f   :  { %3178 = vadd.xlane.f32.xlu1 %v3177_v24 }
0x1491   :  { %v6827_v26 = vpop.eup %6826 }
0x1492   :  { %v3180_v16 = vsel %vm864_vm2, %v6827_v26, 0.0 }
0x1493   :  { %3181 = vadd.xlane.f32.xlu0 %v3180_v16 }
0x14a0   :  { %3335 = vrot.lane.b32.xlu1 %v8031_v36, %s6984_s28 }
0x14a4   :  { %3413 = vrot.lane.b32.xlu1 %v8040_v62, %s6984_s28 }
0x14a8   :  { %3411 = vrot.lane.b32.xlu1 %v8048_v63, %s6984_s28 }
0x14a9   :  { %3333 = vrot.lane.b32.xlu0 %v8035_v58, %s6984_s28 }
0x151c   :  { %v3179_v28 = vpop.xlane.xlu1 %3178 }
0x151d   :  { %6828 = vrcp.f32 %v3179_v28 }
0x1520   :  { %v3182_v61 = vpop.xlane.xlu0 %3181  ;;  %v3336_v34 = vpop.permute.xlu1 %3335 }
0x1521   :  { %6830 = vrcp.f32 %v3182_v61 }
0x1524   :  { %v3414_v37 = vpop.permute.xlu1 %3413  ;;  %v3334_v41 = vpop.permute.xlu0 %3333 }
0x1527   :  { %v6829_v44 = vpop.eup %6828 }
0x1528   :  { %v3185_v31 = vmul.f32 %v6829_v44, %v6825_v23  ;;  %v3412_v42 = vpop.permute.xlu1 %3411 }
0x152a   :  { %6015 = vmatmul.mubr.msk.f32.vlgmr.msra.gmra.mrb[36].mxu0 %vm864_vm2, %v3185_v31 }
0x152b   :  { %v6831_v32 = vpop.eup %6830  ;;  %6018 = vmatpush3.msra.mxu0 %v8037_v45  ;;  %6019 = vmatprep.mubr.msk.f32.mxu0 %vm6983_vm0, %v6982_v5 }
0x152c   :  { %v3186_v35 = vmul.f32 %v6831_v32, %v6827_v26  ;;  %6022 = vmatprep.subr.mxu0 %v6982_v5 }
0x152e   :  { %6020 = vmatmul.mubr.msk.f32.vlgmr.msra.gmra.mrb[38].mxu0 %vm864_vm2, %v3186_v35 }
0x152f   :  { %6024 = vmatprep.mubr.msk.f32.mxu0 %vm6983_vm0, %v6982_v5 }
0x1532   :  { %6023 = vmatpush3.xpose.msk.msra.mxu0 %vm707_vm1, %v3336_v34 }
0x1533   :  { %6027 = vmatprep.subr.mxu0 %v6982_v5 }
0x1535   :  { %6025 = vmatmul.mubr.msk.f32.vlgmr.msra.gmra.mrb[40].mxu0 %vm707_vm1, %v3334_v41 }
0x1536   :  { %6028 = vmatpush3.xpose.msk.msra.mxu0 %vm707_vm1, %v3414_v37  ;;  %6029 = vmatprep.mubr.msk.f32.mxu0 %vm6983_vm0, %v6982_v5 }
0x1537   :  { %6032 = vmatprep.subr.mxu0 %v6982_v5 }
0x1539   :  { %6030 = vmatmul.mubr.msk.f32.vlgmr.msra.gmra.mrb[42].mxu0 %vm707_vm1, %v3412_v42 }
0x153a   :  { %6034 = vmatprep.mubr.msk.f32.mxu0 %vm6983_vm0, %v6982_v5 }
0x15fd   :  { %v8096_v39 = vpop.f32.mrb[36].mxu0 }
0x15fe   :  { %v6016_v46 = vpop.f32.mrb[37].mxu0 }
0x1601   :  { %v8098_v48 = vpop.f32.mrb[38].mxu0 }
0x1602   :  { %v6021_v49 = vpop.f32.mrb[39].mxu0 }
0x1608   :  { %v3407_v50 = vpop.f32.mrb[40].mxu0 }
0x1609   :  { %v3489_v17 = vmul.f32 0.17677669, %v3407_v50  ;;  %v6026_v12 = vpop.f32.mrb[41].mxu0 }
0x160b   :  { %v3491_v53 = vadd.f32 %v8062_v10, %v3489_v17 }
0x160c   :  { %v3485_v51 = vpop.f32.mrb[42].mxu0 }
0x160d   :  { %v3490_v33 = vmul.f32 0.17677669, %v3485_v51  ;;  %v6031_v38 = vpop.f32.mrb[43].mxu0  ;;  %v3493_v52 = vsel %vm864_vm2, %v3491_v53, -inf }
0x160e   :  { %3494 = vmax.xlane.f32.xlu1 %v3493_v52 }
0x160f   :  { %v3492_v54 = vadd.f32 %v8062_v10, %v3490_v33 }
0x1611   :  { %v3496_v55 = vsel %vm864_vm2, %v3492_v54, -inf }
0x1612   :  { %3497 = vmax.xlane.f32.xlu0 %v3496_v55 }
0x161f   :  { %3516 = vrot.lane.b32.xlu1 %v8051_v2, %s6984_s28 }
0x1623   :  { %3671 = vrot.lane.b32.xlu1 %v8031_v36, %s6985_s26 }
0x1627   :  { %3749 = vrot.lane.b32.xlu1 %v8040_v62, %s6985_s26 }
0x1628   :  { %3593 = vrot.lane.b32.xlu0 %v8037_v45, %s6984_s28 }
0x162b   :  { %3669 = vrot.lane.b32.xlu1 %v8035_v58, %s6985_s26 }
0x169b   :  { %v3495_v56 = vpop.xlane.xlu1 %3494 }
0x169c   :  { %v3499_v57 = vsub.f32 %v3491_v53, %v3495_v56 }
0x169e   :  { %v3501_v43 = vmul.f32 1.442695, %v3499_v57 }
0x169f   :  { %v3517_v25 = vpop.permute.xlu1 %3516  ;;  %v3498_v59 = vpop.xlane.xlu0 %3497 }
0x16a0   :  { %6832 = vpow2.f32 %v3501_v43  ;;  %v3500_v7 = vsub.f32 %v3492_v54, %v3498_v59  ;;  %6033 = vmatpush3.msra.mxu0 %v3517_v25 }
0x16a1   :  { %6042 = vmatprep.subr.mxu0 %v6982_v5 }
0x16a2   :  { %v3503_v9 = vmul.f32 1.442695, %v3500_v7 }
0x16a3   :  { %v3594_v47 = vpop.permute.xlu0 %3593  ;;  %v3672_v14 = vpop.permute.xlu1 %3671 }
0x16a4   :  { %6834 = vpow2.f32 %v3503_v9  ;;  %6038 = vmatpush3.msra.mxu1 %v3594_v47 }
0x16a5   :  { %6047 = vmatprep.subr.mxu1 %v6982_v5 }
0x16a7   :  { %v3750_v1 = vpop.permute.xlu1 %3749 }
0x16aa   :  { %v6833_v11 = vpop.eup %6832 }
0x16ab   :  { %v3505_v19 = vsel %vm864_vm2, %v6833_v11, 0.0  ;;  %v3670_v22 = vpop.permute.xlu1 %3669 }
0x16ac   :  { %3506 = vadd.xlane.f32.xlu0 %v3505_v19 }
0x16ae   :  { %v6835_v40 = vpop.eup %6834 }
0x16af   :  { %v3508_v3 = vsel %vm864_vm2, %v6835_v40, 0.0 }
0x16b0   :  { %3509 = vadd.xlane.f32.xlu0 %v3508_v3 }
0x16c6   :  { %3747 = vrot.lane.b32.xlu0 %v8048_v63, %s6985_s26 }
0x1739   :  { %v3507_v6 = vpop.xlane.xlu0 %3506 }
0x173a   :  { %6836 = vrcp.f32 %v3507_v6 }
0x173d   :  { %v3510_v13 = vpop.xlane.xlu0 %3509 }
0x173e   :  { %6838 = vrcp.f32 %v3510_v13 }
0x1741   :  { %v3748_v23 = vpop.permute.xlu0 %3747 }
0x1744   :  { %v6837_v15 = vpop.eup %6836 }
0x1745   :  { %v3513_v18 = vmul.f32 %v6837_v15, %v6833_v11 }
0x1747   :  { %6035 = vmatmul.mubr.msk.f32.vlgmr.msra.gmra.mrb[44].mxu0 %vm864_vm2, %v3513_v18 }
0x1748   :  { %v6839_v21 = vpop.eup %6838  ;;  %6043 = vmatpush3.xpose.msk.msra.mxu0 %vm707_vm1, %v3672_v14  ;;  %6044 = vmatprep.mubr.msk.f32.mxu0 %vm6983_vm0, %v6982_v5 }
0x1749   :  { %v3514_v60 = vmul.f32 %v6839_v21, %v6835_v40  ;;  %6052 = vmatprep.subr.mxu0 %v6982_v5 }
0x174b   :  { %6040 = vmatmul.mubr.msk.f32.vlgmr.msra.gmra.mrb[42].mxu1 %vm864_vm2, %v3514_v60  ;;  %6045 = vmatmul.mubr.msk.f32.vlgmr.msra.gmra.mrb[46].mxu0 %vm707_vm1, %v3670_v22 }
0x174c   :  { %6048 = vmatpush3.xpose.msk.msra.mxu1 %vm707_vm1, %v3750_v1  ;;  %6049 = vmatprep.mubr.msk.f32.mxu1 %vm6983_vm0, %v6982_v5 }
0x174d   :  { %6057 = vmatprep.subr.mxu1 %v6982_v5  ;;  %6054 = vmatprep.mubr.msk.f32.mxu0 %vm6983_vm0, %v6982_v5 }
0x174f   :  { %6050 = vmatmul.mubr.msk.f32.vlgmr.msra.gmra.mrb[44].mxu1 %vm707_vm1, %v3748_v23 }
0x1750   :  { %6059 = vmatprep.mubr.msk.f32.mxu1 %vm6983_vm0, %v6982_v5 }
0x181a   :  { %v8136_v24 = vpop.f32.mrb[44].mxu0 }
0x181b   :  { %v6036_v26 = vpop.f32.mrb[45].mxu0 }
0x181e   :  { %v8138_v16 = vpop.f32.mrb[42].mxu1  ;;  %v3743_v28 = vpop.f32.mrb[46].mxu0 }
0x181f   :  { %v6749_v61 = vpack.i.bf16 %v8138_v16, %v8136_v24  ;;  %v3825_v44 = vmul.f32 0.17677669, %v3743_v28  ;;  %v6041_v31 = vpop.f32.mrb[43].mxu1  ;;  %v6046_v32 = vpop.f32.mrb[47].mxu0 }
0x1821   :  { %v3827_v34 = vadd.f32 %v8062_v10, %v3825_v44 }
0x1822   :  { %v3821_v35 = vpop.f32.mrb[44].mxu1 }
0x1823   :  { %v3826_v37 = vmul.f32 0.17677669, %v3821_v35  ;;  %v6051_v41 = vpop.f32.mrb[45].mxu1  ;;  %v3829_v42 = vsel %vm864_vm2, %v3827_v34, -inf }
0x1824   :  { %3830 = vmax.xlane.f32.xlu1 %v3829_v42 }
0x1825   :  { %v3828_v46 = vadd.f32 %v8062_v10, %v3826_v37 }
0x1827   :  { %v3832_v49 = vsel %vm864_vm2, %v3828_v46, -inf }
0x1828   :  { %3833 = vmax.xlane.f32.xlu0 %v3832_v49 }
0x1835   :  { %3851 = vrot.lane.b32.xlu1 %v8051_v2, %s6985_s26 }
0x1839   :  { %4005 = vrot.lane.b32.xlu1 %v8031_v36, %s6986_s2 }
0x183d   :  { %4083 = vrot.lane.b32.xlu1 %v8040_v62, %s6986_s2 }
0x183e   :  { %3927 = vrot.lane.b32.xlu0 %v8037_v45, %s6985_s26 }
0x1841   :  { %4003 = vrot.lane.b32.xlu1 %v8035_v58, %s6986_s2 }
0x18b1   :  { %v3831_v50 = vpop.xlane.xlu1 %3830 }
0x18b2   :  { %v3835_v17 = vsub.f32 %v3827_v34, %v3831_v50 }
0x18b4   :  { %v3837_v12 = vmul.f32 1.442695, %v3835_v17 }
0x18b5   :  { %v3834_v53 = vpop.xlane.xlu0 %3833  ;;  %v3852_v51 = vpop.permute.xlu1 %3851 }
0x18b6   :  { %6840 = vpow2.f32 %v3837_v12  ;;  %v3836_v33 = vsub.f32 %v3828_v46, %v3834_v53  ;;  %6053 = vmatpush3.msra.mxu0 %v3852_v51  ;;  %v4368_v12 = vld [vmem:[#allocation5 + $0x80] sm:$0xff]  ;;  %v4369_v53 = vld [vmem:[#allocation5 + $0x88] sm:$0xff]  ;;  %v4370_v51 = vld [vmem:[#allocation5 + $0x90] sm:$0xff] }
0x18b7   :  { %6062 = vmatprep.subr.mxu0 %v6982_v5 }
0x18b8   :  { %v3839_v36 = vmul.f32 1.442695, %v3836_v33  ;;  %v4371_v33 = vld [vmem:[#allocation5 + $0x98] sm:$0xff] }
0x18b9   :  { %v3928_v38 = vpop.permute.xlu0 %3927  ;;  %v4006_v57 = vpop.permute.xlu1 %4005 }
0x18ba   :  { %6842 = vpow2.f32 %v3839_v36  ;;  %6058 = vmatpush3.msra.mxu1 %v3928_v38  ;;  %v6540_v36 = vpack.c.bf16 %v4371_v33, %v4370_v51  ;;  %v4372_v38 = vld [vmem:[#allocation5 + $0xa0] sm:$0xff]  ;;  %v5328_v51 = vld [vmem:[%s8594_s12 + $0x210] sm:$0xff]  ;;  %v5335_v33 = vld [vmem:[%s8594_s12 + $0x248] sm:$0xff] }
0x18bb   :  { %6067 = vmatprep.subr.mxu1 %v6982_v5 }
0x18bd   :  { %v4084_v25 = vpop.permute.xlu1 %4083 }
0x18c0   :  { %v6841_v62 = vpop.eup %6840 }
0x18c1   :  { %v3841_v52 = vsel %vm864_vm2, %v6841_v62, 0.0 }
0x18c2   :  { %3842 = vadd.xlane.f32.xlu0 %v3841_v52 }
0x18c4   :  { %v6843_v58 = vpop.eup %6842 }
0x18c5   :  { %v3844_v54 = vsel %vm864_vm2, %v6843_v58, 0.0 }
0x18c6   :  { %3845 = vadd.xlane.f32.xlu0 %v3844_v54  ;;  %v4375_v54 = vld [vmem:[#allocation5 + $0xb8] sm:$0xff] }
0x18dc   :  { %4081 = vrot.lane.b32.xlu0 %v8048_v63, %s6986_s2  ;;  %v4004_v63 = vpop.permute.xlu1 %4003 }
0x194f   :  { %v3843_v55 = vpop.xlane.xlu0 %3842 }
0x1950   :  { %6844 = vrcp.f32 %v3843_v55 }
0x1953   :  { %v3846_v56 = vpop.xlane.xlu0 %3845 }
0x1954   :  { %6846 = vrcp.f32 %v3846_v56  ;;  %v4376_v56 = vld [vmem:[#allocation5 + $0xc0] sm:$0xff] }
0x1957   :  { %v4082_v47 = vpop.permute.xlu0 %4081 }
0x195a   :  { %v6845_v43 = vpop.eup %6844 }
0x195b   :  { %v3849_v59 = vmul.f32 %v6845_v43, %v6841_v62  ;;  %v4373_v62 = vld [vmem:[#allocation5 + $0xa8] sm:$0xff] }
0x195c   :  { %v6544_v52 = vpack.c.bf16 %v4373_v62, %v4372_v38  ;;  %v5339_v38 = vld [vmem:[%s8594_s12 + $0x268] sm:$0xff]  ;;  %v5337_v62 = vld [vmem:[%s8594_s12 + $0x258] sm:$0xff] }
0x195d   :  { %6055 = vmatmul.mubr.msk.f32.vlgmr.msra.gmra.mrb[48].mxu0 %vm864_vm2, %v3849_v59  ;;  %v4379_v59 = vld [vmem:[#allocation5 + $0xd8] sm:$0xff] }
0x195e   :  { %v6847_v7 = vpop.eup %6846  ;;  %6063 = vmatpush3.xpose.msk.msra.mxu0 %vm707_vm1, %v4006_v57  ;;  %6064 = vmatprep.mubr.msk.f32.mxu0 %vm6983_vm0, %v6982_v5  ;;  %v4377_v57 = vld [vmem:[#allocation5 + $0xc8] sm:$0xff] }
0x195f   :  { %v3850_v9 = vmul.f32 %v6847_v7, %v6843_v58  ;;  %6072 = vmatprep.subr.mxu0 %v6982_v5  ;;  %v4374_v58 = vld [vmem:[#allocation5 + $0xb0] sm:$0xff]  ;;  %v6552_v43 = vpack.c.bf16 %v4377_v57, %v4376_v56  ;;  %v5338_v56 = vld [vmem:[%s8594_s12 + $0x260] sm:$0xff] }
0x1960   :  { %v6548_v55 = vpack.c.bf16 %v4375_v54, %v4374_v58  ;;  %v6572_v58 = vpack.c.bf16 %v5339_v38, %v5335_v33  ;;  %v5336_v57 = vld [vmem:[%s8594_s12 + $0x250] sm:$0xff]  ;;  %v5371_v38 = vld [vmem:[%s8594_s12 + $0x368] sm:$0xff] }
0x1961   :  { %6060 = vmatmul.mubr.msk.f32.vlgmr.msra.gmra.mrb[46].mxu1 %vm864_vm2, %v3850_v9  ;;  %6065 = vmatmul.mubr.msk.f32.vlgmr.msra.gmra.mrb[50].mxu0 %vm707_vm1, %v4004_v63  ;;  %v4380_v9 = vld [vmem:[#allocation5 + $0xe0] sm:$0xff]  ;;  %v4381_v63 = vld [vmem:[#allocation5 + $0xe8] sm:$0xff] }
0x1962   :  { %6068 = vmatpush3.xpose.msk.msra.mxu1 %vm707_vm1, %v4084_v25  ;;  %6069 = vmatprep.mubr.msk.f32.mxu1 %vm6983_vm0, %v6982_v5  ;;  %v4378_v25 = vld [vmem:[#allocation5 + $0xd0] sm:$0xff] }
0x1963   :  { %6077 = vmatprep.subr.mxu1 %v6982_v5  ;;  %6074 = vmatprep.mubr.msk.f32.mxu0 %vm6983_vm0, %v6982_v5  ;;  %v6556_v7 = vpack.c.bf16 %v4379_v59, %v4378_v25  ;;  %v5340_v25 = vld [vmem:[%s8594_s12 + $0x270] sm:$0xff]  ;;  %v5343_v59 = vld [vmem:[%s8594_s12 + $0x288] sm:$0xff] }
0x1965   :  { %6070 = vmatmul.mubr.msk.f32.vlgmr.msra.gmra.mrb[48].mxu1 %vm707_vm1, %v4082_v47  ;;  %v6560_v47 = vpack.c.bf16 %v4381_v63, %v4380_v9  ;;  %v6606_v9 = vpack.c.bf16 %v5340_v25, %v5336_v57  ;;  %v5372_v25 = vld [vmem:[%s8594_s12 + $0x370] sm:$0xff] }
0x1966   :  { %6079 = vmatprep.mubr.msk.f32.mxu1 %vm6983_vm0, %v6982_v5 }
0x1a30   :  { %v3923_v11 = vpop.f32.mrb[48].mxu0 }
0x1a31   :  { %v6056_v19 = vpop.f32.mrb[49].mxu0 }
0x1a32   :  { %v4383_v19 = vld [vmem:[#allocation5 + $0xf8] sm:$0xff] }
0x1a34   :  { %v3999_v40 = vpop.f32.mrb[46].mxu1  ;;  %v4077_v3 = vpop.f32.mrb[50].mxu0 }
0x1a35   :  { %v6754_v6 = vpack.i.bf16 %v3999_v40, %v3923_v11  ;;  %v4159_v13 = vmul.f32 0.17677669, %v4077_v3  ;;  %v6061_v14 = vpop.f32.mrb[47].mxu1  ;;  %v6066_v15 = vpop.f32.mrb[51].mxu0  ;;  %v4382_v11 = vld [vmem:[#allocation5 + $0xf0] sm:$0xff] }
0x1a36   :  { %v6564_v40 = vpack.c.bf16 %v4383_v19, %v4382_v11  ;;  %v5349_v11 = vld [vmem:[%s8594_s12 + $0x2b8] sm:$0xff]  ;;  %v5342_v19 = vld [vmem:[%s8594_s12 + $0x280] sm:$0xff] }
0x1a37   :  { %v4161_v1 = vadd.f32 %v8062_v10, %v4159_v13 }
0x1a38   :  { %v4155_v18 = vpop.f32.mrb[48].mxu1 }
0x1a39   :  { %v4160_v21 = vmul.f32 0.17677669, %v4155_v18  ;;  %v6071_v60 = vpop.f32.mrb[49].mxu1  ;;  %v4163_v22 = vsel %vm864_vm2, %v4161_v1, -inf }
0x1a3a   :  { %4164 = vmax.xlane.f32.xlu1 %v4163_v22 }
0x1a3b   :  { %v4162_v23 = vadd.f32 %v8062_v10, %v4160_v21 }
0x1a3d   :  { %v4166_v26 = vsel %vm864_vm2, %v4162_v23, -inf }
0x1a3e   :  { %4167 = vmax.xlane.f32.xlu0 %v4166_v26 }
0x1a4b   :  { %4185 = vrot.lane.b32.xlu1 %v8051_v2, %s6986_s2 }
0x1a4f   :  { %6750 = vrot.lane.b32.xlu1 %v6749_v61, %s6986_s2 }
0x1a53   :  { %6755 = vrot.lane.b32.xlu1 %v6754_v6, %s6985_s26 }
0x1ac7   :  { %v4165_v28 = vpop.xlane.xlu1 %4164 }
0x1ac8   :  { %v4169_v44 = vsub.f32 %v4161_v1, %v4165_v28 }
0x1aca   :  { %v4171_v31 = vmul.f32 1.442695, %v4169_v44 }
0x1acb   :  { %v4168_v32 = vpop.xlane.xlu0 %4167  ;;  %v4186_v34 = vpop.permute.xlu1 %4185 }
0x1acc   :  { %6848 = vpow2.f32 %v4171_v31  ;;  %v4170_v10 = vsub.f32 %v4162_v23, %v4168_v32  ;;  %6073 = vmatpush3.msra.mxu0 %v4186_v34 }
0x1ace   :  { %v4173_v35 = vmul.f32 1.442695, %v4170_v10 }
0x1acf   :  { %v6751_v1 = vpop.permute.xlu1 %6750 }
0x1ad0   :  { %6850 = vpow2.f32 %v4173_v35  ;;  %v6753_v21 = vunpack.i.h.bf16 %v6751_v1  ;;  %v6752_v60 = vunpack.i.l.bf16 %v6751_v1 }
0x1ad2   :  { %v4362_v28 = vsel %vm707_vm1, %v8098_v48, %v6753_v21  ;;  %v4361_v32 = vsel %vm707_vm1, %v8096_v39, %v6752_v60  ;;  %v5321_v48 = vld [vmem:[%s8591_s9 + $0x1] ss:$0 sm:$0xff]  ;;  %s6988_s9 = smov [#allocation8]  }
0x1ad3   :  { %v6756_v18 = vpop.permute.xlu1 %6755  ;;  %s5251_s6 = sshll.u32 %s6988_s9, 4  ;;  %s5252_s6 = int_to_ptr.vmem [resolvable:$true] %s5251_s6 }
0x1ad4   :  { %v6758_v22 = vunpack.i.h.bf16 %v6756_v18  ;;  %v6757_v23 = vunpack.i.l.bf16 %v6756_v18  ;;  %s6947_s30 = scalar_lea.vmem %s5252_s6, 32  ;;  %p6952_p11 = scmp.lt.s32.totalorder %s5252_s6, %s5252_s6 }
0x1ad5   :  { %p6948_p10 = scmp.ne.s32.totalorder %s5252_s6, %s6947_s30  ;;  %p6953_p12 = scmp.lt.s32.totalorder %s6947_s30, %s6947_s30 }
0x1ad6   :  { %v6849_v37 = vpop.eup %6848  ;;  %v4363_v34 = vsel %vm2063_vm3, %v4361_v32, %v6757_v23  ;;  %v4364_v10 = vsel %vm2063_vm3, %v4362_v28, %v6758_v22  ;;  %v5353_v32 = vld [vmem:[%s8594_s12 + $0x2d8] sm:$0xff] }
0x1ad7   :  { %v4175_v2 = vsel %vm864_vm2, %v6849_v37, 0.0  ;;  %p6954_p13 = por %p6953_p12, %p6952_p11 }
0x1ad8   :  { %4176 = vadd.xlane.f32.xlu0 %v4175_v2 }
0x1ad9   :  { %p6955_p0 = pnand %p6954_p13, %p6948_p10 }
0x1ada   :  { %v6851_v41 = vpop.eup %6850 }
0x1adb   :  { %v4178_v24 = vsel %vm864_vm2, %v6851_v41, 0.0 }
0x1adc   :  { %4179 = vadd.xlane.f32.xlu0 %v4178_v24 }
0x1af2   :  { %4261 = vrot.lane.b32.xlu0 %v8037_v45, %s6986_s2  ;;  %v6536_v45 = vpack.c.bf16 %v4369_v53, %v4368_v12 }
0x1af4   :  { %6537 = vmatprep.subr.bf16.mxu0 %v6536_v45 }
0x1b65   :  { %v4177_v16 = vpop.xlane.xlu0 %4176 }
0x1b66   :  { %6852 = vrcp.f32 %v4177_v16 }
0x1b69   :  { %v4180_v61 = vpop.xlane.xlu0 %4179 }
0x1b6a   :  { %6854 = vrcp.f32 %v4180_v61 }
0x1b6d   :  { %v4262_v42 = vpop.permute.xlu0 %4261 }
0x1b6e   :  { %6078 = vmatpush3.msra.mxu1 %v4262_v42  ;;  %v5327_v42 = vld [vmem:[%s8594_s12 + $0x208] sm:$0xff] }
0x1b70   :  { %v6853_v46 = vpop.eup %6852 }
0x1b71   :  { %v4183_v49 = vmul.f32 %v6853_v46, %v6849_v37  ;;  %v5331_v46 = vld [vmem:[%s8594_s12 + $0x228] sm:$0xff] }
0x1b73   :  { %6075 = vmatmul.mubr.msk.f32.vlgmr.msra.gmra.mrb[52].mxu0 %vm864_vm2, %v4183_v49  ;;  %v5333_v49 = vld [vmem:[%s8594_s12 + $0x238] sm:$0xff] }
0x1b74   :  { %v6855_v50 = vpop.eup %6854  ;;  %6539 = vmatpush3.bf16.msra.mxu0 %v6536_v45  ;;  %v5332_v45 = vld [vmem:[%s8594_s12 + $0x230] sm:$0xff] }
0x1b75   :  { %v4184_v17 = vmul.f32 %v6855_v50, %v6851_v41  ;;  %6541 = vmatprep.subr.bf16.mxu0 %v6540_v36  ;;  %v5326_v50 = vld [vmem:[%s8594_s12 + $0x200] sm:$0xff] }
0x1b77   :  { %6080 = vmatmul.mubr.msk.f32.vlgmr.msra.gmra.mrb[50].mxu1 %vm864_vm2, %v4184_v17  ;;  %v5330_v17 = vld [vmem:[%s8594_s12 + $0x220] sm:$0xff] }
0x1b78   :  { %4665 = vmatprep.mubr.f32.mxu1 %v6982_v5  ;;  %6543 = vmatpush3.bf16.msra.mxu0 %v6540_v36  ;;  %v6570_v53 = vpack.c.bf16 %v5330_v17, %v5326_v50  ;;  %v6602_v36 = vpack.c.bf16 %v5332_v45, %v5328_v51  ;;  %v5358_v50 = vld [vmem:[%s8594_s12 + $0x300] sm:$0xff]  ;;  %v5360_v51 = vld [vmem:[%s8594_s12 + $0x310] sm:$0xff] }
0x1b79   :  { %6545 = vmatprep.subr.bf16.mxu0 %v6544_v52  ;;  %v5362_v17 = vld [vmem:[%s8594_s12 + $0x320] sm:$0xff]  ;;  %v5364_v45 = vld [vmem:[%s8594_s12 + $0x330] sm:$0xff] }
0x1b7a   :  { %v6618_v33 = vpack.c.bf16 %v5364_v45, %v5360_v51  ;;  %v4845_v45 = vld [vmem:[#allocation7 + $0x288] sm:$0xff] }
0x1b7c   :  { %6547 = vmatpush3.bf16.msra.mxu0 %v6544_v52  ;;  %v5341_v52 = vld [vmem:[%s8594_s12 + $0x278] sm:$0xff] }
0x1b7d   :  { %6549 = vmatprep.subr.bf16.mxu0 %v6548_v55  ;;  %v6604_v54 = vpack.c.bf16 %v5341_v52, %v5337_v62  ;;  %v5369_v62 = vld [vmem:[%s8594_s12 + $0x358] sm:$0xff] }
0x1b80   :  { %6551 = vmatpush3.bf16.msra.mxu0 %v6548_v55  ;;  %v5334_v55 = vld [vmem:[%s8594_s12 + $0x240] sm:$0xff] }
0x1b81   :  { %6553 = vmatprep.subr.bf16.mxu0 %v6552_v43 }
0x1b84   :  { %6555 = vmatpush3.bf16.msra.mxu0 %v6552_v43  ;;  %v6574_v43 = vpack.c.bf16 %v5338_v56, %v5334_v55  ;;  %v5370_v55 = vld [vmem:[%s8594_s12 + $0x360] sm:$0xff] }
0x1b85   :  { %6557 = vmatprep.subr.bf16.mxu0 %v6556_v7 }
0x1b88   :  { %6559 = vmatpush3.bf16.msra.mxu0 %v6556_v7  ;;  %v5347_v7 = vld [vmem:[%s8594_s12 + $0x2a8] sm:$0xff] }
0x1b89   :  { %6561 = vmatprep.subr.bf16.mxu0 %v6560_v47  ;;  %v6576_v63 = vpack.c.bf16 %v5347_v7, %v5343_v59  ;;  %v5375_v59 = vld [vmem:[%s8594_s12 + $0x388] sm:$0xff] }
0x1b8c   :  { %6563 = vmatpush3.bf16.msra.mxu0 %v6560_v47  ;;  %v5345_v47 = vld [vmem:[%s8594_s12 + $0x298] sm:$0xff] }
0x1b8d   :  { %6565 = vmatprep.subr.bf16.mxu0 %v6564_v40 }
0x1b90   :  { %6567 = vmatpush3.bf16.msra.mxu0 %v6564_v40  ;;  %v6608_v40 = vpack.c.bf16 %v5349_v11, %v5345_v47  ;;  %v5381_v47 = vld [vmem:[%s8594_s12 + $0x3b8] sm:$0xff] }
0x1c46   :  { %v4257_v3 = vpop.f32.mrb[52].mxu0 }
0x1c47   :  { %v6076_v6 = vpop.f32.mrb[53].mxu0 }
0x1c48   :  { %v5344_v6 = vld [vmem:[%s8594_s12 + $0x290] sm:$0xff] }
0x1c4a   :  { %v4333_v13 = vpop.f32.mrb[50].mxu1 }
0x1c4b   :  { %v6759_v14 = vpack.i.bf16 %v4333_v13, %v4257_v3  ;;  %v6081_v15 = vpop.f32.mrb[51].mxu1  ;;  %v5346_v3 = vld [vmem:[%s8594_s12 + $0x2a0] sm:$0xff]  ;;  %v5348_v13 = vld [vmem:[%s8594_s12 + $0x2b0] sm:$0xff] }
0x1c4c   :  { %v6610_v15 = vpack.c.bf16 %v5348_v13, %v5344_v6  ;;  %v5376_v6 = vld [vmem:[%s8594_s12 + $0x390] sm:$0xff] }
0x1c4d   :  { %6760 = vrot.lane.b32.xlu1 %v6759_v14, %s6984_s28  ;;  %v6578_v14 = vpack.c.bf16 %v5346_v3, %v5342_v19  ;;  %v5378_v3 = vld [vmem:[%s8594_s12 + $0x3a0] sm:$0xff] }
0x1cbf   :  { %v6761_v26 = vpop.permute.xlu1 %6760 }
0x1cc0   :  { %v6763_v44 = vunpack.i.h.bf16 %v6761_v26  ;;  %v6762_v31 = vunpack.i.l.bf16 %v6761_v26 }
0x1cc2   :  { %v4365_v35 = vsel %vm2066_vm4, %v4363_v34, %v6762_v31  ;;  %v4366_v37 = vsel %vm2066_vm4, %v4364_v10, %v6763_v44  ;;  %v5351_v44 = vld [vmem:[%s8594_s12 + $0x2c8] sm:$0xff]  ;;  %v5357_v10 = vld [vmem:[%s8594_s12 + $0x2f8] sm:$0xff] }
0x1cc3   :  { %6114 = vmatprep.mubr.f32.mxu0 %v4365_v35  ;;  %v5355_v31 = vld [vmem:[%s8594_s12 + $0x2e8] sm:$0xff]  ;;  %v5350_v35 = vld [vmem:[%s8594_s12 + $0x2c0] sm:$0xff] }
0x1cc4   :  { %6115 = vmatmul.mubr.f32.vlgmr.msra.gmra.mrb[54].mxu0 %v4366_v37  ;;  %v6580_v34 = vpack.c.bf16 %v5355_v31, %v5351_v44  ;;  %v5354_v37 = vld [vmem:[%s8594_s12 + $0x2e0] sm:$0xff] }
0x1cc5   :  { %4742 = vmatprep.mubr.f32.mxu0 %v6982_v5  ;;  %v5386_v31 = vld [vmem:[%s8594_s12 + $0x3e0] sm:$0xff] }
0x1d97   :  { %v6116_v2 = vpop.f32.mrb[54].mxu0 }
0x1d98   :  { %v4460_v41 = vadd.f32 %v6116_v2, %v7997_v4  ;;  %v4450_v39 = vpop.f32.mrb[55].mxu0  ;;  %v6568_v4 = vpack.c.bf16 %v5331_v46, %v5327_v42  ;;  %v6612_v2 = vpack.c.bf16 %v5357_v10, %v5353_v32  ;;  %v5359_v42 = vld [vmem:[%s8594_s12 + $0x308] sm:$0xff]  ;;  %v5384_v32 = vld [vmem:[%s8594_s12 + $0x3d0] sm:$0xff] }
0x1d99   :  { %v4459_v24 = vadd.f32 %v4450_v39, %v7993_v0  ;;  %v5329_v0 = vld [vmem:[%s8594_s12 + $0x218] sm:$0xff]  ;;  %v5356_v39 = vld [vmem:[%s8594_s12 + $0x2f0] sm:$0xff]  ;;  %v5363_v46 = vld [vmem:[%s8594_s12 + $0x328] sm:$0xff] }
0x1d9a   :  { %v8211_v16 = vadd.f32 %v5321_v48, %v4460_v41  ;;  %v6600_v12 = vpack.c.bf16 %v5333_v49, %v5329_v0  ;;  %6569 = vmatprep.subr.bf16.mxu1 %v6568_v4  ;;  %v5352_v41 = vld [vmem:[%s8594_s12 + $0x2d0] sm:$0xff]  ;;  %v5361_v0 = vld [vmem:[%s8594_s12 + $0x318] sm:$0xff]  ;;  %v6584_v4 = vpack.c.bf16 %v5363_v46, %v5359_v42  ;;  %v5324_v46 = vld [vmem:[%s8592_s10 + $0x1] ss:$0 sm:$0xff] }
0x1d9b   :  { %v8213_v61 = vadd.f32 %v5321_v48, %v4459_v24  ;;  %6571 = vmatpush1.bf16.msra.mxu1 %v6570_v53  ;;  %v6582_v48 = vpack.c.bf16 %v5354_v37, %v5350_v35  ;;  %v6614_v24 = vpack.c.bf16 %v5356_v39, %v5352_v41  ;;  %v5365_v49 = vld [vmem:[%s8594_s12 + $0x338] sm:$0xff]  ;;  %v6586_v53 = vpack.c.bf16 %v5362_v17, %v5358_v50 }
0x1d9c   :  { %4477 = vadd.xlane.f32.xlu1 %v8211_v16  ;;  %6601 = vmatprep.subr.bf16.mxu0 %v6600_v12  ;;  %v6616_v12 = vpack.c.bf16 %v5365_v49, %v5361_v0 }
0x1d9d   :  { %4475 = vadd.xlane.f32.xlu0 %v8213_v61  ;;  %6603 = vmatpush1.bf16.msra.mxu0 %v6602_v36  ;;  %v5367_v36 = vld [vmem:[%s8594_s12 + $0x348] sm:$0xff] }
0x1d9e   :  { %6573 = vmatprep.subr.bf16.mxu1 %v6572_v58  ;;  %6605 = vmatprep.subr.bf16.mxu0 %v6604_v54  ;;  %v6588_v52 = vpack.c.bf16 %v5371_v38, %v5367_v36  ;;  %v5373_v58 = vld [vmem:[%s8594_s12 + $0x378] sm:$0xff]  ;;  %v5366_v54 = vld [vmem:[%s8594_s12 + $0x340] sm:$0xff]  ;;  %v4877_v38 = vld [vmem:[#allocation7 + $0x388] sm:$0xff] }
0x1d9f   :  { %6575 = vmatpush1.bf16.msra.mxu1 %v6574_v43  ;;  %v6620_v56 = vpack.c.bf16 %v5373_v58, %v5369_v62  ;;  %v6590_v57 = vpack.c.bf16 %v5370_v55, %v5366_v54  ;;  %v5368_v43 = vld [vmem:[%s8594_s12 + $0x350] sm:$0xff]  ;;  %v4828_v62 = vld [vmem:[#allocation7 + $0x200] sm:$0xff]  ;;  %v4861_v55 = vld [vmem:[#allocation7 + $0x308] sm:$0xff] }
0x1da0   :  { %6577 = vmatprep.subr.bf16.mxu1 %v6576_v63  ;;  %v6622_v7 = vpack.c.bf16 %v5372_v25, %v5368_v43  ;;  %v5377_v63 = vld [vmem:[%s8594_s12 + $0x398] sm:$0xff]  ;;  %v4878_v25 = vld [vmem:[#allocation7 + $0x390] sm:$0xff] }
0x1da1   :  { %6607 = vmatpush1.bf16.msra.mxu0 %v6606_v9  ;;  %v5379_v9 = vld [vmem:[%s8594_s12 + $0x3a8] sm:$0xff]  ;;  %v6624_v19 = vpack.c.bf16 %v5381_v47, %v5377_v63  ;;  %v4847_v43 = vld [vmem:[#allocation7 + $0x298] sm:$0xff] }
0x1da2   :  { %6609 = vmatprep.subr.bf16.mxu0 %v6608_v40  ;;  %v6592_v11 = vpack.c.bf16 %v5379_v9, %v5375_v59  ;;  %v5374_v40 = vld [vmem:[%s8594_s12 + $0x380] sm:$0xff]  ;;  %v4830_v9 = vld [vmem:[#allocation7 + $0x210] sm:$0xff]  ;;  %v4831_v63 = vld [vmem:[#allocation7 + $0x218] sm:$0xff] }
0x1da3   :  { %6579 = vmatpush1.bf16.msra.mxu1 %v6578_v14  ;;  %v6594_v13 = vpack.c.bf16 %v5378_v3, %v5374_v40  ;;  %v5380_v14 = vld [vmem:[%s8594_s12 + $0x3b0] sm:$0xff]  ;;  %v4863_v40 = vld [vmem:[#allocation7 + $0x318] sm:$0xff] }
0x1da4   :  { %6581 = vmatprep.subr.bf16.mxu1 %v6580_v34  ;;  %v5388_v34 = vld [vmem:[%s8594_s12 + $0x3f0] sm:$0xff] }
0x1da5   :  { %6611 = vmatpush1.bf16.msra.mxu0 %v6610_v15  ;;  %v5383_v15 = vld [vmem:[%s8594_s12 + $0x3c8] sm:$0xff]  ;;  %v6630_v35 = vpack.c.bf16 %v5388_v34, %v5384_v32  ;;  %v4850_v32 = vld [vmem:[#allocation7 + $0x2b0] sm:$0xff]  ;;  %v4851_v34 = vld [vmem:[#allocation7 + $0x2b8] sm:$0xff] }
0x1da6   :  { %6613 = vmatprep.subr.bf16.mxu0 %v6612_v2 }
0x1da7   :  { %6583 = vmatpush1.bf16.msra.mxu1 %v6582_v48 }
0x1da8   :  { %6585 = vmatprep.subr.bf16.mxu1 %v6584_v4  ;;  %v5325_v4 = vld [vmem:[%s8593_s11 + $0x1] ss:$0 sm:$0xff] }
0x1da9   :  { %6615 = vmatpush1.bf16.msra.mxu0 %v6614_v24 }
0x1daa   :  { %6617 = vmatprep.subr.bf16.mxu0 %v6616_v12 }
0x1dab   :  { %6587 = vmatpush1.bf16.msra.mxu1 %v6586_v53 }
0x1dac   :  { %6589 = vmatprep.subr.bf16.mxu1 %v6588_v52  ;;  %v4829_v52 = vld [vmem:[#allocation7 + $0x208] sm:$0xff] }
0x1dad   :  { %6619 = vmatpush1.bf16.msra.mxu0 %v6618_v33  ;;  %v4876_v33 = vld [vmem:[#allocation7 + $0x380] sm:$0xff]  ;;  %v6634_v54 = vpack.c.bf16 %v4829_v52, %v4828_v62  ;;  %v4855_v62 = vld [vmem:[#allocation7 + $0x2d8] sm:$0xff]  ;;  %v4886_v52 = vld [vmem:[#allocation7 + $0x3d0] sm:$0xff] }
0x1dae   :  { %6621 = vmatprep.subr.bf16.mxu0 %v6620_v56  ;;  %v6664_v58 = vpack.c.bf16 %v4877_v38, %v4876_v33  ;;  %v4869_v33 = vld [vmem:[#allocation7 + $0x348] sm:$0xff]  ;;  %v4854_v38 = vld [vmem:[#allocation7 + $0x2d0] sm:$0xff] }
0x1daf   :  { %6591 = vmatpush1.bf16.msra.mxu1 %v6590_v57  ;;  %v4846_v57 = vld [vmem:[#allocation7 + $0x290] sm:$0xff] }
0x1db0   :  { %6593 = vmatprep.subr.bf16.mxu1 %v6592_v11  ;;  %v6636_v59 = vpack.c.bf16 %v4847_v43, %v4846_v57  ;;  %v6638_v11 = vpack.c.bf16 %v4831_v63, %v4830_v9  ;;  %v4870_v43 = vld [vmem:[#allocation7 + $0x350] sm:$0xff]  ;;  %v4857_v9 = vld [vmem:[#allocation7 + $0x2e8] sm:$0xff]  ;;  %v4888_v63 = vld [vmem:[#allocation7 + $0x3e0] sm:$0xff] }
0x1db1   :  { %6623 = vmatpush1.bf16.msra.mxu0 %v6622_v7  ;;  %v4879_v7 = vld [vmem:[#allocation7 + $0x398] sm:$0xff] }
0x1db2   :  { %6625 = vmatprep.subr.bf16.mxu0 %v6624_v19  ;;  %v6668_v47 = vpack.c.bf16 %v4879_v7, %v4878_v25  ;;  %v4862_v19 = vld [vmem:[#allocation7 + $0x310] sm:$0xff]  ;;  %v4871_v25 = vld [vmem:[#allocation7 + $0x358] sm:$0xff]  ;;  %v4856_v7 = vld [vmem:[#allocation7 + $0x2e0] sm:$0xff] }
0x1db3   :  { %6595 = vmatpush1.bf16.msra.mxu1 %v6594_v13  ;;  %v6670_v3 = vpack.c.bf16 %v4863_v40, %v4862_v19  ;;  %v4849_v13 = vld [vmem:[#allocation7 + $0x2a8] sm:$0xff]  ;;  %v4840_v19 = vld [vmem:[#allocation7 + $0x260] sm:$0xff] }
0x1db4   :  { %v4841_v40 = vld [vmem:[#allocation7 + $0x268] sm:$0xff] }
0x1e29   :  { %v4478_v1 = vpop.xlane.xlu1 %4477 }
0x1e2a   :  { %v4476_v18 = vpop.xlane.xlu0 %4475  ;;  %v4480_v21 = vmul.f32 0.0078125, %v4478_v1  ;;  %v5387_v1 = vld [vmem:[%s8594_s12 + $0x3e8] sm:$0xff] }
0x1e2b   :  { %v4479_v60 = vmul.f32 0.0078125, %v4476_v18  ;;  %v6626_v18 = vpack.c.bf16 %v5380_v14, %v5376_v6  ;;  %v4848_v6 = vld [vmem:[#allocation7 + $0x2a0] sm:$0xff] }
0x1e2c   :  { %v8293_v23 = vsub.f32 %v8211_v16, %v4480_v21  ;;  %v6596_v21 = vpack.c.bf16 %v5387_v1, %v5383_v15  ;;  %v4880_v14 = vld [vmem:[#allocation7 + $0x3a0] sm:$0xff]  ;;  %v6640_v15 = vpack.c.bf16 %v4849_v13, %v4848_v6  ;;  %v4881_v1 = vld [vmem:[#allocation7 + $0x3a8] sm:$0xff]  ;;  %v6658_v6 = vpack.c.bf16 %v4841_v40, %v4840_v19 }
0x1e2d   :  { %v8290_v22 = vsub.f32 %v8213_v61, %v4479_v60  ;;  %v5385_v60 = vld [vmem:[%s8594_s12 + $0x3d8] sm:$0xff]  ;;  %6627 = vmatpush1.bf16.msra.mxu0 %v6626_v18  ;;  %v4832_v18 = vld [vmem:[#allocation7 + $0x220] sm:$0xff] }
0x1e2e   :  { %v4484_v28 = vmul.f32 %v8293_v23, %v8293_v23  ;;  %6597 = vmatprep.subr.bf16.mxu1 %v6596_v21  ;;  %v4833_v21 = vld [vmem:[#allocation7 + $0x228] sm:$0xff]  ;;  %v4872_v13 = vld [vmem:[#allocation7 + $0x360] sm:$0xff] }
0x1e2f   :  { %v4483_v26 = vmul.f32 %v8290_v22, %v8290_v22 }
0x1e31   :  { %4485 = vadd.xlane.f32.xlu0 %v4483_v26  ;;  %v5389_v26 = vld [vmem:[%s8594_s12 + $0x3f8] sm:$0xff] }
0x1e32   :  { %v6628_v44 = vpack.c.bf16 %v5389_v26, %v5385_v60  ;;  %v6672_v60 = vpack.c.bf16 %v4881_v1, %v4880_v14  ;;  %v6642_v26 = vpack.c.bf16 %v4833_v21, %v4832_v18  ;;  %v4873_v14 = vld [vmem:[#allocation7 + $0x368] sm:$0xff]  ;;  %v4858_v1 = vld [vmem:[#allocation7 + $0x2f0] sm:$0xff]  ;;  %v4859_v18 = vld [vmem:[#allocation7 + $0x2f8] sm:$0xff] }
0x1e33   :  { %v4890_v21 = vld [vmem:[#allocation7 + $0x3f0] sm:$0xff] }
0x1e34   :  { %6629 = vmatprep.subr.bf16.mxu0 %v6628_v44  ;;  %v4865_v44 = vld [vmem:[#allocation7 + $0x328] sm:$0xff] }
0x1e35   :  { %4487 = vadd.xlane.f32.xlu0 %v4484_v28  ;;  %v5382_v28 = vld [vmem:[%s8594_s12 + $0x3c0] sm:$0xff]  ;;  %6631 = vmatpush1.bf16.msra.mxu0 %v6630_v35  ;;  %v6644_v35 = vpack.c.bf16 %v4851_v34, %v4850_v32  ;;  %v4874_v34 = vld [vmem:[#allocation7 + $0x370] sm:$0xff] }
0x1e36   :  { %v6598_v10 = vpack.c.bf16 %v5386_v31, %v5382_v28  ;;  %6665 = vmatprep.subr.bf16.mxu0 %v6664_v58  ;;  %v4864_v28 = vld [vmem:[#allocation7 + $0x320] sm:$0xff]  ;;  %v6652_v58 = vpack.c.bf16 %v4855_v62, %v4854_v38 }
0x1e37   :  { %v6674_v31 = vpack.c.bf16 %v4865_v44, %v4864_v28  ;;  %v4842_v28 = vld [vmem:[#allocation7 + $0x270] sm:$0xff]  ;;  %v4843_v44 = vld [vmem:[#allocation7 + $0x278] sm:$0xff] }
0x1e38   :  { %6599 = vmatpush1.bf16.msra.mxu1 %v6598_v10  ;;  %v4882_v10 = vld [vmem:[#allocation7 + $0x3b0] sm:$0xff]  ;;  %v6662_v32 = vpack.c.bf16 %v4843_v44, %v4842_v28 }
0x1ebe   :  { %v4486_v37 = vpop.xlane.xlu0 %4485 }
0x1ebf   :  { %v4489_v2 = vmul.f32 0.0078125, %v4486_v37  ;;  %v4883_v37 = vld [vmem:[#allocation7 + $0x3b8] sm:$0xff] }
0x1ec1   :  { %v4491_v48 = vadd.f32 1e-12, %v4489_v2  ;;  %v4834_v2 = vld [vmem:[#allocation7 + $0x230] sm:$0xff] }
0x1ec2   :  { %v4488_v41 = vpop.xlane.xlu0 %4487 }
0x1ec3   :  { %6856 = vrsqrt.f32 %v4491_v48  ;;  %v4490_v39 = vmul.f32 0.0078125, %v4488_v41  ;;  %v4835_v48 = vld [vmem:[#allocation7 + $0x238] sm:$0xff]  ;;  %v6676_v41 = vpack.c.bf16 %v4883_v37, %v4882_v10  ;;  %v5390_v37 = vld [vmem:[%s8595_s13 + $0x4] sm:$0xf] }
0x1ec4   :  { %v4875_v10 = vld [vmem:[#allocation7 + $0x378] sm:$0xff] }
0x1ec5   :  { %v4492_v24 = vadd.f32 1e-12, %v4490_v39  ;;  %v6646_v39 = vpack.c.bf16 %v4835_v48, %v4834_v2  ;;  %v4584_v2 = vrot.slane %v5390_v37, %v7517_v29  ;;  %v4592_v48 = vrot.slane %v5390_v37, %v7520_v30 }
0x1ec7   :  { %6858 = vrsqrt.f32 %v4492_v24  ;;  %v4866_v24 = vld [vmem:[#allocation7 + $0x330] sm:$0xff] }
0x1ecd   :  { %v6857_v42 = vpop.eup %6856 }
0x1ece   :  { %v4495_v0 = vmul.f32 %v6857_v42, %v8290_v22  ;;  %v4844_v22 = vld [vmem:[#allocation7 + $0x280] sm:$0xff]  ;;  %v4867_v42 = vld [vmem:[#allocation7 + $0x338] sm:$0xff] }
0x1ecf   :  { %v6632_v36 = vpack.c.bf16 %v4845_v45, %v4844_v22  ;;  %v4868_v45 = vld [vmem:[#allocation7 + $0x340] sm:$0xff] }
0x1ed0   :  { %v4503_v49 = vmul.f32 %v5324_v46, %v4495_v0  ;;  %v4852_v0 = vld [vmem:[#allocation7 + $0x2c0] sm:$0xff] }
0x1ed1   :  { %v6859_v50 = vpop.eup %6858  ;;  %6633 = vmatprep.subr.bf16.mxu1 %v6632_v36  ;;  %v6682_v36 = vpack.c.bf16 %v4869_v33, %v4868_v45 }
0x1ed2   :  { %v4511_v17 = vadd.f32 %v5325_v4, %v4503_v49  ;;  %v4496_v12 = vmul.f32 %v6859_v50, %v8293_v23  ;;  %v4860_v23 = vld [vmem:[#allocation7 + $0x300] sm:$0xff] }
0x1ed3   :  { %v6666_v56 = vpack.c.bf16 %v4861_v55, %v4860_v23  ;;  %v4884_v49 = vld [vmem:[#allocation7 + $0x3c0] sm:$0xff]  ;;  %v4838_v23 = vld [vmem:[#allocation7 + $0x250] sm:$0xff]  ;;  %v4839_v55 = vld [vmem:[#allocation7 + $0x258] sm:$0xff] }
0x1ed4   :  { %4666 = vmatmul.mubr.f32.vlgmr.msra.gmra.mrb[52].mxu1 %v4511_v17  ;;  %4743 = vmatmul.mubr.f32.vlgmr.msra.gmra.mrb[56].mxu0 %v4511_v17  ;;  %v4504_v53 = vmul.f32 %v5324_v46, %v4496_v12  ;;  %v6678_v46 = vpack.c.bf16 %v4867_v42, %v4866_v24  ;;  %v4885_v17 = vld [vmem:[#allocation7 + $0x3c8] sm:$0xff]  ;;  %v4836_v12 = vld [vmem:[#allocation7 + $0x240] sm:$0xff]  ;;  %v6654_v57 = vpack.c.bf16 %v4839_v55, %v4838_v23 }
0x1ed5   :  { %4671 = vmatprep.mubr.f32.mxu1 %v6982_v5  ;;  %4748 = vmatprep.mubr.f32.mxu0 %v6982_v5 }
0x1ed6   :  { %v4512_v51 = vadd.f32 %v5325_v4, %v4504_v53  ;;  %6635 = vmatpush3.bf16.msra.mxu1 %v6634_v54  ;;  %6667 = vmatpush3.bf16.msra.mxu0 %v6666_v56  ;;  %v4853_v4 = vld [vmem:[#allocation7 + $0x2c8] sm:$0xff]  ;;  %v4887_v54 = vld [vmem:[#allocation7 + $0x3d8] sm:$0xff] }
0x1ed7   :  { %6637 = vmatprep.subr.bf16.mxu1 %v6636_v59  ;;  %6669 = vmatprep.subr.bf16.mxu0 %v6668_v47  ;;  %v6648_v50 = vpack.c.bf16 %v4853_v4, %v4852_v0  ;;  %v4837_v53 = vld [vmem:[#allocation7 + $0x248] sm:$0xff]  ;;  %v6684_v56 = vpack.c.bf16 %v4887_v54, %v4886_v52  ;;  %v6686_v59 = vpack.c.bf16 %v4871_v25, %v4870_v43 }
0x1ed8   :  { %4672 = vmatmul.mubr.f32.gmra.mrb[54].mxu1 %v4512_v51  ;;  %4749 = vmatmul.mubr.f32.gmra.mrb[58].mxu0 %v4512_v51  ;;  %v6680_v51 = vpack.c.bf16 %v4885_v17, %v4884_v49  ;;  %v6650_v22 = vpack.c.bf16 %v4837_v53, %v4836_v12  ;;  %v6656_v47 = vpack.c.bf16 %v4857_v9, %v4856_v7 }
0x1eda   :  { %6639 = vmatpush3.bf16.msra.mxu1 %v6638_v11  ;;  %6671 = vmatpush3.bf16.msra.mxu0 %v6670_v3  ;;  %v4889_v11 = vld [vmem:[#allocation7 + $0x3e8] sm:$0xff] }
0x1edb   :  { %6641 = vmatprep.subr.bf16.mxu1 %v6640_v15  ;;  %6673 = vmatprep.subr.bf16.mxu0 %v6672_v60  ;;  %v6688_v3 = vpack.c.bf16 %v4889_v11, %v4888_v63  ;;  %v6690_v15 = vpack.c.bf16 %v4873_v14, %v4872_v13  ;;  %v6660_v60 = vpack.c.bf16 %v4859_v18, %v4858_v1 }
0x1ede   :  { %6643 = vmatpush3.bf16.msra.mxu1 %v6642_v26  ;;  %6675 = vmatpush3.bf16.msra.mxu0 %v6674_v31  ;;  %v4891_v26 = vld [vmem:[#allocation7 + $0x3f8] sm:$0xff] }
0x1edf   :  { %6645 = vmatprep.subr.bf16.mxu1 %v6644_v35  ;;  %6677 = vmatprep.subr.bf16.mxu0 %v6676_v41  ;;  %v6692_v31 = vpack.c.bf16 %v4891_v26, %v4890_v21  ;;  %v6694_v35 = vpack.c.bf16 %v4875_v10, %v4874_v34  ;;  %v4588_v41 = vrot.slane %v5390_v37, %v7511_v20 }
0x1ee2   :  { %6647 = vmatpush3.bf16.msra.mxu1 %v6646_v39  ;;  %6679 = vmatpush3.bf16.msra.mxu0 %v6678_v46  ;;  %v4596_v39 = vrot.slane %v5390_v37, %v2291_v8 }
0x1ee3   :  { %6649 = vmatprep.subr.bf16.mxu1 %v6648_v50  ;;  %6681 = vmatprep.subr.bf16.mxu0 %v6680_v51 }
0x1ee6   :  { %6651 = vmatpush3.bf16.msra.mxu1 %v6650_v22  ;;  %6683 = vmatpush3.bf16.msra.mxu0 %v6682_v36 }
0x1ee7   :  { %6653 = vmatprep.subr.bf16.mxu1 %v6652_v58  ;;  %6685 = vmatprep.subr.bf16.mxu0 %v6684_v56 }
0x1eea   :  { %6655 = vmatpush3.bf16.msra.mxu1 %v6654_v57  ;;  %6687 = vmatpush3.bf16.msra.mxu0 %v6686_v59 }
0x1eeb   :  { %6657 = vmatprep.subr.bf16.mxu1 %v6656_v47  ;;  %6689 = vmatprep.subr.bf16.mxu0 %v6688_v3 }
0x1eee   :  { %6659 = vmatpush3.bf16.msra.mxu1 %v6658_v6  ;;  %6691 = vmatpush3.bf16.msra.mxu0 %v6690_v15 }
0x1eef   :  { %6661 = vmatprep.subr.bf16.mxu1 %v6660_v60  ;;  %6693 = vmatprep.subr.bf16.mxu0 %v6692_v31 }
0x1ef2   :  { %6663 = vmatpush3.bf16.msra.mxu1 %v6662_v32  ;;  %6695 = vmatpush3.bf16.msra.mxu0 %v6694_v35 }
0x1fa7   :  { %v4667_v24 = vpop.f32.mrb[52].mxu1  ;;  %v4744_v42 = vpop.f32.mrb[56].mxu0 }
0x1fa8   :  { %v8437_v46 = vadd.f32 %v4667_v24, %v4584_v2  ;;  %v8439_v0 = vadd.f32 %v4744_v42, %v4592_v48  ;;  %v4669_v4 = vpop.f32.mrb[53].mxu1  ;;  %v4746_v49 = vpop.f32.mrb[57].mxu0 }
0x1fa9   :  { %v8441_v50 = vadd.f32 %v4669_v4, %v4588_v41  ;;  %v8443_v17 = vadd.f32 %v4746_v49, %v4596_v39 }
0x1faa   :  { %v4755_v29 = vmul.f32 %v8437_v46, %v8437_v46  ;;  %v4757_v20 = vmul.f32 %v8439_v0, %v8439_v0 }
0x1fab   :  { %v4756_v27 = vmul.f32 %v8441_v50, %v8441_v50  ;;  %v4758_v30 = vmul.f32 %v8443_v17, %v8443_v17  ;;  %v4673_v8 = vpop.f32.mrb[54].mxu1  ;;  %v4750_v12 = vpop.f32.mrb[58].mxu0 }
0x1fac   :  { %v4763_v53 = vmul.f32 %v4755_v29, %v8437_v46  ;;  %v4765_v51 = vmul.f32 %v4757_v20, %v8439_v0  ;;  %v8455_v22 = vadd.f32 %v4673_v8, %v4584_v2  ;;  %v8457_v45 = vadd.f32 %v4750_v12, %v4592_v48  ;;  %v4675_v33 = vpop.f32.mrb[55].mxu1  ;;  %v4752_v36 = vpop.f32.mrb[59].mxu0 }
0x1fad   :  { %v4764_v38 = vmul.f32 %v4756_v27, %v8441_v50  ;;  %v4766_v62 = vmul.f32 %v4758_v30, %v8443_v17  ;;  %v8461_v52 = vadd.f32 %v4675_v33, %v4588_v41  ;;  %v8463_v58 = vadd.f32 %v4752_v36, %v4596_v39 }
0x1fae   :  { %v4771_v54 = vmul.f32 0.044715, %v4763_v53  ;;  %v4773_v23 = vmul.f32 0.044715, %v4765_v51  ;;  %v4759_v55 = vmul.f32 %v8455_v22, %v8455_v22  ;;  %v4761_v56 = vmul.f32 %v8457_v45, %v8457_v45 }
0x1faf   :  { %v4772_v57 = vmul.f32 0.044715, %v4764_v38  ;;  %v4774_v43 = vmul.f32 0.044715, %v4766_v62  ;;  %v4760_v25 = vmul.f32 %v8461_v52, %v8461_v52  ;;  %v4762_v59 = vmul.f32 %v8463_v58, %v8463_v58 }
0x1fb0   :  { %v4779_v7 = vadd.f32 %v4771_v54, %v8437_v46  ;;  %v4781_v9 = vadd.f32 %v4773_v23, %v8439_v0  ;;  %v4767_v63 = vmul.f32 %v4759_v55, %v8455_v22  ;;  %v4769_v47 = vmul.f32 %v4761_v56, %v8457_v45 }
0x1fb1   :  { %v4780_v11 = vadd.f32 %v4772_v57, %v8441_v50  ;;  %v4782_v19 = vadd.f32 %v4774_v43, %v8443_v17  ;;  %v4768_v40 = vmul.f32 %v4760_v25, %v8461_v52  ;;  %v4770_v3 = vmul.f32 %v4762_v59, %v8463_v58 }
0x1fb2   :  { %v4787_v6 = vmul.f32 0.7978846, %v4779_v7  ;;  %v4789_v13 = vmul.f32 0.7978846, %v4781_v9  ;;  %v4775_v14 = vmul.f32 0.044715, %v4767_v63 }
0x1fb3   :  { %v4788_v15 = vmul.f32 0.7978846, %v4780_v11  ;;  %v4790_v1 = vmul.f32 0.7978846, %v4782_v19  ;;  %v4777_v18 = vmul.f32 0.044715, %v4769_v47 }
0x1fb4   :  { %6860 = vtanh.f32 %v4787_v6  ;;  %v4783_v21 = vadd.f32 %v4775_v14, %v8455_v22  ;;  %v4776_v60 = vmul.f32 0.044715, %v4768_v40  ;;  %v4778_v26 = vmul.f32 0.044715, %v4770_v3 }
0x1fb5   :  { %6862 = vtanh.f32 %v4789_v13  ;;  %v4785_v28 = vadd.f32 %v4777_v18, %v8457_v45 }
0x1fb6   :  { %v4791_v44 = vmul.f32 0.7978846, %v4783_v21  ;;  %v4784_v31 = vadd.f32 %v4776_v60, %v8461_v52  ;;  %v4786_v32 = vadd.f32 %v4778_v26, %v8463_v58  ;;  %6864 = vtanh.f32 %v4788_v15  ;;  %v5110_v26 = vld [vmem:[%s8600_s18 + $0x10] sm:$0xff] }
0x1fb7   :  { %v4793_v34 = vmul.f32 0.7978846, %v4785_v28  ;;  %6866 = vtanh.f32 %v4790_v1  ;;  %v6987_v28 = vmov 0.0|0.0  }
0x1fb8   :  { %v4792_v10 = vmul.f32 0.7978846, %v4784_v31  ;;  %v4794_v35 = vmul.f32 0.7978846, %v4786_v32  ;;  %6868 = vtanh.f32 %v4791_v44  ;;  %6696 = vmatprep.subr.bf16.mxu1 %v6987_v28  ;;  %v5111_v31 = vld [vmem:[%s8600_s18 + $0x18] sm:$0xff] }
0x1fb9   :  { %6870 = vtanh.f32 %v4793_v34  ;;  %v6700_v32 = vpack.c.bf16 %v5111_v31, %v5110_v26 }
0x1fba   :  { %6872 = vtanh.f32 %v4792_v10 }
0x1fbb   :  { %6874 = vtanh.f32 %v4794_v35 }
0x1fbe   :  { %v6861_v37 = vpop.eup %6860 }
0x1fbf   :  { %v6863_v2 = vpop.eup %6862  ;;  %v4803_v48 = vadd.f32 1.0, %v6861_v37 }
0x1fc0   :  { %v6865_v41 = vpop.eup %6864  ;;  %v4805_v39 = vadd.f32 1.0, %v6863_v2 }
0x1fc1   :  { %v6867_v24 = vpop.eup %6866  ;;  %v4804_v42 = vadd.f32 1.0, %v6865_v41  ;;  %v4811_v49 = vmul.f32 0.5, %v4803_v48 }
0x1fc2   :  { %v6869_v4 = vpop.eup %6868  ;;  %v4806_v29 = vadd.f32 1.0, %v6867_v24  ;;  %v4813_v27 = vmul.f32 0.5, %v4805_v39 }
0x1fc3   :  { %v6871_v20 = vpop.eup %6870  ;;  %v4812_v30 = vmul.f32 0.5, %v4804_v42  ;;  %v4807_v8 = vadd.f32 1.0, %v6869_v4  ;;  %v4819_v62 = vmul.f32 %v4811_v49, %v8437_v46  ;;  %v5112_v4 = vld [vmem:[%s8600_s18 + $0x20] sm:$0xff]  ;;  %v5113_v49 = vld [vmem:[%s8600_s18 + $0x28] sm:$0xff] }
0x1fc4   :  { %v6873_v12 = vpop.eup %6872  ;;  %v4814_v53 = vmul.f32 0.5, %v4806_v29  ;;  %v4809_v51 = vadd.f32 1.0, %v6871_v20  ;;  %v4821_v56 = vmul.f32 %v4813_v27, %v8439_v0  ;;  %v6703_v29 = vpack.c.bf16 %v5113_v49, %v5112_v4  ;;  %v5114_v20 = vld [vmem:[%s8600_s18 + $0x30] sm:$0xff]  ;;  %v5115_v27 = vld [vmem:[%s8600_s18 + $0x38] sm:$0xff] }
0x1fc5   :  { %v6875_v33 = vpop.eup %6874  ;;  %v4820_v36 = vmul.f32 %v4812_v30, %v8441_v50  ;;  %v4808_v38 = vadd.f32 1.0, %v6873_v12  ;;  %v4815_v55 = vmul.f32 0.5, %v4807_v8  ;;  %v6706_v30 = vpack.c.bf16 %v5115_v27, %v5114_v20  ;;  %v5116_v8 = vld [vmem:[%s8600_s18 + $0x40] sm:$0xff]  ;;  %v5117_v12 = vld [vmem:[%s8600_s18 + $0x48] sm:$0xff] }
0x1fc6   :  { %v4822_v54 = vmul.f32 %v4814_v53, %v8443_v17  ;;  %v4810_v23 = vadd.f32 1.0, %v6875_v33  ;;  %v4817_v43 = vmul.f32 0.5, %v4809_v51  ;;  %v6709_v53 = vpack.c.bf16 %v5117_v12, %v5116_v8  ;;  %v5118_v51 = vld [vmem:[%s8600_s18 + $0x50] sm:$0xff]  ;;  %v5119_v33 = vld [vmem:[%s8600_s18 + $0x58] sm:$0xff] }
0x1fc7   :  { %4956 = vmatprep.mubr.f32.mxu1 %v4820_v36  ;;  %v4816_v57 = vmul.f32 0.5, %v4808_v38  ;;  %v4823_v7 = vmul.f32 %v4815_v55, %v8455_v22  ;;  %v6712_v36 = vpack.c.bf16 %v5119_v33, %v5118_v51  ;;  %v5120_v38 = vld [vmem:[%s8600_s18 + $0x60] sm:$0xff]  ;;  %v5123_v55 = vld [vmem:[%s8600_s18 + $0x78] sm:$0xff] }
0x1fc8   :  { %5031 = vmatprep.mubr.f32.mxu0 %v4822_v54  ;;  %4957 = vmatmul.mubr.f32.vlgmr.msra.gmra.mrb[56].mxu1 %v4819_v62  ;;  %v4818_v25 = vmul.f32 0.5, %v4810_v23  ;;  %v4825_v46 = vmul.f32 %v4817_v43, %v8457_v45  ;;  %v5121_v62 = vld [vmem:[%s8600_s18 + $0x68] sm:$0xff]  ;;  %v5122_v23 = vld [vmem:[%s8600_s18 + $0x70] sm:$0xff] }
0x1fc9   :  { %5032 = vmatmul.mubr.f32.vlgmr.msra.gmra.mrb[60].mxu0 %v4821_v56  ;;  %v4824_v59 = vmul.f32 %v4816_v57, %v8461_v52  ;;  %v6715_v54 = vpack.c.bf16 %v5121_v62, %v5120_v38  ;;  %v6718_v56 = vpack.c.bf16 %v5123_v55, %v5122_v23 }
0x1fca   :  { %v4826_v50 = vmul.f32 %v4818_v25, %v8463_v58 }
0x1fcb   :  { %4961 = vmatprep.mubr.f32.mxu1 %v4824_v59 }
0x1fcc   :  { %5036 = vmatprep.mubr.f32.mxu0 %v4826_v50  ;;  %4962 = vmatmul.mubr.f32.gmra.mrb[58].mxu1 %v4823_v7 }
0x1fcd   :  { %5037 = vmatmul.mubr.f32.gmra.mrb[62].mxu0 %v4825_v46  ;;  %6149 = vmatprep.mubr.msk.f32.mxu1 %vm6983_vm0, %v6982_v5  ;;  %v5392_v5 = vld [vmem:[%s8597_s15 + $0x1] ss:$0 sm:$0xff]  ;;  %v5393_v46 = vld [vmem:[%s8598_s16] ss:$0 sm:$0xff] }
0x209b   :  { %v5756_v0 = vpop.f32.mrb[56].mxu1 }
0x209c   :  { %v5794_v17 = vpop.f32.mrb[60].mxu0  ;;  %v5757_v9 = vpop.f32.mrb[57].mxu1 }
0x209d   :  { %v5758_v63 = vadd.f32 %v5757_v9, %v5756_v0  ;;  %v5795_v47 = vpop.f32.mrb[61].mxu0 }
0x209e   :  { %v5796_v11 = vadd.f32 %v5795_v47, %v5794_v17 }
0x209f   :  { %v5759_v52 = vpop.f32.mrb[58].mxu1 }
0x20a0   :  { %v5034_v19 = vadd.f32 %v5796_v11, %v5758_v63  ;;  %v5797_v58 = vpop.f32.mrb[62].mxu0  ;;  %v5760_v40 = vpop.f32.mrb[59].mxu1  ;;  %v5394_v63 = vld [vmem:[%s8599_s17] ss:$0 sm:$0xff] }
0x20a1   :  { %v5761_v22 = vadd.f32 %v5760_v40, %v5759_v52  ;;  %v5798_v3 = vpop.f32.mrb[63].mxu0 }
0x20a2   :  { %v5799_v6 = vadd.f32 %v5798_v3, %v5797_v58  ;;  %v5042_v13 = vadd.f32 %v5034_v19, %v8213_v61  ;;  %v5108_v61 = vld [vmem:[%s8600_s18] sm:$0xff] }
0x20a3   :  { %v5395_v58 = vld [vmem:[%s8601_s19] ss:$0 sm:$0xff] }
0x20a4   :  { %v5039_v45 = vadd.f32 %v5799_v6, %v5761_v22  ;;  %v5052_v1 = vadd.f32 %v5392_v5, %v5042_v13 }
0x20a6   :  { %v5043_v14 = vadd.f32 %v5039_v45, %v8211_v16  ;;  %v5109_v16 = vld [vmem:[%s8600_s18 + $0x8] sm:$0xff] }
0x20a7   :  { %v6697_v44 = vpack.c.bf16 %v5109_v16, %v5108_v61 }
0x20a8   :  { %v5053_v15 = vadd.f32 %v5392_v5, %v5043_v14 }
0x20a9   :  { %6698 = vmatpush3.bf16.msra.mxu1 %v6697_v44 }
0x20aa   :  { %v5058_v18 = vrot.slane %v5053_v15, 7  ;;  %6699 = vmatprep.subr.bf16.mxu1 %v6987_v28 }
0x20ac   :  { %v5060_v21 = vsel %vm5059_vm5, %v5058_v18, %v5052_v1 }
0x20ad   :  { %v5063_v60 = vsel %vm5062_vm6, %v5060_v21, 0.0  ;;  %6701 = vmatpush3.bf16.msra.mxu1 %v6700_v32 }
0x20ae   :  { %5064 = vadd.xlane.f32.xlu0 %v5063_v60  ;;  %6702 = vmatprep.subr.bf16.mxu1 %v6987_v28 }
0x20b1   :  { %6704 = vmatpush3.bf16.msra.mxu1 %v6703_v29 }
0x20b2   :  { %6705 = vmatprep.subr.bf16.mxu1 %v6987_v28 }
0x20b5   :  { %6707 = vmatpush3.bf16.msra.mxu1 %v6706_v30 }
0x20b6   :  { %6708 = vmatprep.subr.bf16.mxu1 %v6987_v28 }
0x20b9   :  { %6710 = vmatpush3.bf16.msra.mxu1 %v6709_v53 }
0x20ba   :  { %6711 = vmatprep.subr.bf16.mxu1 %v6987_v28 }
0x20bd   :  { %6713 = vmatpush3.bf16.msra.mxu1 %v6712_v36 }
0x20be   :  { %6714 = vmatprep.subr.bf16.mxu1 %v6987_v28 }
0x20c1   :  { %6716 = vmatpush3.bf16.msra.mxu1 %v6715_v54 }
0x20c2   :  { %6717 = vmatprep.subr.bf16.mxu1 %v6987_v28 }
0x20c5   :  { %6719 = vmatpush3.bf16.msra.mxu1 %v6718_v56 }
0x213b   :  { %v5065_v34 = vpop.xlane.xlu0 %5064 }
0x213c   :  { %v5066_v10 = vmul.f32 0.0078125, %v5065_v34 }
0x213e   :  { %v5068_v35 = vrot.slane %v5066_v10, 1  ;;  %v5071_v37 = vsub.f32 %v5052_v1, %v5066_v10 }
0x2140   :  { %v5072_v2 = vsub.f32 %v5053_v15, %v5068_v35  ;;  %v5073_v41 = vmul.f32 %v5071_v37, %v5071_v37 }
0x2142   :  { %v5074_v48 = vmul.f32 %v5072_v2, %v5072_v2 }
0x2144   :  { %v5077_v39 = vrot.slane %v5074_v48, 7  ;;  %v5397_v48 = vld [vmem:[%s8603_s21] ss:$0 sm:$0xff] }
0x2146   :  { %v5078_v24 = vsel %vm5059_vm5, %v5077_v39, %v5073_v41 }
0x2147   :  { %v5080_v42 = vsel %vm5062_vm6, %v5078_v24, 0.0 }
0x2148   :  { %5081 = vadd.xlane.f32.xlu1 %v5080_v42 }
0x21d5   :  { %v5082_v57 = vpop.xlane.xlu1 %5081 }
0x21d6   :  { %v5083_v43 = vmul.f32 0.0078125, %v5082_v57 }
0x21d8   :  { %v5084_v25 = vadd.f32 1e-12, %v5083_v43 }
0x21da   :  { %6876 = vrsqrt.f32 %v5084_v25 }
0x21e4   :  { %v6877_v59 = vpop.eup %6876 }
0x21e5   :  { %v5087_v50 = vrot.slane %v6877_v59, 1  ;;  %v5090_v7 = vmul.f32 %v6877_v59, %v5071_v37  ;;  %v5396_v37 = vld [vmem:[%s8602_s20] ss:$0 sm:$0xff] }
0x21e7   :  { %v5091_v0 = vmul.f32 %v5087_v50, %v5072_v2  ;;  %v5098_v17 = vmul.f32 %v5393_v46, %v5090_v7 }
0x21e9   :  { %v5099_v9 = vmul.f32 %v5393_v46, %v5091_v0  ;;  %v5106_v11 = vadd.f32 %v5394_v63, %v5098_v17 }
0x21eb   :  { %v5107_v47 = vadd.f32 %v5394_v63, %v5099_v9 }
0x21ed   :  { %v5133_v52 = vrot.slane %v5107_v47, 7 }
0x21ef   :  { %v5134_v19 = vsel %vm5059_vm5, %v5133_v52, %v5106_v11 }
0x21f0   :  { %6150 = vmatmul.mubr.f32.vlgmr.msra.gmra.mrb[60].mxu1 %v5134_v19 }
0x22c3   :  { %v5202_v40 = vpop.f32.mrb[60].mxu1 }
0x22c4   :  { %v5203_v22 = vadd.f32 %v5395_v58, %v5202_v40  ;;  %v6151_v3 = vpop.f32.mrb[61].mxu1 }
0x22c6   :  { %v5206_v6 = vsel %vm5062_vm6, %v5203_v22, 0.0 }
0x22c7   :  { %v5207_v45 = vrot.slane %v5206_v6, 4 }
0x22c9   :  { %v5208_v13 = vadd.f32 %v5207_v45, %v5206_v6 }
0x22cb   :  { %v5209_v14 = vrot.slane %v5208_v13, 2 }
0x22cd   :  { %v5210_v5 = vadd.f32 %v5209_v14, %v5208_v13 }
0x22cf   :  { %v5211_v15 = vrot.slane %v5210_v5, 1 }
0x22d1   :  { %v5212_v1 = vadd.f32 %v5211_v15, %v5210_v5 }
0x22d3   :  { %v5214_v18 = vmul.f32 0.5, %v5212_v1 }
0x22d5   :  { %v5215_v21 = vsub.f32 %v5203_v22, %v5214_v18 }
0x22d7   :  { %v5216_v60 = vmul.f32 %v5215_v21, %v5215_v21 }
0x22d9   :  { %v5217_v61 = vsel %vm5062_vm6, %v5216_v60, 0.0 }
0x22da   :  { %v5218_v16 = vrot.slane %v5217_v61, 4 }
0x22dc   :  { %v5219_v26 = vadd.f32 %v5218_v16, %v5217_v61 }
0x22de   :  { %v5220_v28 = vrot.slane %v5219_v26, 2 }
0x22e0   :  { %v5221_v44 = vadd.f32 %v5220_v28, %v5219_v26 }
0x22e2   :  { %v5222_v31 = vrot.slane %v5221_v44, 1 }
0x22e4   :  { %v5223_v32 = vadd.f32 %v5222_v31, %v5221_v44 }
0x22e6   :  { %v5224_v34 = vmul.f32 0.5, %v5223_v32 }
0x22e8   :  { %v5225_v10 = vadd.f32 1e-05, %v5224_v34 }
0x22ea   :  { %6878 = vrsqrt.f32 %v5225_v10 }
0x22f4   :  { %v6879_v35 = vpop.eup %6878 }
0x22f5   :  { %v5227_v2 = vmul.f32 %v6879_v35, %v5215_v21 }
0x22f7   :  { %v5235_v41 = vmul.f32 %v5396_v37, %v5227_v2 }
0x22f9   :  { %v5243_v39 = vadd.f32 %v5397_v48, %v5235_v41 }
0x22fb   :  { %5244 = vst [vmem:[#allocation8] sm:$0x3] %v5243_v39 }
0x22fc   :  { %6958 = shalt.err (!%p6955_p0)
}
0x22fd   :  { %s8630_s23 = sld [smem:[#allocation19_spill]] }
0x2303   :  { %s6959_s1 = scalar_lea.hbm %s8630_s23, 32 }
0x2304   :  { %p6960_p1 = scmp.ne.s32.totalorder %s8630_s23, %s6959_s1  ;;  %p6963_p2 = scmp.lt.u32.totalorder %s6959_s1, %s8630_s23 }
0x2306   :  { %p6965_p3 = pnand %p6963_p2, %p6960_p1 }
0x2308   :  { %6968 = shalt.err (!%p6965_p3)
}
0x2309   :  { %5254 = dma.vmem_to_hbm [thread:$0]  %s5252_s6, 32, %s8630_s23, [#allocation4]  }
0x230a   :  { %6973 = dma.done.wait [#allocation4], 32  }
0x230b   :  { %6974 = vsyncadd [#allocation4], 4294967264 }
0x230c   :  { %5258 = vsyncpa [#allocation3], 1 }
0x230d   :  { %5259 = vsyncpa [#allocation6], 1 }
0x230e   :  { %5260 = vsyncpa [#allocation4], 1 }

</bundles_post_ra>
